<compile_context>
chip_gen: v7x
topology: tpu7x:2x2x1
jax: 0.10.0
libtpu: 0.0.40
codegen_flags: <defaults>
</compile_context>

<pallas_src>
import functools

import numpy as np

import jax
import jax.numpy as jnp
from jax.experimental import pallas as pl
from jax.experimental.pallas import tpu as pltpu


def _elu(v):
    # ELU(alpha=1): x if x > 0 else exp(x) - 1   (clamp arg of exp for safety)
    return jnp.where(v > 0, v, jnp.exp(jnp.minimum(v, 0.0)) - 1.0)


def lp_kernel(x_ref, w1_ref, b1_ref, w2_ref, b2_ref,
              fw1_ref, fb1_ref, fw2_ref, fb2_ref, o_ref, p_ref):
    bsz = x_ref.shape[1]                    # images in this block (lane axis)
    xb = x_ref[...]                         # (256, B) raw flattened 16x16
    b1 = b1_ref[...]                        # (48, 1)  conv1 bias, pooled layout
    b2 = b2_ref[...]                        # (32, 1)  conv2 bias, pooled layout

    # Leading 48-row zero block of the pooled buffer = conv2's top spatial pad.
    p_ref[0:48, :] = jnp.zeros((48, bsz), jnp.float32)

    # ---- conv1 (1->6, k=5, pad=1) fused with 2x2 max-pool -------------------
    # One banded MXU dot per pooled-row pair.  Row layout of the (192,B)
    # result (folded into w1_ref on the host):
    #   [  0, 48): conv row 2ph, even cols   (sublane = ci*8 + ow/2)
    #   [ 48, 96): conv row 2ph, odd  cols
    #   [ 96,144): conv row 2ph+1, even cols
    #   [144,192): conv row 2ph+1, odd  cols
    # so the 2x2 pool is a pure 4-way element-wise max of aligned 48-row
    # slices.  Bias + ELU are applied AFTER the pool (exact: ELU monotone,
    # per-channel bias).  Result stored at 48-row stride into the scratch.
    for ph in range(7):
        y = jnp.dot(w1_ref[ph], xb, preferred_element_type=jnp.float32)
        m = jnp.maximum(jnp.maximum(y[0:48], y[48:96]),
                        jnp.maximum(y[96:144], y[144:192]))          # (48, B)
        p_ref[(ph + 1) * 48:(ph + 2) * 48, :] = _elu(m + b1)

    # TODO(synk): F.dropout(p=0.6) is identity in eval mode; training-mode
    # dropout (pltpu.prng_*) is not implemented here.

    # ---- conv2 (6->16, k=5, pad=1) + 2x2 pool + fc1 + ELU -------------------
    # Each conv2 output row oh (only 0..3 are ever pooled) is ONE dot of the
    # (64,240) band against the contiguous 240-row slab p_ref[oh*48:oh*48+240]
    # (5 pooled rows incl. the zero pad block; spatial column padding and the
    # unused output column 4 are folded into / dropped from the band).
    # Row layout: [0,32) = output cols {0,2}, [32,64) = cols {1,3}, so pooling
    # is again a pure aligned halves/pair max; bias + ELU after the pool.
    h = fb1_ref[...]                        # (16, 1)
    w2b = w2_ref[...]                       # (64, 240)
    for ph2 in range(2):
        ra = jnp.dot(w2b, p_ref[(2 * ph2) * 48:(2 * ph2) * 48 + 240, :],
                     preferred_element_type=jnp.float32)             # (64, B)
        rb = jnp.dot(w2b, p_ref[(2 * ph2 + 1) * 48:(2 * ph2 + 1) * 48 + 240, :],
                     preferred_element_type=jnp.float32)
        m = jnp.maximum(ra, rb)
        feat = _elu(jnp.maximum(m[0:32], m[32:64]) + b2)             # (32, B)
        h = h + jnp.dot(fw1_ref[ph2], feat, preferred_element_type=jnp.float32)
    h = _elu(h)                                                      # (16, B)

    # ---- fc2 (16->2), lane-dense (2, B) store -------------------------------
    o_ref[...] = (jnp.dot(fw2_ref[...], h,
                          preferred_element_type=jnp.float32) + fb2_ref[...])


@functools.lru_cache(maxsize=1)
def _conv_index_tables():
    """Static gather tables folding padding / pooling layout into the bands."""
    # conv1 band: (7 pooled-row pairs, 192 rows, 256 input pixels).
    # Gather index into w1[:,0].reshape(150); 150 -> zero entry.
    i1 = np.full((7, 192, 256), 150, dtype=np.int32)
    for ph in range(7):
        for rr in range(2):                          # conv row within the pair
            oh = 2 * ph + rr
            for par in range(2):                     # 0: even cols, 1: odd
                base = rr * 96 + par * 48
                for ci in range(6):                  # conv1 output channel
                    for j in range(7):
                        ow = 2 * j + par
                        r = base + ci * 8 + j        # sublane ci*8+7 stays pad
                        for kh in range(5):
                            ir = oh + kh - 1
                            if not 0 <= ir < 16:
                                continue
                            for kw in range(5):
                                ic = ow + kw - 1
                                if not 0 <= ic < 16:
                                    continue
                                i1[ph, r, ir * 16 + ic] = (ci * 5 + kh) * 5 + kw

    # conv2 band: (64 rows, 240 = 5 pooled-row blocks * 48).
    # Gather index into w2.reshape(2400); 2400 -> zero entry.
    i2 = np.full((64, 240), 2400, dtype=np.int32)
    for par in range(2):                             # 0: cols {0,2}, 1: {1,3}
        for co in range(16):
            for j in range(2):
                ow2 = 2 * j + par
                r = par * 32 + co * 2 + j
                for kh in range(5):
                    for ci in range(6):
                        for pw in range(7):
                            kw = pw - ow2 + 1
                            if 0 <= kw < 5:
                                i2[r, kh * 48 + ci * 8 + pw] = \
                                    ((co * 6 + ci) * 5 + kh) * 5 + kw

    # conv1 pooled-layout bias index: (48,) into b1 (6 -> zero pad sublane).
    ib1 = np.full((48,), 6, dtype=np.int32)
    for ci in range(6):
        ib1[ci * 8:ci * 8 + 7] = ci
    return i1, i2, ib1


def _prep_constants(params):
    """Fold padding / pooling layout / flatten order into the weights."""
    w1, b1, w2, b2, fw1, fb1, fw2, fb2 = [p.astype(jnp.float32) for p in params]
    i1, i2, ib1 = _conv_index_tables()

    w1_flat = jnp.concatenate([w1[:, 0].reshape(-1),
                               jnp.zeros((1,), jnp.float32)])
    w1p = w1_flat[i1]                                         # (7, 192, 256)
    b1_flat = jnp.concatenate([b1, jnp.zeros((1,), jnp.float32)])
    b1p = b1_flat[ib1].reshape(48, 1)

    w2_flat = jnp.concatenate([w2.reshape(-1), jnp.zeros((1,), jnp.float32)])
    w2b = w2_flat[i2]                                         # (64, 240)
    b2p = jnp.repeat(b2, 2).reshape(32, 1)                    # feature co*2+pw

    # fc1 split per pooled output row; feature layout co*2 + pw matches the
    # PyTorch (c, h, w) flatten order c*4 + h*2 + w.
    fw1_r = fw1.reshape(16, 16, 2, 2)
    fw1p = jnp.stack([fw1_r[:, :, 0, :].reshape(16, 32),
                      fw1_r[:, :, 1, :].reshape(16, 32)], axis=0)   # (2,16,32)

    return (w1p, b1p, w2b, b2p, fw1p,
            fb1.reshape(16, 1), fw2, fb2.reshape(2, 1))


def _round_up(a, m):
    return (a + m - 1) // m * m


@jax.jit
def lp_forward(x, params):
    """x: (N, 1, 16, 16) float32 (NCHW, matching the PyTorch module)."""
    n = x.shape[0]
    # Lane block of images: multiple of 128 (lane-dense, full MXU N).  For
    # n > 128 split into >= 2 blocks so the "parallel" grid axis can shard
    # across v7x's two TensorCores; cap at 512 lanes (per-block residents
    # ~3.5 MB, well inside v5e's 16 MiB scoped-VMEM default).
    if n <= 128:
        block_b = 128
    else:
        block_b = min(512, _round_up(-(-n // 2), 128))
    npad = _round_up(n, block_b)

    # Raw 16x16 images flattened to 256 sublanes, batch on the lane axis
    # (conv1's spatial zero-padding is folded into the band weights).
    xcols = jnp.pad(x[:, 0].astype(jnp.float32).reshape(n, 256),
                    ((0, npad - n), (0, 0))).T                # (256, npad)

    consts = _prep_constants(params)

    def _const_spec(arr):
        nd = arr.ndim
        return pl.BlockSpec(arr.shape, lambda i, _nd=nd: (0,) * _nd)

    out = pl.pallas_call(
        lp_kernel,
        out_shape=jax.ShapeDtypeStruct((2, npad), jnp.float32),
        grid_spec=pltpu.PrefetchScalarGridSpec(
            num_scalar_prefetch=0,
            grid=(npad // block_b,),
            in_specs=[pl.BlockSpec((256, block_b), lambda i: (0, i))]
                     + [_const_spec(c) for c in consts],
            out_specs=pl.BlockSpec((2, block_b), lambda i: (0, i)),
            # Pooled conv1 maps, stacked at 48-row stride behind one zero
            # block (conv2's top spatial pad): 8 * 48 = 384 rows.
            scratch_shapes=[pltpu.VMEM((384, block_b), jnp.float32)]),
        compiler_params=pltpu.CompilerParams(
            dimension_semantics=("parallel",)),
    )(xcols, *consts)
    return out[:, :n].T                                       # (N, 2)


def lp_reference(x, params):
    """Pure-JAX reference matching the PyTorch forward (eval mode)."""
    w1, b1, w2, b2, fw1, fb1, fw2, fb2 = params

    def conv(v, w, b):
        y = jax.lax.conv_general_dilated(
            v, w, (1, 1), [(1, 1), (1, 1)],
            dimension_numbers=("NCHW", "OIHW", "NCHW"))
        return y + b[None, :, None, None]

    def elu(v):
        return jnp.where(v > 0, v, jnp.exp(jnp.minimum(v, 0.0)) - 1.0)

    def pool(v):
        nb, c, hh, ww = v.shape
        hf, wf = (hh // 2) * 2, (ww // 2) * 2
        v = v[:, :, :hf, :wf].reshape(nb, c, hf // 2, 2, wf // 2, 2)
        return jnp.max(v, axis=(3, 5))

    h = pool(elu(conv(x, w1, b1)))
    h = pool(elu(conv(h, w2, b2)))
    h = h.reshape(x.shape[0], -1)
    h = elu(h @ fw1.T + fb1)
    return h @ fw2.T + fb2


if __name__ == "__main__":
    key = jax.random.PRNGKey(0)
    kx, *ks = jax.random.split(key, 9)

    # Deterministic synthetic parameters (shapes from LP.__init__).
    params = (
        jax.random.normal(ks[0], (6, 1, 5, 5), jnp.float32) * 0.2,   # conv1.w
        jax.random.normal(ks[1], (6,), jnp.float32) * 0.1,           # conv1.b
        jax.random.normal(ks[2], (16, 6, 5, 5), jnp.float32) * 0.1,  # conv2.w
        jax.random.normal(ks[3], (16,), jnp.float32) * 0.1,          # conv2.b
        jax.random.normal(ks[4], (16, 64), jnp.float32) * 0.1,       # fc1.w
        jax.random.normal(ks[5], (16,), jnp.float32) * 0.1,          # fc1.b
        jax.random.normal(ks[6], (2, 16), jnp.float32) * 0.1,        # fc2.w
        jax.random.normal(ks[7], (2,), jnp.float32) * 0.1,           # fc2.b
    )

    # Input spatial size 16x16 is implied by fc1's 16*2*2 flat features.
    x = jax.random.normal(kx, (2, 1, 16, 16), jnp.float32)

    out = lp_forward(x, params)
    jax.block_until_ready(out)

    ref = lp_reference(x, params)
    assert out.shape == (2, 2)
    assert jnp.allclose(out, ref, atol=5e-4, rtol=5e-4), (
        "max abs err %g" % float(jnp.max(jnp.abs(out - ref))))
    print("KERNEL_OK")
</pallas_src>

<mosaic_0001>
module attributes {stable_mosaic.version = 11 : i64} {
  func.func @lp_kernel(%arg0: i32, %arg1: memref<256x128xf32, #tpu.memory_space<vmem>>, %arg2: memref<7x192x256xf32, #tpu.memory_space<vmem>>, %arg3: memref<48x1xf32, #tpu.memory_space<vmem>>, %arg4: memref<64x240xf32, #tpu.memory_space<vmem>>, %arg5: memref<32x1xf32, #tpu.memory_space<vmem>>, %arg6: memref<2x16x32xf32, #tpu.memory_space<vmem>>, %arg7: memref<16x1xf32, #tpu.memory_space<vmem>>, %arg8: memref<2x16xf32, #tpu.memory_space<vmem>>, %arg9: memref<2x1xf32, #tpu.memory_space<vmem>>, %arg10: memref<2x128xf32, #tpu.memory_space<vmem>>, %arg11: memref<384x128xf32, #tpu.memory_space<vmem>>) attributes {dimension_semantics = [#tpu.dimension_semantics<parallel>], iteration_bounds = array<i64: 1>, scalar_prefetch = 0 : i64, scratch_operands = 1 : i64, tpu.core_type = #tpu.core_type<tc>, window_params = [{transform_indices = @transform_0, window_bounds = array<i64: 256, 128>}, {pipeline_mode = #tpu.pipeline_mode<synchronous>, transform_indices = @transform_1, window_bounds = array<i64: 7, 192, 256>}, {pipeline_mode = #tpu.pipeline_mode<synchronous>, transform_indices = @transform_2, window_bounds = array<i64: 48, 1>}, {pipeline_mode = #tpu.pipeline_mode<synchronous>, transform_indices = @transform_3, window_bounds = array<i64: 64, 240>}, {pipeline_mode = #tpu.pipeline_mode<synchronous>, transform_indices = @transform_4, window_bounds = array<i64: 32, 1>}, {pipeline_mode = #tpu.pipeline_mode<synchronous>, transform_indices = @transform_5, window_bounds = array<i64: 2, 16, 32>}, {pipeline_mode = #tpu.pipeline_mode<synchronous>, transform_indices = @transform_6, window_bounds = array<i64: 16, 1>}, {pipeline_mode = #tpu.pipeline_mode<synchronous>, transform_indices = @transform_7, window_bounds = array<i64: 2, 16>}, {pipeline_mode = #tpu.pipeline_mode<synchronous>, transform_indices = @transform_8, window_bounds = array<i64: 2, 1>}, {transform_indices = @transform_9, window_bounds = array<i64: 2, 128>}]} {
    %c0 = arith.constant 0 : index
    %c0_0 = arith.constant 0 : index
    %0 = vector.load %arg1[%c0, %c0_0] : memref<256x128xf32, #tpu.memory_space<vmem>>, vector<256x128xf32>
    %c0_1 = arith.constant 0 : index
    %c0_2 = arith.constant 0 : index
    %1 = vector.load %arg3[%c0_1, %c0_2] : memref<48x1xf32, #tpu.memory_space<vmem>>, vector<48x1xf32>
    %c0_3 = arith.constant 0 : index
    %c0_4 = arith.constant 0 : index
    %2 = vector.load %arg5[%c0_3, %c0_4] : memref<32x1xf32, #tpu.memory_space<vmem>>, vector<32x1xf32>
    %cst = arith.constant 0.000000e+00 : f32
    %3 = vector.broadcast %cst : f32 to vector<48x128xf32>
    %c0_5 = arith.constant 0 : index
    %c0_6 = arith.constant 0 : index
    %4 = vector.load %arg11[%c0_5, %c0_6] : memref<384x128xf32, #tpu.memory_space<vmem>>, vector<48x128xf32>
    tpu.vector_store %arg11[%c0_5, %c0_6], %3 {strides = array<i32>} : memref<384x128xf32, #tpu.memory_space<vmem>>, vector<48x128xf32>,
    %c0_7 = arith.constant 0 : index
    %c0_8 = arith.constant 0 : index
    %c0_9 = arith.constant 0 : index
    %5 = vector.load %arg2[%c0_7, %c0_8, %c0_9] : memref<7x192x256xf32, #tpu.memory_space<vmem>>, vector<1x192x256xf32>
    %6 = vector.shape_cast %5 : vector<1x192x256xf32> to vector<192x256xf32>
    %cst_10 = arith.constant dense<0.000000e+00> : vector<192x128xf32>
    %7 = tpu.matmul %6, %0, %cst_10 {dimension_numbers = #tpu.dot_dimension_numbers<[1], [0], [0], [1], [0, 0, 1, 1], [], []>} : vector<192x256xf32>, vector<256x128xf32>, vector<192x128xf32> -> vector<192x128xf32>
    %8 = vector.extract_strided_slice %7 {offsets = [0, 0], sizes = [48, 128], strides = [1, 1]} : vector<192x128xf32> to vector<48x128xf32>
    %9 = vector.extract_strided_slice %7 {offsets = [48, 0], sizes = [48, 128], strides = [1, 1]} : vector<192x128xf32> to vector<48x128xf32>
    %10 = arith.maximumf %8, %9 : vector<48x128xf32>
    %11 = vector.extract_strided_slice %7 {offsets = [96, 0], sizes = [48, 128], strides = [1, 1]} : vector<192x128xf32> to vector<48x128xf32>
    %12 = vector.extract_strided_slice %7 {offsets = [144, 0], sizes = [48, 128], strides = [1, 1]} : vector<192x128xf32> to vector<48x128xf32>
    %13 = arith.maximumf %11, %12 : vector<48x128xf32>
    %14 = arith.maximumf %10, %13 : vector<48x128xf32>
    %15 = vector.broadcast %1 : vector<48x1xf32> to vector<48x128xf32>
    %16 = arith.addf %14, %15 : vector<48x128xf32>
    %cst_11 = arith.constant 0.000000e+00 : f32
    %17 = vector.broadcast %cst_11 : f32 to vector<48x128xf32>
    %18 = arith.cmpf ogt, %16, %17 : vector<48x128xf32>
    %cst_12 = arith.constant 0.000000e+00 : f32
    %19 = vector.broadcast %cst_12 : f32 to vector<48x128xf32>
    %20 = arith.minimumf %16, %19 : vector<48x128xf32>
    %21 = math.exp %20 : vector<48x128xf32>
    %cst_13 = arith.constant 1.000000e+00 : f32
    %22 = vector.broadcast %cst_13 : f32 to vector<48x128xf32>
    %23 = arith.subf %21, %22 : vector<48x128xf32>
    %24 = arith.select %18, %16, %23 : vector<48x128xi1>, vector<48x128xf32>
    %c48 = arith.constant 48 : index
    %c0_14 = arith.constant 0 : index
    %25 = vector.load %arg11[%c48, %c0_14] : memref<384x128xf32, #tpu.memory_space<vmem>>, vector<48x128xf32>
    tpu.vector_store %arg11[%c48, %c0_14], %24 {strides = array<i32>} : memref<384x128xf32, #tpu.memory_space<vmem>>, vector<48x128xf32>,
    %c1 = arith.constant 1 : index
    %c0_15 = arith.constant 0 : index
    %c0_16 = arith.constant 0 : index
    %26 = vector.load %arg2[%c1, %c0_15, %c0_16] : memref<7x192x256xf32, #tpu.memory_space<vmem>>, vector<1x192x256xf32>
    %27 = vector.shape_cast %26 : vector<1x192x256xf32> to vector<192x256xf32>
    %cst_17 = arith.constant dense<0.000000e+00> : vector<192x128xf32>
    %28 = tpu.matmul %27, %0, %cst_17 {dimension_numbers = #tpu.dot_dimension_numbers<[1], [0], [0], [1], [0, 0, 1, 1], [], []>} : vector<192x256xf32>, vector<256x128xf32>, vector<192x128xf32> -> vector<192x128xf32>
    %29 = vector.extract_strided_slice %28 {offsets = [0, 0], sizes = [48, 128], strides = [1, 1]} : vector<192x128xf32> to vector<48x128xf32>
    %30 = vector.extract_strided_slice %28 {offsets = [48, 0], sizes = [48, 128], strides = [1, 1]} : vector<192x128xf32> to vector<48x128xf32>
    %31 = arith.maximumf %29, %30 : vector<48x128xf32>
    %32 = vector.extract_strided_slice %28 {offsets = [96, 0], sizes = [48, 128], strides = [1, 1]} : vector<192x128xf32> to vector<48x128xf32>
    %33 = vector.extract_strided_slice %28 {offsets = [144, 0], sizes = [48, 128], strides = [1, 1]} : vector<192x128xf32> to vector<48x128xf32>
    %34 = arith.maximumf %32, %33 : vector<48x128xf32>
    %35 = arith.maximumf %31, %34 : vector<48x128xf32>
    %36 = vector.broadcast %1 : vector<48x1xf32> to vector<48x128xf32>
    %37 = arith.addf %35, %36 : vector<48x128xf32>
    %cst_18 = arith.constant 0.000000e+00 : f32
    %38 = vector.broadcast %cst_18 : f32 to vector<48x128xf32>
    %39 = arith.cmpf ogt, %37, %38 : vector<48x128xf32>
    %cst_19 = arith.constant 0.000000e+00 : f32
    %40 = vector.broadcast %cst_19 : f32 to vector<48x128xf32>
    %41 = arith.minimumf %37, %40 : vector<48x128xf32>
    %42 = math.exp %41 : vector<48x128xf32>
    %cst_20 = arith.constant 1.000000e+00 : f32
    %43 = vector.broadcast %cst_20 : f32 to vector<48x128xf32>
    %44 = arith.subf %42, %43 : vector<48x128xf32>
    %45 = arith.select %39, %37, %44 : vector<48x128xi1>, vector<48x128xf32>
    %c96 = arith.constant 96 : index
    %c0_21 = arith.constant 0 : index
    %46 = vector.load %arg11[%c96, %c0_21] : memref<384x128xf32, #tpu.memory_space<vmem>>, vector<48x128xf32>
    tpu.vector_store %arg11[%c96, %c0_21], %45 {strides = array<i32>} : memref<384x128xf32, #tpu.memory_space<vmem>>, vector<48x128xf32>,
    %c2 = arith.constant 2 : index
    %c0_22 = arith.constant 0 : index
    %c0_23 = arith.constant 0 : index
    %47 = vector.load %arg2[%c2, %c0_22, %c0_23] : memref<7x192x256xf32, #tpu.memory_space<vmem>>, vector<1x192x256xf32>
    %48 = vector.shape_cast %47 : vector<1x192x256xf32> to vector<192x256xf32>
    %cst_24 = arith.constant dense<0.000000e+00> : vector<192x128xf32>
    %49 = tpu.matmul %48, %0, %cst_24 {dimension_numbers = #tpu.dot_dimension_numbers<[1], [0], [0], [1], [0, 0, 1, 1], [], []>} : vector<192x256xf32>, vector<256x128xf32>, vector<192x128xf32> -> vector<192x128xf32>
    %50 = vector.extract_strided_slice %49 {offsets = [0, 0], sizes = [48, 128], strides = [1, 1]} : vector<192x128xf32> to vector<48x128xf32>
    %51 = vector.extract_strided_slice %49 {offsets = [48, 0], sizes = [48, 128], strides = [1, 1]} : vector<192x128xf32> to vector<48x128xf32>
    %52 = arith.maximumf %50, %51 : vector<48x128xf32>
    %53 = vector.extract_strided_slice %49 {offsets = [96, 0], sizes = [48, 128], strides = [1, 1]} : vector<192x128xf32> to vector<48x128xf32>
    %54 = vector.extract_strided_slice %49 {offsets = [144, 0], sizes = [48, 128], strides = [1, 1]} : vector<192x128xf32> to vector<48x128xf32>
    %55 = arith.maximumf %53, %54 : vector<48x128xf32>
    %56 = arith.maximumf %52, %55 : vector<48x128xf32>
    %57 = vector.broadcast %1 : vector<48x1xf32> to vector<48x128xf32>
    %58 = arith.addf %56, %57 : vector<48x128xf32>
    %cst_25 = arith.constant 0.000000e+00 : f32
    %59 = vector.broadcast %cst_25 : f32 to vector<48x128xf32>
    %60 = arith.cmpf ogt, %58, %59 : vector<48x128xf32>
    %cst_26 = arith.constant 0.000000e+00 : f32
    %61 = vector.broadcast %cst_26 : f32 to vector<48x128xf32>
    %62 = arith.minimumf %58, %61 : vector<48x128xf32>
    %63 = math.exp %62 : vector<48x128xf32>
    %cst_27 = arith.constant 1.000000e+00 : f32
    %64 = vector.broadcast %cst_27 : f32 to vector<48x128xf32>
    %65 = arith.subf %63, %64 : vector<48x128xf32>
    %66 = arith.select %60, %58, %65 : vector<48x128xi1>, vector<48x128xf32>
    %c144 = arith.constant 144 : index
    %c0_28 = arith.constant 0 : index
    %67 = vector.load %arg11[%c144, %c0_28] : memref<384x128xf32, #tpu.memory_space<vmem>>, vector<48x128xf32>
    tpu.vector_store %arg11[%c144, %c0_28], %66 {strides = array<i32>} : memref<384x128xf32, #tpu.memory_space<vmem>>, vector<48x128xf32>,
    %c3 = arith.constant 3 : index
    %c0_29 = arith.constant 0 : index
    %c0_30 = arith.constant 0 : index
    %68 = vector.load %arg2[%c3, %c0_29, %c0_30] : memref<7x192x256xf32, #tpu.memory_space<vmem>>, vector<1x192x256xf32>
    %69 = vector.shape_cast %68 : vector<1x192x256xf32> to vector<192x256xf32>
    %cst_31 = arith.constant dense<0.000000e+00> : vector<192x128xf32>
    %70 = tpu.matmul %69, %0, %cst_31 {dimension_numbers = #tpu.dot_dimension_numbers<[1], [0], [0], [1], [0, 0, 1, 1], [], []>} : vector<192x256xf32>, vector<256x128xf32>, vector<192x128xf32> -> vector<192x128xf32>
    %71 = vector.extract_strided_slice %70 {offsets = [0, 0], sizes = [48, 128], strides = [1, 1]} : vector<192x128xf32> to vector<48x128xf32>
    %72 = vector.extract_strided_slice %70 {offsets = [48, 0], sizes = [48, 128], strides = [1, 1]} : vector<192x128xf32> to vector<48x128xf32>
    %73 = arith.maximumf %71, %72 : vector<48x128xf32>
    %74 = vector.extract_strided_slice %70 {offsets = [96, 0], sizes = [48, 128], strides = [1, 1]} : vector<192x128xf32> to vector<48x128xf32>
    %75 = vector.extract_strided_slice %70 {offsets = [144, 0], sizes = [48, 128], strides = [1, 1]} : vector<192x128xf32> to vector<48x128xf32>
    %76 = arith.maximumf %74, %75 : vector<48x128xf32>
    %77 = arith.maximumf %73, %76 : vector<48x128xf32>
    %78 = vector.broadcast %1 : vector<48x1xf32> to vector<48x128xf32>
    %79 = arith.addf %77, %78 : vector<48x128xf32>
    %cst_32 = arith.constant 0.000000e+00 : f32
    %80 = vector.broadcast %cst_32 : f32 to vector<48x128xf32>
    %81 = arith.cmpf ogt, %79, %80 : vector<48x128xf32>
    %cst_33 = arith.constant 0.000000e+00 : f32
    %82 = vector.broadcast %cst_33 : f32 to vector<48x128xf32>
    %83 = arith.minimumf %79, %82 : vector<48x128xf32>
    %84 = math.exp %83 : vector<48x128xf32>
    %cst_34 = arith.constant 1.000000e+00 : f32
    %85 = vector.broadcast %cst_34 : f32 to vector<48x128xf32>
    %86 = arith.subf %84, %85 : vector<48x128xf32>
    %87 = arith.select %81, %79, %86 : vector<48x128xi1>, vector<48x128xf32>
    %c192 = arith.constant 192 : index
    %c0_35 = arith.constant 0 : index
    %88 = vector.load %arg11[%c192, %c0_35] : memref<384x128xf32, #tpu.memory_space<vmem>>, vector<48x128xf32>
    tpu.vector_store %arg11[%c192, %c0_35], %87 {strides = array<i32>} : memref<384x128xf32, #tpu.memory_space<vmem>>, vector<48x128xf32>,
    %c4 = arith.constant 4 : index
    %c0_36 = arith.constant 0 : index
    %c0_37 = arith.constant 0 : index
    %89 = vector.load %arg2[%c4, %c0_36, %c0_37] : memref<7x192x256xf32, #tpu.memory_space<vmem>>, vector<1x192x256xf32>
    %90 = vector.shape_cast %89 : vector<1x192x256xf32> to vector<192x256xf32>
    %cst_38 = arith.constant dense<0.000000e+00> : vector<192x128xf32>
    %91 = tpu.matmul %90, %0, %cst_38 {dimension_numbers = #tpu.dot_dimension_numbers<[1], [0], [0], [1], [0, 0, 1, 1], [], []>} : vector<192x256xf32>, vector<256x128xf32>, vector<192x128xf32> -> vector<192x128xf32>
    %92 = vector.extract_strided_slice %91 {offsets = [0, 0], sizes = [48, 128], strides = [1, 1]} : vector<192x128xf32> to vector<48x128xf32>
    %93 = vector.extract_strided_slice %91 {offsets = [48, 0], sizes = [48, 128], strides = [1, 1]} : vector<192x128xf32> to vector<48x128xf32>
    %94 = arith.maximumf %92, %93 : vector<48x128xf32>
    %95 = vector.extract_strided_slice %91 {offsets = [96, 0], sizes = [48, 128], strides = [1, 1]} : vector<192x128xf32> to vector<48x128xf32>
    %96 = vector.extract_strided_slice %91 {offsets = [144, 0], sizes = [48, 128], strides = [1, 1]} : vector<192x128xf32> to vector<48x128xf32>
    %97 = arith.maximumf %95, %96 : vector<48x128xf32>
    %98 = arith.maximumf %94, %97 : vector<48x128xf32>
    %99 = vector.broadcast %1 : vector<48x1xf32> to vector<48x128xf32>
    %100 = arith.addf %98, %99 : vector<48x128xf32>
    %cst_39 = arith.constant 0.000000e+00 : f32
    %101 = vector.broadcast %cst_39 : f32 to vector<48x128xf32>
    %102 = arith.cmpf ogt, %100, %101 : vector<48x128xf32>
    %cst_40 = arith.constant 0.000000e+00 : f32
    %103 = vector.broadcast %cst_40 : f32 to vector<48x128xf32>
    %104 = arith.minimumf %100, %103 : vector<48x128xf32>
    %105 = math.exp %104 : vector<48x128xf32>
    %cst_41 = arith.constant 1.000000e+00 : f32
    %106 = vector.broadcast %cst_41 : f32 to vector<48x128xf32>
    %107 = arith.subf %105, %106 : vector<48x128xf32>
    %108 = arith.select %102, %100, %107 : vector<48x128xi1>, vector<48x128xf32>
    %c240 = arith.constant 240 : index
    %c0_42 = arith.constant 0 : index
    %109 = vector.load %arg11[%c240, %c0_42] : memref<384x128xf32, #tpu.memory_space<vmem>>, vector<48x128xf32>
    tpu.vector_store %arg11[%c240, %c0_42], %108 {strides = array<i32>} : memref<384x128xf32, #tpu.memory_space<vmem>>, vector<48x128xf32>,
    %c5 = arith.constant 5 : index
    %c0_43 = arith.constant 0 : index
    %c0_44 = arith.constant 0 : index
    %110 = vector.load %arg2[%c5, %c0_43, %c0_44] : memref<7x192x256xf32, #tpu.memory_space<vmem>>, vector<1x192x256xf32>
    %111 = vector.shape_cast %110 : vector<1x192x256xf32> to vector<192x256xf32>
    %cst_45 = arith.constant dense<0.000000e+00> : vector<192x128xf32>
    %112 = tpu.matmul %111, %0, %cst_45 {dimension_numbers = #tpu.dot_dimension_numbers<[1], [0], [0], [1], [0, 0, 1, 1], [], []>} : vector<192x256xf32>, vector<256x128xf32>, vector<192x128xf32> -> vector<192x128xf32>
    %113 = vector.extract_strided_slice %112 {offsets = [0, 0], sizes = [48, 128], strides = [1, 1]} : vector<192x128xf32> to vector<48x128xf32>
    %114 = vector.extract_strided_slice %112 {offsets = [48, 0], sizes = [48, 128], strides = [1, 1]} : vector<192x128xf32> to vector<48x128xf32>
    %115 = arith.maximumf %113, %114 : vector<48x128xf32>
    %116 = vector.extract_strided_slice %112 {offsets = [96, 0], sizes = [48, 128], strides = [1, 1]} : vector<192x128xf32> to vector<48x128xf32>
    %117 = vector.extract_strided_slice %112 {offsets = [144, 0], sizes = [48, 128], strides = [1, 1]} : vector<192x128xf32> to vector<48x128xf32>
    %118 = arith.maximumf %116, %117 : vector<48x128xf32>
    %119 = arith.maximumf %115, %118 : vector<48x128xf32>
    %120 = vector.broadcast %1 : vector<48x1xf32> to vector<48x128xf32>
    %121 = arith.addf %119, %120 : vector<48x128xf32>
    %cst_46 = arith.constant 0.000000e+00 : f32
    %122 = vector.broadcast %cst_46 : f32 to vector<48x128xf32>
    %123 = arith.cmpf ogt, %121, %122 : vector<48x128xf32>
    %cst_47 = arith.constant 0.000000e+00 : f32
    %124 = vector.broadcast %cst_47 : f32 to vector<48x128xf32>
    %125 = arith.minimumf %121, %124 : vector<48x128xf32>
    %126 = math.exp %125 : vector<48x128xf32>
    %cst_48 = arith.constant 1.000000e+00 : f32
    %127 = vector.broadcast %cst_48 : f32 to vector<48x128xf32>
    %128 = arith.subf %126, %127 : vector<48x128xf32>
    %129 = arith.select %123, %121, %128 : vector<48x128xi1>, vector<48x128xf32>
    %c288 = arith.constant 288 : index
    %c0_49 = arith.constant 0 : index
    %130 = vector.load %arg11[%c288, %c0_49] : memref<384x128xf32, #tpu.memory_space<vmem>>, vector<48x128xf32>
    tpu.vector_store %arg11[%c288, %c0_49], %129 {strides = array<i32>} : memref<384x128xf32, #tpu.memory_space<vmem>>, vector<48x128xf32>,
    %c6 = arith.constant 6 : index
    %c0_50 = arith.constant 0 : index
    %c0_51 = arith.constant 0 : index
    %131 = vector.load %arg2[%c6, %c0_50, %c0_51] : memref<7x192x256xf32, #tpu.memory_space<vmem>>, vector<1x192x256xf32>
    %132 = vector.shape_cast %131 : vector<1x192x256xf32> to vector<192x256xf32>
    %cst_52 = arith.constant dense<0.000000e+00> : vector<192x128xf32>
    %133 = tpu.matmul %132, %0, %cst_52 {dimension_numbers = #tpu.dot_dimension_numbers<[1], [0], [0], [1], [0, 0, 1, 1], [], []>} : vector<192x256xf32>, vector<256x128xf32>, vector<192x128xf32> -> vector<192x128xf32>
    %134 = vector.extract_strided_slice %133 {offsets = [0, 0], sizes = [48, 128], strides = [1, 1]} : vector<192x128xf32> to vector<48x128xf32>
    %135 = vector.extract_strided_slice %133 {offsets = [48, 0], sizes = [48, 128], strides = [1, 1]} : vector<192x128xf32> to vector<48x128xf32>
    %136 = arith.maximumf %134, %135 : vector<48x128xf32>
    %137 = vector.extract_strided_slice %133 {offsets = [96, 0], sizes = [48, 128], strides = [1, 1]} : vector<192x128xf32> to vector<48x128xf32>
    %138 = vector.extract_strided_slice %133 {offsets = [144, 0], sizes = [48, 128], strides = [1, 1]} : vector<192x128xf32> to vector<48x128xf32>
    %139 = arith.maximumf %137, %138 : vector<48x128xf32>
    %140 = arith.maximumf %136, %139 : vector<48x128xf32>
    %141 = vector.broadcast %1 : vector<48x1xf32> to vector<48x128xf32>
    %142 = arith.addf %140, %141 : vector<48x128xf32>
    %cst_53 = arith.constant 0.000000e+00 : f32
    %143 = vector.broadcast %cst_53 : f32 to vector<48x128xf32>
    %144 = arith.cmpf ogt, %142, %143 : vector<48x128xf32>
    %cst_54 = arith.constant 0.000000e+00 : f32
    %145 = vector.broadcast %cst_54 : f32 to vector<48x128xf32>
    %146 = arith.minimumf %142, %145 : vector<48x128xf32>
    %147 = math.exp %146 : vector<48x128xf32>
    %cst_55 = arith.constant 1.000000e+00 : f32
    %148 = vector.broadcast %cst_55 : f32 to vector<48x128xf32>
    %149 = arith.subf %147, %148 : vector<48x128xf32>
    %150 = arith.select %144, %142, %149 : vector<48x128xi1>, vector<48x128xf32>
    %c336 = arith.constant 336 : index
    %c0_56 = arith.constant 0 : index
    %151 = vector.load %arg11[%c336, %c0_56] : memref<384x128xf32, #tpu.memory_space<vmem>>, vector<48x128xf32>
    tpu.vector_store %arg11[%c336, %c0_56], %150 {strides = array<i32>} : memref<384x128xf32, #tpu.memory_space<vmem>>, vector<48x128xf32>,
    %c0_57 = arith.constant 0 : index
    %c0_58 = arith.constant 0 : index
    %152 = vector.load %arg7[%c0_57, %c0_58] : memref<16x1xf32, #tpu.memory_space<vmem>>, vector<16x1xf32>
    %c0_59 = arith.constant 0 : index
    %c0_60 = arith.constant 0 : index
    %153 = vector.load %arg4[%c0_59, %c0_60] : memref<64x240xf32, #tpu.memory_space<vmem>>, vector<64x240xf32>
    %c0_61 = arith.constant 0 : index
    %c0_62 = arith.constant 0 : index
    %154 = vector.load %arg11[%c0_61, %c0_62] : memref<384x128xf32, #tpu.memory_space<vmem>>, vector<240x128xf32>
    %cst_63 = arith.constant dense<0.000000e+00> : vector<64x128xf32>
    %155 = tpu.matmul %153, %154, %cst_63 {dimension_numbers = #tpu.dot_dimension_numbers<[1], [0], [0], [1], [0, 0, 1, 1], [], []>} : vector<64x240xf32>, vector<240x128xf32>, vector<64x128xf32> -> vector<64x128xf32>
    %c48_64 = arith.constant 48 : index
    %c0_65 = arith.constant 0 : index
    %156 = vector.load %arg11[%c48_64, %c0_65] : memref<384x128xf32, #tpu.memory_space<vmem>>, vector<240x128xf32>
    %cst_66 = arith.constant dense<0.000000e+00> : vector<64x128xf32>
    %157 = tpu.matmul %153, %156, %cst_66 {dimension_numbers = #tpu.dot_dimension_numbers<[1], [0], [0], [1], [0, 0, 1, 1], [], []>} : vector<64x240xf32>, vector<240x128xf32>, vector<64x128xf32> -> vector<64x128xf32>
    %158 = arith.maximumf %155, %157 : vector<64x128xf32>
    %159 = vector.extract_strided_slice %158 {offsets = [0, 0], sizes = [32, 128], strides = [1, 1]} : vector<64x128xf32> to vector<32x128xf32>
    %160 = vector.extract_strided_slice %158 {offsets = [32, 0], sizes = [32, 128], strides = [1, 1]} : vector<64x128xf32> to vector<32x128xf32>
    %161 = arith.maximumf %159, %160 : vector<32x128xf32>
    %162 = vector.broadcast %2 : vector<32x1xf32> to vector<32x128xf32>
    %163 = arith.addf %161, %162 : vector<32x128xf32>
    %cst_67 = arith.constant 0.000000e+00 : f32
    %164 = vector.broadcast %cst_67 : f32 to vector<32x128xf32>
    %165 = arith.cmpf ogt, %163, %164 : vector<32x128xf32>
    %cst_68 = arith.constant 0.000000e+00 : f32
    %166 = vector.broadcast %cst_68 : f32 to vector<32x128xf32>
    %167 = arith.minimumf %163, %166 : vector<32x128xf32>
    %168 = math.exp %167 : vector<32x128xf32>
    %cst_69 = arith.constant 1.000000e+00 : f32
    %169 = vector.broadcast %cst_69 : f32 to vector<32x128xf32>
    %170 = arith.subf %168, %169 : vector<32x128xf32>
    %171 = arith.select %165, %163, %170 : vector<32x128xi1>, vector<32x128xf32>
    %c0_70 = arith.constant 0 : index
    %c0_71 = arith.constant 0 : index
    %c0_72 = arith.constant 0 : index
    %172 = vector.load %arg6[%c0_70, %c0_71, %c0_72] : memref<2x16x32xf32, #tpu.memory_space<vmem>>, vector<1x16x32xf32>
    %173 = vector.shape_cast %172 : vector<1x16x32xf32> to vector<16x32xf32>
    %cst_73 = arith.constant dense<0.000000e+00> : vector<16x128xf32>
    %174 = tpu.matmul %173, %171, %cst_73 {dimension_numbers = #tpu.dot_dimension_numbers<[1], [0], [0], [1], [0, 0, 1, 1], [], []>} : vector<16x32xf32>, vector<32x128xf32>, vector<16x128xf32> -> vector<16x128xf32>
    %175 = vector.broadcast %152 : vector<16x1xf32> to vector<16x128xf32>
    %176 = arith.addf %175, %174 : vector<16x128xf32>
    %c96_74 = arith.constant 96 : index
    %c0_75 = arith.constant 0 : index
    %177 = vector.load %arg11[%c96_74, %c0_75] : memref<384x128xf32, #tpu.memory_space<vmem>>, vector<240x128xf32>
    %cst_76 = arith.constant dense<0.000000e+00> : vector<64x128xf32>
    %178 = tpu.matmul %153, %177, %cst_76 {dimension_numbers = #tpu.dot_dimension_numbers<[1], [0], [0], [1], [0, 0, 1, 1], [], []>} : vector<64x240xf32>, vector<240x128xf32>, vector<64x128xf32> -> vector<64x128xf32>
    %c144_77 = arith.constant 144 : index
    %c0_78 = arith.constant 0 : index
    %179 = vector.load %arg11[%c144_77, %c0_78] : memref<384x128xf32, #tpu.memory_space<vmem>>, vector<240x128xf32>
    %cst_79 = arith.constant dense<0.000000e+00> : vector<64x128xf32>
    %180 = tpu.matmul %153, %179, %cst_79 {dimension_numbers = #tpu.dot_dimension_numbers<[1], [0], [0], [1], [0, 0, 1, 1], [], []>} : vector<64x240xf32>, vector<240x128xf32>, vector<64x128xf32> -> vector<64x128xf32>
    %181 = arith.maximumf %178, %180 : vector<64x128xf32>
    %182 = vector.extract_strided_slice %181 {offsets = [0, 0], sizes = [32, 128], strides = [1, 1]} : vector<64x128xf32> to vector<32x128xf32>
    %183 = vector.extract_strided_slice %181 {offsets = [32, 0], sizes = [32, 128], strides = [1, 1]} : vector<64x128xf32> to vector<32x128xf32>
    %184 = arith.maximumf %182, %183 : vector<32x128xf32>
    %185 = vector.broadcast %2 : vector<32x1xf32> to vector<32x128xf32>
    %186 = arith.addf %184, %185 : vector<32x128xf32>
    %cst_80 = arith.constant 0.000000e+00 : f32
    %187 = vector.broadcast %cst_80 : f32 to vector<32x128xf32>
    %188 = arith.cmpf ogt, %186, %187 : vector<32x128xf32>
    %cst_81 = arith.constant 0.000000e+00 : f32
    %189 = vector.broadcast %cst_81 : f32 to vector<32x128xf32>
    %190 = arith.minimumf %186, %189 : vector<32x128xf32>
    %191 = math.exp %190 : vector<32x128xf32>
    %cst_82 = arith.constant 1.000000e+00 : f32
    %192 = vector.broadcast %cst_82 : f32 to vector<32x128xf32>
    %193 = arith.subf %191, %192 : vector<32x128xf32>
    %194 = arith.select %188, %186, %193 : vector<32x128xi1>, vector<32x128xf32>
    %c1_83 = arith.constant 1 : index
    %c0_84 = arith.constant 0 : index
    %c0_85 = arith.constant 0 : index
    %195 = vector.load %arg6[%c1_83, %c0_84, %c0_85] : memref<2x16x32xf32, #tpu.memory_space<vmem>>, vector<1x16x32xf32>
    %196 = vector.shape_cast %195 : vector<1x16x32xf32> to vector<16x32xf32>
    %cst_86 = arith.constant dense<0.000000e+00> : vector<16x128xf32>
    %197 = tpu.matmul %196, %194, %cst_86 {dimension_numbers = #tpu.dot_dimension_numbers<[1], [0], [0], [1], [0, 0, 1, 1], [], []>} : vector<16x32xf32>, vector<32x128xf32>, vector<16x128xf32> -> vector<16x128xf32>
    %198 = arith.addf %176, %197 : vector<16x128xf32>
    %cst_87 = arith.constant 0.000000e+00 : f32
    %199 = vector.broadcast %cst_87 : f32 to vector<16x128xf32>
    %200 = arith.cmpf ogt, %198, %199 : vector<16x128xf32>
    %cst_88 = arith.constant 0.000000e+00 : f32
    %201 = vector.broadcast %cst_88 : f32 to vector<16x128xf32>
    %202 = arith.minimumf %198, %201 : vector<16x128xf32>
    %203 = math.exp %202 : vector<16x128xf32>
    %cst_89 = arith.constant 1.000000e+00 : f32
    %204 = vector.broadcast %cst_89 : f32 to vector<16x128xf32>
    %205 = arith.subf %203, %204 : vector<16x128xf32>
    %206 = arith.select %200, %198, %205 : vector<16x128xi1>, vector<16x128xf32>
    %c0_90 = arith.constant 0 : index
    %c0_91 = arith.constant 0 : index
    %207 = vector.load %arg8[%c0_90, %c0_91] : memref<2x16xf32, #tpu.memory_space<vmem>>, vector<2x16xf32>
    %cst_92 = arith.constant dense<0.000000e+00> : vector<2x128xf32>
    %208 = tpu.matmul %207, %206, %cst_92 {dimension_numbers = #tpu.dot_dimension_numbers<[1], [0], [0], [1], [0, 0, 1, 1], [], []>} : vector<2x16xf32>, vector<16x128xf32>, vector<2x128xf32> -> vector<2x128xf32>
    %c0_93 = arith.constant 0 : index
    %c0_94 = arith.constant 0 : index
    %209 = vector.load %arg9[%c0_93, %c0_94] : memref<2x1xf32, #tpu.memory_space<vmem>>, vector<2x1xf32>
    %210 = vector.broadcast %209 : vector<2x1xf32> to vector<2x128xf32>
    %211 = arith.addf %208, %210 : vector<2x128xf32>
    %c0_95 = arith.constant 0 : index
    %c0_96 = arith.constant 0 : index
    %212 = vector.load %arg10[%c0_95, %c0_96] : memref<2x128xf32, #tpu.memory_space<vmem>>, vector<2x128xf32>
    tpu.vector_store %arg10[%c0_95, %c0_96], %211 {strides = array<i32>} : memref<2x128xf32, #tpu.memory_space<vmem>>, vector<2x128xf32>,
    return
  }
  func.func @transform_0(%arg0: i32) -> (i32, i32) {
    %c0_i32 = arith.constant 0 : i32
    %c0_i32_0 = arith.constant 0 : i32
    return %c0_i32, %arg0 : i32, i32
  }
  func.func @transform_1(%arg0: i32) -> (i32, i32, i32) {
    %c0_i32 = arith.constant 0 : i32
    %c0_i32_0 = arith.constant 0 : i32
    %c0_i32_1 = arith.constant 0 : i32
    %c0_i32_2 = arith.constant 0 : i32
    return %c0_i32, %c0_i32_0, %c0_i32_1 : i32, i32, i32
  }
  func.func @transform_2(%arg0: i32) -> (i32, i32) {
    %c0_i32 = arith.constant 0 : i32
    %c0_i32_0 = arith.constant 0 : i32
    %c0_i32_1 = arith.constant 0 : i32
    return %c0_i32, %c0_i32_0 : i32, i32
  }
  func.func @transform_3(%arg0: i32) -> (i32, i32) {
    %c0_i32 = arith.constant 0 : i32
    %c0_i32_0 = arith.constant 0 : i32
    %c0_i32_1 = arith.constant 0 : i32
    return %c0_i32, %c0_i32_0 : i32, i32
  }
  func.func @transform_4(%arg0: i32) -> (i32, i32) {
    %c0_i32 = arith.constant 0 : i32
    %c0_i32_0 = arith.constant 0 : i32
    %c0_i32_1 = arith.constant 0 : i32
    return %c0_i32, %c0_i32_0 : i32, i32
  }
  func.func @transform_5(%arg0: i32) -> (i32, i32, i32) {
    %c0_i32 = arith.constant 0 : i32
    %c0_i32_0 = arith.constant 0 : i32
    %c0_i32_1 = arith.constant 0 : i32
    %c0_i32_2 = arith.constant 0 : i32
    return %c0_i32, %c0_i32_0, %c0_i32_1 : i32, i32, i32
  }
  func.func @transform_6(%arg0: i32) -> (i32, i32) {
    %c0_i32 = arith.constant 0 : i32
    %c0_i32_0 = arith.constant 0 : i32
    %c0_i32_1 = arith.constant 0 : i32
    return %c0_i32, %c0_i32_0 : i32, i32
  }
  func.func @transform_7(%arg0: i32) -> (i32, i32) {
    %c0_i32 = arith.constant 0 : i32
    %c0_i32_0 = arith.constant 0 : i32
    %c0_i32_1 = arith.constant 0 : i32
    return %c0_i32, %c0_i32_0 : i32, i32
  }
  func.func @transform_8(%arg0: i32) -> (i32, i32) {
    %c0_i32 = arith.constant 0 : i32
    %c0_i32_0 = arith.constant 0 : i32
    %c0_i32_1 = arith.constant 0 : i32
    return %c0_i32, %c0_i32_0 : i32, i32
  }
  func.func @transform_9(%arg0: i32) -> (i32, i32) {
    %c0_i32 = arith.constant 0 : i32
    %c0_i32_0 = arith.constant 0 : i32
    return %c0_i32, %arg0 : i32, i32
  }
}

</mosaic_0001>

<bundles_post_ra>
// kernel: squeeze.5
= control target key start
LH: loop header
LB: loop body
LE: loop exit
PB: predicated region body
PF: predicated region fallthrough
CT: control target
= control target key end

     0   :  { %vm9_vm0 = vcmask 23552   ;;  %s255_s12 = smov 125   ;;  %s256_s13 = smov 115   ;;  %vm3_vm1 = vcmask 39936   ;;  %vm13_vm2 = vcmask 15360   ;;  %vm16_vm3 = vcmask 1048552   ;;  %s390_s0 = inlined_call_operand.vmem [shape: f32[6,1,5,5], index: 0, kind: input, shape index: {}]   ;;  %s391_s1 = inlined_call_operand.vmem [shape: f32[150], index: 1, kind: output, shape index: {}]  }
   0x1   :  { %v196_v0 = vld [vmem:[%s390_s0 + $0x28] sm:$0x1]   ;;  %v199_v3 = vld [vmem:[%s390_s0 + $0x23] sm:$0x1]   ;;  %v198_v4 = vld [vmem:[%s390_s0 + $0x24] sm:$0x1]  }
   0x2   :  { %v197_v1 = vld [vmem:[%s390_s0 + $0x28] sm:$0x1]   ;;  %26 = vrot.lane.b32.xlu1 %v199_v3, %s256_s13  ;;  %v200_v5 = vld [vmem:[%s390_s0 + $0x22] sm:$0x1]   ;;  %s257_s18 = smov 120   ;;  %s258_s19 = smov 110  }
   0x3   :  { %v10_v2 = vsel %vm9_vm0, %v197_v1, %v196_v0  ;;  %v201_v6 = vld [vmem:[%s390_s0 + $0x21] sm:$0x1]   ;;  %v202_v7 = vld [vmem:[%s390_s0 + $0x20] sm:$0x1]   ;;  %s259_s24 = smov 105   ;;  %s260_s25 = smov 100  }
   0x4   :  { %11 = vrot.lane.b32.xlu0 %v10_v2, %s255_s12  ;;  %v203_v8 = vld [vmem:[%s390_s0 + $0x1c] sm:$0x1]   ;;  %v204_v9 = vld [vmem:[%s390_s0 + $0x1b] sm:$0x1]   ;;  %s261_s30 = smov 95   ;;  %s262_s2 = smov 90  }
   0x5   :  { %v205_v10 = vld [vmem:[%s390_s0 + $0x1a] sm:$0x1]   ;;  %v206_v11 = vld [vmem:[%s390_s0 + $0x19] sm:$0x1]   ;;  %v2_v12 = vld [vmem:[%s390_s0] sm:$0x1]  }
   0x6   :  { %32 = vrot.lane.b32.xlu1 %v200_v5, %s258_s19  ;;  %4 = vst.msk [vmem:[#allocation0] sm:$0x1] %vm3_vm1, %v2_v12   ;;  %s263_s9 = smov 85   ;;  %s264_s10 = smov 80   ;;  %v207_v13 = vld [vmem:[%s390_s0 + $0x18] sm:$0x1]  }
   0x7   :  { %v208_v14 = vld [vmem:[%s390_s0 + $0x14] sm:$0x1]   ;;  %s265_s15 = smov 75   ;;  %s266_s16 = smov 70   ;;  %v209_v15 = vld [vmem:[%s390_s0 + $0x13] sm:$0x1]  }
   0x8   :  { %20 = vrot.lane.b32.xlu0 %v198_v4, %s257_s18  ;;  %v210_v16 = vld [vmem:[%s390_s0 + $0x12] sm:$0x1]   ;;  %s267_s21 = smov 65   ;;  %s268_s22 = smov 60   ;;  %v211_v17 = vld [vmem:[%s390_s0 + $0x11] sm:$0x1]  }
   0x9   :  { %v212_v18 = vld [vmem:[%s390_s0 + $0x10] sm:$0x1]   ;;  %s269_s27 = smov 55   ;;  %s270_s28 = smov 50   ;;  %v213_v19 = vld [vmem:[%s390_s0 + $0xc] sm:$0x1]  }
   0xa   :  { %44 = vrot.lane.b32.xlu1 %v202_v7, %s260_s25  ;;  %v214_v20 = vld [vmem:[%s390_s0 + $0xb] sm:$0x1]   ;;  %s271_s4 = smov 45   ;;  %s272_s5 = smov 40   ;;  %v215_v21 = vld [vmem:[%s390_s0 + $0xa] sm:$0x1]  }
   0xb   :  { %v216_v22 = vld [vmem:[%s390_s0 + $0x9] sm:$0x1]   ;;  %s274_s11 = smov 30   ;;  %v217_v23 = vld [vmem:[%s390_s0 + $0x8] sm:$0x1]   ;;  %s276_s17 = smov 20  }
   0xc   :  { %38 = vrot.lane.b32.xlu0 %v201_v6, %s259_s24  ;;  %v218_v24 = vld [vmem:[%s390_s0 + $0x4] sm:$0x1]   ;;  %v219_v25 = vld [vmem:[%s390_s0 + $0x2c] sm:$0x1]   ;;  %v220_v26 = vld [vmem:[%s390_s0 + $0x3] sm:$0x1]  }
   0xd   :  { %s278_s23 = smov 15   ;;  %v221_v27 = vld [vmem:[%s390_s0 + $0x2b] sm:$0x1]   ;;  %v222_v28 = vld [vmem:[%s390_s0 + $0x2] sm:$0x1]   ;;  %s280_s29 = smov 10  }
   0xe   :  { %56 = vrot.lane.b32.xlu1 %v204_v9, %s262_s2  ;;  %v223_v29 = vld [vmem:[%s390_s0 + $0x2a] sm:$0x1]   ;;  %v224_v30 = vld [vmem:[%s390_s0 + $0x1] sm:$0x1]   ;;  %s282_s6 = smov 5   ;;  %vm22_vm4 = vcmask 1023936  }
   0xf   :  { %v225_v31 = vld [vmem:[%s390_s0 + $0x29] sm:$0x1]   ;;  %s283_s0 = smov 2   ;;  %vm28_vm5 = vcmask 982936   ;;  %vm34_vm6 = vcmask 941936   ;;  %vm40_vm7 = vcmask 900936  }
  0x10   :  { %50 = vrot.lane.b32.xlu0 %v203_v8, %s261_s30  ;;  %vm46_vm8 = vcmask 859936   ;;  %vm52_vm9 = vcmask 818936   ;;  %vm58_vm10 = vcmask 777936   ;;  %vm64_vm11 = vcmask 736936  }
  0x11   :  { %vm70_vm12 = vcmask 695936   ;;  %vm76_vm13 = vcmask 654936   ;;  %vm82_vm14 = vcmask 613936   ;;  %vm88_vm15 = vcmask 572936  }
  0x12   :  { %68 = vrot.lane.b32.xlu1 %v206_v11, %s264_s10  ;;  %s273_s10 = smov 35   ;;  %vm94_vm0 = vcmask 531936   ;;  %vm100_vm1 = vcmask 490936  }
  0x14   :  { %62 = vrot.lane.b32.xlu0 %v205_v10, %s263_s9 }
  0x16   :  { %80 = vrot.lane.b32.xlu1 %v208_v14, %s266_s16  ;;  %s275_s16 = smov 25  }
  0x18   :  { %74 = vrot.lane.b32.xlu0 %v207_v13, %s265_s15 }
  0x1a   :  { %92 = vrot.lane.b32.xlu1 %v210_v16, %s268_s22  ;;  %s277_s22 = smov 17  }
  0x1c   :  { %86 = vrot.lane.b32.xlu0 %v209_v15, %s267_s21 }
  0x1e   :  { %104 = vrot.lane.b32.xlu1 %v212_v18, %s270_s28  ;;  %s279_s28 = smov 12  }
  0x20   :  { %98 = vrot.lane.b32.xlu0 %v211_v17, %s269_s27 }
  0x22   :  { %116 = vrot.lane.b32.xlu1 %v214_v20, %s272_s5  ;;  %s281_s5 = smov 7  }
  0x24   :  { %110 = vrot.lane.b32.xlu0 %v213_v19, %s271_s4 }
  0x26   :  { %128 = vrot.lane.b32.xlu1 %v216_v22, %s274_s11 }
  0x28   :  { %122 = vrot.lane.b32.xlu0 %v215_v21, %s273_s10 }
  0x2a   :  { %140 = vrot.lane.b32.xlu1 %v218_v24, %s276_s17 }
  0x2c   :  { %134 = vrot.lane.b32.xlu0 %v217_v23, %s275_s16 }
  0x2e   :  { %153 = vrot.lane.b32.xlu1 %v220_v26, %s278_s23 }
  0x30   :  { %146 = vrot.lane.b32.xlu0 %v219_v25, %s277_s22 }
  0x32   :  { %166 = vrot.lane.b32.xlu1 %v222_v28, %s280_s29 }
  0x34   :  { %159 = vrot.lane.b32.xlu0 %v221_v27, %s279_s28 }
  0x36   :  { %179 = vrot.lane.b32.xlu1 %v224_v30, %s282_s6 }
  0x38   :  { %172 = vrot.lane.b32.xlu0 %v223_v29, %s281_s5 }
  0x3c   :  { %185 = vrot.lane.b32.xlu0 %v225_v31, %s283_s0 }
  0x74   :  { %v27_v33 = vpop.permute.xlu1 %26  }
  0x76   :  { %v12_v32 = vpop.permute.xlu0 %11  }
  0x77   :  { %15 = vst.msk [vmem:[#allocation0 + $0x1] sm:$0x1] %vm13_vm2, %v12_v32   ;;  %vm106_vm2 = vcmask 449936  }
  0x78   :  { %17 = vst.msk [vmem:[#allocation0] sm:$0x1] %vm16_vm3, %v12_v32   ;;  %v33_v35 = vpop.permute.xlu1 %32   ;;  %vm112_vm3 = vcmask 408936  }
  0x7a   :  { %v21_v34 = vpop.permute.xlu0 %20  }
  0x7b   :  { %23 = vst.msk [vmem:[#allocation0] sm:$0x1] %vm22_vm4, %v21_v34   ;;  %vm118_vm4 = vcmask 367936  }
  0x7c   :  { %29 = vst.msk [vmem:[#allocation0] sm:$0x1] %vm28_vm5, %v27_v33   ;;  %v45_v37 = vpop.permute.xlu1 %44   ;;  %vm124_vm5 = vcmask 326936  }
  0x7d   :  { %35 = vst.msk [vmem:[#allocation0] sm:$0x1] %vm34_vm6, %v33_v35   ;;  %vm130_vm6 = vcmask 285936  }
  0x7e   :  { %v39_v36 = vpop.permute.xlu0 %38  }
  0x7f   :  { %41 = vst.msk [vmem:[#allocation0] sm:$0x1] %vm40_vm7, %v39_v36   ;;  %vm136_vm7 = vcmask 244936  }
  0x80   :  { %47 = vst.msk [vmem:[#allocation0] sm:$0x1] %vm46_vm8, %v45_v37   ;;  %v57_v39 = vpop.permute.xlu1 %56   ;;  %vm142_vm8 = vcmask 203936  }
  0x82   :  { %v51_v38 = vpop.permute.xlu0 %50  }
  0x83   :  { %53 = vst.msk [vmem:[#allocation0] sm:$0x1] %vm52_vm9, %v51_v38   ;;  %vm148_vm9 = vcmask 179336  }
  0x84   :  { %59 = vst.msk [vmem:[#allocation0] sm:$0x1] %vm58_vm10, %v57_v39   ;;  %v69_v41 = vpop.permute.xlu1 %68   ;;  %vm155_vm10 = vcmask 162936  }
  0x86   :  { %v63_v40 = vpop.permute.xlu0 %62  }
  0x87   :  { %65 = vst.msk [vmem:[#allocation0] sm:$0x1] %vm64_vm11, %v63_v40   ;;  %vm161_vm11 = vcmask 138336  }
  0x88   :  { %71 = vst.msk [vmem:[#allocation0] sm:$0x1] %vm70_vm12, %v69_v41   ;;  %v81_v43 = vpop.permute.xlu1 %80   ;;  %vm168_vm12 = vcmask 121936  }
  0x8a   :  { %v75_v42 = vpop.permute.xlu0 %74  }
  0x8b   :  { %77 = vst.msk [vmem:[#allocation0] sm:$0x1] %vm76_vm13, %v75_v42   ;;  %vm174_vm13 = vcmask 97336  }
  0x8c   :  { %83 = vst.msk [vmem:[#allocation0] sm:$0x1] %vm82_vm14, %v81_v43   ;;  %v93_v45 = vpop.permute.xlu1 %92   ;;  %vm181_vm14 = vcmask 80936  }
  0x8e   :  { %v87_v44 = vpop.permute.xlu0 %86  }
  0x8f   :  { %89 = vst.msk [vmem:[#allocation0] sm:$0x1] %vm88_vm15, %v87_v44   ;;  %vm187_vm15 = vcmask 56336  }
  0x90   :  { %95 = vst.msk [vmem:[#allocation0] sm:$0x1] %vm94_vm0, %v93_v45   ;;  %v105_v47 = vpop.permute.xlu1 %104  }
  0x92   :  { %v99_v46 = vpop.permute.xlu0 %98  }
  0x93   :  { %101 = vst.msk [vmem:[#allocation0] sm:$0x1] %vm100_vm1, %v99_v46  }
  0x94   :  { %107 = vst.msk [vmem:[#allocation0] sm:$0x1] %vm106_vm2, %v105_v47   ;;  %v117_v49 = vpop.permute.xlu1 %116  }
  0x96   :  { %v111_v48 = vpop.permute.xlu0 %110  }
  0x97   :  { %113 = vst.msk [vmem:[#allocation0] sm:$0x1] %vm112_vm3, %v111_v48  }
  0x98   :  { %119 = vst.msk [vmem:[#allocation0] sm:$0x1] %vm118_vm4, %v117_v49   ;;  %v129_v51 = vpop.permute.xlu1 %128  }
  0x9a   :  { %v123_v50 = vpop.permute.xlu0 %122  }
  0x9b   :  { %125 = vst.msk [vmem:[#allocation0] sm:$0x1] %vm124_vm5, %v123_v50  }
  0x9c   :  { %131 = vst.msk [vmem:[#allocation0] sm:$0x1] %vm130_vm6, %v129_v51   ;;  %v141_v53 = vpop.permute.xlu1 %140  }
  0x9e   :  { %v135_v52 = vpop.permute.xlu0 %134  }
  0x9f   :  { %137 = vst.msk [vmem:[#allocation0] sm:$0x1] %vm136_vm7, %v135_v52  }
  0xa0   :  { %143 = vst.msk [vmem:[#allocation0] sm:$0x1] %vm142_vm8, %v141_v53   ;;  %v154_v55 = vpop.permute.xlu1 %153  }
  0xa1   :  { %156 = vst.msk [vmem:[#allocation0] sm:$0x1] %vm155_vm10, %v154_v55  }
  0xa2   :  { %v147_v54 = vpop.permute.xlu0 %146  }
  0xa3   :  { %150 = vst.msk [vmem:[#allocation0 + $0x1] sm:$0x1] %vm148_vm9, %v147_v54  }
  0xa4   :  { %v167_v57 = vpop.permute.xlu1 %166  }
  0xa5   :  { %169 = vst.msk [vmem:[#allocation0] sm:$0x1] %vm168_vm12, %v167_v57  }
  0xa6   :  { %v160_v56 = vpop.permute.xlu0 %159  }
  0xa7   :  { %163 = vst.msk [vmem:[#allocation0 + $0x1] sm:$0x1] %vm161_vm11, %v160_v56  }
  0xa8   :  { %v180_v59 = vpop.permute.xlu1 %179  }
  0xa9   :  { %182 = vst.msk [vmem:[#allocation0] sm:$0x1] %vm181_vm14, %v180_v59  }
  0xaa   :  { %v173_v58 = vpop.permute.xlu0 %172  }
  0xab   :  { %176 = vst.msk [vmem:[#allocation0 + $0x1] sm:$0x1] %vm174_vm13, %v173_v58  }
  0xae   :  { %v186_v60 = vpop.permute.xlu0 %185  }
  0xaf   :  { %189 = vst.msk [vmem:[#allocation0 + $0x1] sm:$0x1] %vm187_vm15, %v186_v60  }
  0xb6   :  { %v193_v61 = vld [vmem:[#allocation0] sm:$0x3] }
  0xb7   :  { %195 = vst [vmem:[%s391_s1] sm:$0x3] %v193_v61 }

// kernel: lp_forward.1
= control target key start
LH: loop header
LB: loop body
LE: loop exit
PB: predicated region body
PF: predicated region fallthrough
CT: control target
= control target key end

     0   :  { %v6921_v0 = vmov 0.0|0.0   ;;  %vm2257_vm4 = vcmask 916480   ;;  %s6911_s0 = inlined_call_operand.vmem [shape: f32[256,128], index: 0, kind: input, shape index: {}]   ;;  %s6912_s1 = inlined_call_operand.vmem [shape: f32[7,192,256], index: 1, kind: input, shape index: {}]   ;;  %s6913_s2 = inlined_call_operand.vmem [shape: f32[48,1], index: 2, kind: input, shape index: {}]   ;;  %s6914_s4 = inlined_call_operand.vmem [shape: f32[32,1], index: 4, kind: input, shape index: {}]   ;;  %s6915_s6 = inlined_call_operand.vmem [shape: f32[16,1], index: 6, kind: input, shape index: {}]   ;;  %s6916_s8 = inlined_call_operand.vmem [shape: f32[2,1], index: 8, kind: input, shape index: {}]   ;;  %s6917_s3 = inlined_call_operand.vmem [shape: f32[64,240], index: 3, kind: input, shape index: {}]   ;;  %s6918_s5 = inlined_call_operand.vmem [shape: f32[2,16,32], index: 5, kind: input, shape index: {}]   ;;  %s6919_s7 = inlined_call_operand.vmem [shape: f32[2,16], index: 7, kind: input, shape index: {}]   ;;  %s6920_s9 = inlined_call_operand.vmem [shape: f32[2,128], index: 9, kind: output, shape index: {}]  }
   0x1   :  { %3595 = vmatprep.subr.bf16.mxu0 %v6921_v0  ;;  %3643 = vmatprep.subr.bf16.mxu1 %v6921_v0  ;;  %v32_v1 = vld [vmem:[%s6911_s0] sm:$0xff]  ;;  %v33_v2 = vld [vmem:[%s6911_s0 + $0x8] sm:$0xff]  ;;  %v34_v3 = vld [vmem:[%s6911_s0 + $0x10] sm:$0xff] }
   0x2   :  { %v4347_v4 = vpack.c.bf16 %v33_v2, %v32_v1  ;;  %v35_v5 = vld [vmem:[%s6911_s0 + $0x18] sm:$0xff]  ;;  %v36_v7 = vld [vmem:[%s6911_s0 + $0x20] sm:$0xff]  ;;  %v37_v8 = vld [vmem:[%s6911_s0 + $0x28] sm:$0xff] }
   0x3   :  { %v4354_v6 = vpack.c.bf16 %v35_v5, %v34_v3  ;;  %v4366_v9 = vpack.c.bf16 %v37_v8, %v36_v7  ;;  %v38_v10 = vld [vmem:[%s6911_s0 + $0x30] sm:$0xff]  ;;  %v39_v11 = vld [vmem:[%s6911_s0 + $0x38] sm:$0xff]  ;;  %v81_v12 = vld [vmem:[%s6912_s1 + $0x8] sm:$0xff] }
   0x4   :  { %3597 = vmatpush1.bf16.msra.mxu0 %v4347_v4  ;;  %3645 = vmatpush1.bf16.msra.mxu1 %v4347_v4  ;;  %v4381_v13 = vpack.c.bf16 %v39_v11, %v38_v10  ;;  %v3179_v14 = vld [vmem:[%s6912_s1 + $0x188] sm:$0xff]  ;;  %v40_v15 = vld [vmem:[%s6911_s0 + $0x40] sm:$0xff]  ;;  %v42_v18 = vld [vmem:[%s6911_s0 + $0x50] sm:$0xff] }
   0x5   :  { %3598 = vmatprep.subr.bf16.mxu0 %v6921_v0  ;;  %3646 = vmatprep.subr.bf16.mxu1 %v6921_v0  ;;  %v41_v16 = vld [vmem:[%s6911_s0 + $0x48] sm:$0xff]  ;;  %v43_v19 = vld [vmem:[%s6911_s0 + $0x58] sm:$0xff]  ;;  %v44_v21 = vld [vmem:[%s6911_s0 + $0x60] sm:$0xff] }
   0x6   :  { %192 = vmatprep.mubr.f32.mxu0 %v81_v12  ;;  %522 = vmatprep.mubr.f32.mxu1 %v3179_v14  ;;  %v4396_v17 = vpack.c.bf16 %v41_v16, %v40_v15  ;;  %v4408_v20 = vpack.c.bf16 %v43_v19, %v42_v18  ;;  %v45_v22 = vld [vmem:[%s6911_s0 + $0x68] sm:$0xff]  ;;  %v46_v24 = vld [vmem:[%s6911_s0 + $0x70] sm:$0xff]  ;;  %v47_v25 = vld [vmem:[%s6911_s0 + $0x78] sm:$0xff] }
   0x7   :  { %v4420_v23 = vpack.c.bf16 %v45_v22, %v44_v21  ;;  %v4432_v26 = vpack.c.bf16 %v47_v25, %v46_v24  ;;  %v48_v27 = vld [vmem:[%s6911_s0 + $0x80] sm:$0xff]  ;;  %v49_v28 = vld [vmem:[%s6911_s0 + $0x88] sm:$0xff]  ;;  %v50_v30 = vld [vmem:[%s6911_s0 + $0x90] sm:$0xff] }
   0x8   :  { %3600 = vmatpush1.bf16.msra.mxu0 %v4354_v6  ;;  %3648 = vmatpush1.bf16.msra.mxu1 %v4354_v6  ;;  %v4444_v29 = vpack.c.bf16 %v49_v28, %v48_v27  ;;  %v51_v31 = vld [vmem:[%s6911_s0 + $0x98] sm:$0xff]  ;;  %v52_v33 = vld [vmem:[%s6911_s0 + $0xa0] sm:$0xff]  ;;  %v53_v34 = vld [vmem:[%s6911_s0 + $0xa8] sm:$0xff] }
   0x9   :  { %3601 = vmatprep.subr.bf16.mxu0 %v6921_v0  ;;  %3649 = vmatprep.subr.bf16.mxu1 %v6921_v0  ;;  %v4456_v32 = vpack.c.bf16 %v51_v31, %v50_v30  ;;  %v4468_v35 = vpack.c.bf16 %v53_v34, %v52_v33  ;;  %v54_v36 = vld [vmem:[%s6911_s0 + $0xb0] sm:$0xff]  ;;  %v55_v37 = vld [vmem:[%s6911_s0 + $0xb8] sm:$0xff]  ;;  %v56_v39 = vld [vmem:[%s6911_s0 + $0xc0] sm:$0xff] }
   0xa   :  { %v4480_v38 = vpack.c.bf16 %v55_v37, %v54_v36  ;;  %v57_v40 = vld [vmem:[%s6911_s0 + $0xc8] sm:$0xff]  ;;  %v58_v42 = vld [vmem:[%s6911_s0 + $0xd0] sm:$0xff]  ;;  %v59_v43 = vld [vmem:[%s6911_s0 + $0xd8] sm:$0xff] }
   0xb   :  { %v4492_v41 = vpack.c.bf16 %v57_v40, %v56_v39  ;;  %v4504_v44 = vpack.c.bf16 %v59_v43, %v58_v42  ;;  %v60_v45 = vld [vmem:[%s6911_s0 + $0xe0] sm:$0xff]  ;;  %v61_v46 = vld [vmem:[%s6911_s0 + $0xe8] sm:$0xff]  ;;  %v62_v48 = vld [vmem:[%s6911_s0 + $0xf0] sm:$0xff] }
   0xc   :  { %3603 = vmatpush1.bf16.msra.mxu0 %v4366_v9  ;;  %3651 = vmatpush1.bf16.msra.mxu1 %v4366_v9  ;;  %v4516_v47 = vpack.c.bf16 %v61_v46, %v60_v45  ;;  %v63_v49 = vld [vmem:[%s6911_s0 + $0xf8] sm:$0xff]  ;;  %v80_v51 = vld [vmem:[%s6912_s1] sm:$0xff]  ;;  %v82_v55 = vld [vmem:[%s6912_s1 + $0x10] sm:$0xff] }
   0xd   :  { %3604 = vmatprep.subr.bf16.mxu0 %v6921_v0  ;;  %3652 = vmatprep.subr.bf16.mxu1 %v6921_v0  ;;  %v4528_v50 = vpack.c.bf16 %v63_v49, %v62_v48  ;;  %v3178_v52 = vld [vmem:[%s6912_s1 + $0x180] sm:$0xff]  ;;  %v83_v53 = vld [vmem:[%s6912_s1 + $0x18] sm:$0xff]  ;;  %v3180_v56 = vld [vmem:[%s6912_s1 + $0x190] sm:$0xff] }
   0xe   :  { %v3181_v54 = vld [vmem:[%s6912_s1 + $0x198] sm:$0xff]  ;;  %v85_v57 = vld [vmem:[%s6912_s1 + $0x28] sm:$0xff]  ;;  %v84_v59 = vld [vmem:[%s6912_s1 + $0x20] sm:$0xff] }
   0xf   :  { %v3183_v58 = vld [vmem:[%s6912_s1 + $0x1a8] sm:$0xff]  ;;  %v3182_v60 = vld [vmem:[%s6912_s1 + $0x1a0] sm:$0xff]  ;;  %v87_v61 = vld [vmem:[%s6912_s1 + $0x38] sm:$0xff] }
  0x10   :  { %3606 = vmatpush1.bf16.msra.mxu0 %v4381_v13  ;;  %3654 = vmatpush1.bf16.msra.mxu1 %v4381_v13  ;;  %v3185_v62 = vld [vmem:[%s6912_s1 + $0x1b8] sm:$0xff]  ;;  %v86_v63 = vld [vmem:[%s6912_s1 + $0x30] sm:$0xff]  ;;  %v89_v2 = vld [vmem:[%s6912_s1 + $0x48] sm:$0xff] }
  0x11   :  { %3607 = vmatprep.subr.bf16.mxu0 %v6921_v0  ;;  %3655 = vmatprep.subr.bf16.mxu1 %v6921_v0  ;;  %v3184_v1 = vld [vmem:[%s6912_s1 + $0x1b0] sm:$0xff]  ;;  %v3187_v3 = vld [vmem:[%s6912_s1 + $0x1c8] sm:$0xff]  ;;  %v88_v5 = vld [vmem:[%s6912_s1 + $0x40] sm:$0xff] }
  0x12   :  { %v3186_v7 = vld [vmem:[%s6912_s1 + $0x1c0] sm:$0xff]  ;;  %v91_v8 = vld [vmem:[%s6912_s1 + $0x58] sm:$0xff]  ;;  %v90_v11 = vld [vmem:[%s6912_s1 + $0x50] sm:$0xff] }
  0x13   :  { %v3189_v10 = vld [vmem:[%s6912_s1 + $0x1d8] sm:$0xff]  ;;  %v3188_v12 = vld [vmem:[%s6912_s1 + $0x1d0] sm:$0xff]  ;;  %v93_v14 = vld [vmem:[%s6912_s1 + $0x68] sm:$0xff] }
  0x14   :  { %3609 = vmatpush1.bf16.msra.mxu0 %v4396_v17  ;;  %3657 = vmatpush1.bf16.msra.mxu1 %v4396_v17  ;;  %v3191_v15 = vld [vmem:[%s6912_s1 + $0x1e8] sm:$0xff]  ;;  %v92_v16 = vld [vmem:[%s6912_s1 + $0x60] sm:$0xff]  ;;  %v95_v19 = vld [vmem:[%s6912_s1 + $0x78] sm:$0xff] }
  0x15   :  { %3610 = vmatprep.subr.bf16.mxu0 %v6921_v0  ;;  %3658 = vmatprep.subr.bf16.mxu1 %v6921_v0  ;;  %v3190_v18 = vld [vmem:[%s6912_s1 + $0x1e0] sm:$0xff]  ;;  %v3193_v21 = vld [vmem:[%s6912_s1 + $0x1f8] sm:$0xff]  ;;  %v94_v22 = vld [vmem:[%s6912_s1 + $0x70] sm:$0xff] }
  0x16   :  { %v3192_v24 = vld [vmem:[%s6912_s1 + $0x1f0] sm:$0xff]  ;;  %v97_v25 = vld [vmem:[%s6912_s1 + $0x88] sm:$0xff]  ;;  %v96_v28 = vld [vmem:[%s6912_s1 + $0x80] sm:$0xff] }
  0x17   :  { %v3195_v27 = vld [vmem:[%s6912_s1 + $0x208] sm:$0xff]  ;;  %v3194_v30 = vld [vmem:[%s6912_s1 + $0x200] sm:$0xff]  ;;  %v99_v31 = vld [vmem:[%s6912_s1 + $0x98] sm:$0xff] }
  0x18   :  { %3612 = vmatpush1.bf16.msra.mxu0 %v4408_v20  ;;  %3660 = vmatpush1.bf16.msra.mxu1 %v4408_v20  ;;  %v3197_v33 = vld [vmem:[%s6912_s1 + $0x218] sm:$0xff]  ;;  %v98_v34 = vld [vmem:[%s6912_s1 + $0x90] sm:$0xff]  ;;  %v101_v37 = vld [vmem:[%s6912_s1 + $0xa8] sm:$0xff] }
  0x19   :  { %3613 = vmatprep.subr.bf16.mxu0 %v6921_v0  ;;  %3661 = vmatprep.subr.bf16.mxu1 %v6921_v0  ;;  %v3196_v36 = vld [vmem:[%s6912_s1 + $0x210] sm:$0xff]  ;;  %v3199_v39 = vld [vmem:[%s6912_s1 + $0x228] sm:$0xff]  ;;  %v100_v40 = vld [vmem:[%s6912_s1 + $0xa0] sm:$0xff] }
  0x1a   :  { %v3198_v42 = vld [vmem:[%s6912_s1 + $0x220] sm:$0xff]  ;;  %v103_v43 = vld [vmem:[%s6912_s1 + $0xb8] sm:$0xff]  ;;  %v102_v46 = vld [vmem:[%s6912_s1 + $0xb0] sm:$0xff] }
  0x1b   :  { %v3201_v45 = vld [vmem:[%s6912_s1 + $0x238] sm:$0xff]  ;;  %v3200_v48 = vld [vmem:[%s6912_s1 + $0x230] sm:$0xff]  ;;  %v105_v49 = vld [vmem:[%s6912_s1 + $0xc8] sm:$0xff] }
  0x1c   :  { %3615 = vmatpush1.bf16.msra.mxu0 %v4420_v23  ;;  %3663 = vmatpush1.bf16.msra.mxu1 %v4420_v23 }
  0x1d   :  { %3616 = vmatprep.subr.bf16.mxu0 %v6921_v0  ;;  %3664 = vmatprep.subr.bf16.mxu1 %v6921_v0 }
  0x20   :  { %3618 = vmatpush1.bf16.msra.mxu0 %v4432_v26  ;;  %3666 = vmatpush1.bf16.msra.mxu1 %v4432_v26 }
  0x21   :  { %3619 = vmatprep.subr.bf16.mxu0 %v6921_v0  ;;  %3667 = vmatprep.subr.bf16.mxu1 %v6921_v0 }
  0x24   :  { %3621 = vmatpush1.bf16.msra.mxu0 %v4444_v29  ;;  %3669 = vmatpush1.bf16.msra.mxu1 %v4444_v29 }
  0x25   :  { %3622 = vmatprep.subr.bf16.mxu0 %v6921_v0  ;;  %3670 = vmatprep.subr.bf16.mxu1 %v6921_v0 }
  0x28   :  { %3624 = vmatpush1.bf16.msra.mxu0 %v4456_v32  ;;  %3672 = vmatpush1.bf16.msra.mxu1 %v4456_v32 }
  0x29   :  { %3625 = vmatprep.subr.bf16.mxu0 %v6921_v0  ;;  %3673 = vmatprep.subr.bf16.mxu1 %v6921_v0 }
  0x2c   :  { %3627 = vmatpush1.bf16.msra.mxu0 %v4468_v35  ;;  %3675 = vmatpush1.bf16.msra.mxu1 %v4468_v35 }
  0x2d   :  { %3628 = vmatprep.subr.bf16.mxu0 %v6921_v0  ;;  %3676 = vmatprep.subr.bf16.mxu1 %v6921_v0 }
  0x30   :  { %3630 = vmatpush1.bf16.msra.mxu0 %v4480_v38  ;;  %3678 = vmatpush1.bf16.msra.mxu1 %v4480_v38 }
  0x31   :  { %3631 = vmatprep.subr.bf16.mxu0 %v6921_v0  ;;  %3679 = vmatprep.subr.bf16.mxu1 %v6921_v0 }
  0x34   :  { %3633 = vmatpush1.bf16.msra.mxu0 %v4492_v41  ;;  %3681 = vmatpush1.bf16.msra.mxu1 %v4492_v41 }
  0x35   :  { %3634 = vmatprep.subr.bf16.mxu0 %v6921_v0  ;;  %3682 = vmatprep.subr.bf16.mxu1 %v6921_v0 }
  0x38   :  { %3636 = vmatpush1.bf16.msra.mxu0 %v4504_v44  ;;  %3684 = vmatpush1.bf16.msra.mxu1 %v4504_v44 }
  0x39   :  { %3637 = vmatprep.subr.bf16.mxu0 %v6921_v0  ;;  %3685 = vmatprep.subr.bf16.mxu1 %v6921_v0 }
  0x3c   :  { %3639 = vmatpush1.bf16.msra.mxu0 %v4516_v47  ;;  %3687 = vmatpush1.bf16.msra.mxu1 %v4516_v47 }
  0x3d   :  { %3640 = vmatprep.subr.bf16.mxu0 %v6921_v0  ;;  %3688 = vmatprep.subr.bf16.mxu1 %v6921_v0 }
  0x40   :  { %3642 = vmatpush1.bf16.msra.mxu0 %v4528_v50  ;;  %3690 = vmatpush1.bf16.msra.mxu1 %v4528_v50 }
  0x41   :  { %3691 = vmatprep.subr.bf16.mxu0 %v6921_v0  ;;  %3739 = vmatprep.subr.bf16.mxu1 %v6921_v0 }
  0x43   :  { %193 = vmatmul.mubr.f32.vlgmr.msra.gmra.mrb[0].mxu0 %v80_v51  ;;  %523 = vmatmul.mubr.f32.vlgmr.msra.gmra.mrb[0].mxu1 %v3178_v52  ;;  %v3203_v51 = vld [vmem:[%s6912_s1 + $0x248] sm:$0xff]  ;;  %v104_v52 = vld [vmem:[%s6912_s1 + $0xc0] sm:$0xff] }
  0x44   :  { %197 = vmatprep.mubr.f32.mxu0 %v83_v53  ;;  %527 = vmatprep.mubr.f32.mxu1 %v3181_v54  ;;  %v3202_v53 = vld [vmem:[%s6912_s1 + $0x240] sm:$0xff]  ;;  %v107_v54 = vld [vmem:[%s6912_s1 + $0xd8] sm:$0xff] }
  0x45   :  { %3693 = vmatpush1.bf16.msra.mxu0 %v4347_v4  ;;  %3741 = vmatpush1.bf16.msra.mxu1 %v4347_v4 }
  0x46   :  { %3694 = vmatprep.subr.bf16.mxu0 %v6921_v0  ;;  %3742 = vmatprep.subr.bf16.mxu1 %v6921_v0 }
  0x47   :  { %198 = vmatmul.mubr.f32.gmra.mrb[2].mxu0 %v82_v55  ;;  %528 = vmatmul.mubr.f32.gmra.mrb[2].mxu1 %v3180_v56  ;;  %v3205_v55 = vld [vmem:[%s6912_s1 + $0x258] sm:$0xff]  ;;  %v106_v56 = vld [vmem:[%s6912_s1 + $0xd0] sm:$0xff] }
  0x48   :  { %202 = vmatprep.mubr.f32.mxu0 %v85_v57  ;;  %532 = vmatprep.mubr.f32.mxu1 %v3183_v58  ;;  %v3204_v57 = vld [vmem:[%s6912_s1 + $0x250] sm:$0xff]  ;;  %v109_v58 = vld [vmem:[%s6912_s1 + $0xe8] sm:$0xff] }
  0x49   :  { %3696 = vmatpush1.bf16.msra.mxu0 %v4354_v6  ;;  %3744 = vmatpush1.bf16.msra.mxu1 %v4354_v6 }
  0x4a   :  { %3697 = vmatprep.subr.bf16.mxu0 %v6921_v0  ;;  %3745 = vmatprep.subr.bf16.mxu1 %v6921_v0 }
  0x4b   :  { %203 = vmatmul.mubr.f32.gmra.mrb[4].mxu0 %v84_v59  ;;  %533 = vmatmul.mubr.f32.gmra.mrb[4].mxu1 %v3182_v60  ;;  %v3207_v59 = vld [vmem:[%s6912_s1 + $0x268] sm:$0xff]  ;;  %v108_v60 = vld [vmem:[%s6912_s1 + $0xe0] sm:$0xff] }
  0x4c   :  { %207 = vmatprep.mubr.f32.mxu0 %v87_v61  ;;  %537 = vmatprep.mubr.f32.mxu1 %v3185_v62  ;;  %v3206_v61 = vld [vmem:[%s6912_s1 + $0x260] sm:$0xff]  ;;  %v111_v62 = vld [vmem:[%s6912_s1 + $0xf8] sm:$0xff] }
  0x4d   :  { %3699 = vmatpush1.bf16.msra.mxu0 %v4366_v9  ;;  %3747 = vmatpush1.bf16.msra.mxu1 %v4366_v9 }
  0x4e   :  { %3700 = vmatprep.subr.bf16.mxu0 %v6921_v0  ;;  %3748 = vmatprep.subr.bf16.mxu1 %v6921_v0 }
  0x4f   :  { %208 = vmatmul.mubr.f32.gmra.mrb[6].mxu0 %v86_v63  ;;  %538 = vmatmul.mubr.f32.gmra.mrb[6].mxu1 %v3184_v1  ;;  %v3209_v63 = vld [vmem:[%s6912_s1 + $0x278] sm:$0xff]  ;;  %v110_v1 = vld [vmem:[%s6912_s1 + $0xf0] sm:$0xff] }
  0x50   :  { %212 = vmatprep.mubr.f32.mxu0 %v89_v2  ;;  %542 = vmatprep.mubr.f32.mxu1 %v3187_v3  ;;  %v3208_v2 = vld [vmem:[%s6912_s1 + $0x270] sm:$0xff]  ;;  %v113_v3 = vld [vmem:[%s6912_s1 + $0x108] sm:$0xff] }
  0x51   :  { %3702 = vmatpush1.bf16.msra.mxu0 %v4381_v13  ;;  %3750 = vmatpush1.bf16.msra.mxu1 %v4381_v13 }
  0x52   :  { %3703 = vmatprep.subr.bf16.mxu0 %v6921_v0  ;;  %3751 = vmatprep.subr.bf16.mxu1 %v6921_v0 }
  0x53   :  { %213 = vmatmul.mubr.f32.gmra.mrb[8].mxu0 %v88_v5  ;;  %543 = vmatmul.mubr.f32.gmra.mrb[8].mxu1 %v3186_v7  ;;  %v3211_v5 = vld [vmem:[%s6912_s1 + $0x288] sm:$0xff]  ;;  %v112_v7 = vld [vmem:[%s6912_s1 + $0x100] sm:$0xff] }
  0x54   :  { %217 = vmatprep.mubr.f32.mxu0 %v91_v8  ;;  %547 = vmatprep.mubr.f32.mxu1 %v3189_v10  ;;  %v3210_v8 = vld [vmem:[%s6912_s1 + $0x280] sm:$0xff]  ;;  %v115_v10 = vld [vmem:[%s6912_s1 + $0x118] sm:$0xff] }
  0x55   :  { %3705 = vmatpush1.bf16.msra.mxu0 %v4396_v17  ;;  %3753 = vmatpush1.bf16.msra.mxu1 %v4396_v17 }
  0x56   :  { %3706 = vmatprep.subr.bf16.mxu0 %v6921_v0  ;;  %3754 = vmatprep.subr.bf16.mxu1 %v6921_v0 }
  0x57   :  { %218 = vmatmul.mubr.f32.gmra.mrb[10].mxu0 %v90_v11  ;;  %548 = vmatmul.mubr.f32.gmra.mrb[10].mxu1 %v3188_v12  ;;  %v3213_v11 = vld [vmem:[%s6912_s1 + $0x298] sm:$0xff]  ;;  %v64_v12 = vld [vmem:[%s6913_s2] sm:$0xff] }
  0x58   :  { %222 = vmatprep.mubr.f32.mxu0 %v93_v14  ;;  %552 = vmatprep.mubr.f32.mxu1 %v3191_v15  ;;  %v66_v14 = vld [vmem:[%s6913_s2 + $0x10] sm:$0xff] }
  0x59   :  { %3708 = vmatpush1.bf16.msra.mxu0 %v4408_v20  ;;  %3756 = vmatpush1.bf16.msra.mxu1 %v4408_v20  ;;  %v114_v15 = vld [vmem:[%s6912_s1 + $0x110] sm:$0xff] }
  0x5a   :  { %3709 = vmatprep.subr.bf16.mxu0 %v6921_v0  ;;  %3757 = vmatprep.subr.bf16.mxu1 %v6921_v0 }
  0x5b   :  { %223 = vmatmul.mubr.f32.gmra.mrb[12].mxu0 %v92_v16  ;;  %553 = vmatmul.mubr.f32.gmra.mrb[12].mxu1 %v3190_v18  ;;  %v3212_v16 = vld [vmem:[%s6912_s1 + $0x290] sm:$0xff]  ;;  %v117_v18 = vld [vmem:[%s6912_s1 + $0x128] sm:$0xff] }
  0x5c   :  { %227 = vmatprep.mubr.f32.mxu0 %v95_v19  ;;  %557 = vmatprep.mubr.f32.mxu1 %v3193_v21  ;;  %v3215_v19 = vld [vmem:[%s6912_s1 + $0x2a8] sm:$0xff]  ;;  %v4283_v21 = vmov 0  }
  0x5d   :  { %3711 = vmatpush1.bf16.msra.mxu0 %v4420_v23  ;;  %3759 = vmatpush1.bf16.msra.mxu1 %v4420_v23 }
  0x5e   :  { %3712 = vmatprep.subr.bf16.mxu0 %v6921_v0  ;;  %3760 = vmatprep.subr.bf16.mxu1 %v6921_v0 }
  0x5f   :  { %228 = vmatmul.mubr.f32.gmra.mrb[14].mxu0 %v94_v22  ;;  %558 = vmatmul.mubr.f32.gmra.mrb[14].mxu1 %v3192_v24  ;;  %v65_v22 = vld [vmem:[%s6913_s2 + $0x8] sm:$0xff]  ;;  %v67_v24 = vld [vmem:[%s6913_s2 + $0x18] sm:$0xff] }
  0x60   :  { %232 = vmatprep.mubr.f32.mxu0 %v97_v25  ;;  %562 = vmatprep.mubr.f32.mxu1 %v3195_v27  ;;  %v116_v25 = vld [vmem:[%s6912_s1 + $0x120] sm:$0xff] }
  0x61   :  { %3714 = vmatpush1.bf16.msra.mxu0 %v4432_v26  ;;  %3762 = vmatpush1.bf16.msra.mxu1 %v4432_v26  ;;  %v3214_v27 = vld [vmem:[%s6912_s1 + $0x2a0] sm:$0xff] }
  0x62   :  { %3715 = vmatprep.subr.bf16.mxu0 %v6921_v0  ;;  %3763 = vmatprep.subr.bf16.mxu1 %v6921_v0 }
  0x63   :  { %233 = vmatmul.mubr.f32.gmra.mrb[16].mxu0 %v96_v28  ;;  %563 = vmatmul.mubr.f32.gmra.mrb[16].mxu1 %v3194_v30  ;;  %v119_v28 = vld [vmem:[%s6912_s1 + $0x138] sm:$0xff] }
  0x64   :  { %237 = vmatprep.mubr.f32.mxu0 %v99_v31  ;;  %567 = vmatprep.mubr.f32.mxu1 %v3197_v33  ;;  %v3217_v30 = vld [vmem:[%s6912_s1 + $0x2b8] sm:$0xff]  ;;  %v68_v31 = vld [vmem:[%s6913_s2 + $0x20] sm:$0xff]  ;;  %v69_v33 = vld [vmem:[%s6913_s2 + $0x28] sm:$0xff] }
  0x65   :  { %3717 = vmatpush1.bf16.msra.mxu0 %v4444_v29  ;;  %3765 = vmatpush1.bf16.msra.mxu1 %v4444_v29 }
  0x66   :  { %3718 = vmatprep.subr.bf16.mxu0 %v6921_v0  ;;  %3766 = vmatprep.subr.bf16.mxu1 %v6921_v0 }
  0x67   :  { %238 = vmatmul.mubr.f32.gmra.mrb[18].mxu0 %v98_v34  ;;  %568 = vmatmul.mubr.f32.gmra.mrb[18].mxu1 %v3196_v36  ;;  %v118_v34 = vld [vmem:[%s6912_s1 + $0x130] sm:$0xff] }
  0x68   :  { %242 = vmatprep.mubr.f32.mxu0 %v101_v37  ;;  %572 = vmatprep.mubr.f32.mxu1 %v3199_v39  ;;  %v3216_v36 = vld [vmem:[%s6912_s1 + $0x2b0] sm:$0xff]  ;;  %v121_v37 = vld [vmem:[%s6912_s1 + $0x148] sm:$0xff] }
  0x69   :  { %3720 = vmatpush1.bf16.msra.mxu0 %v4456_v32  ;;  %3768 = vmatpush1.bf16.msra.mxu1 %v4456_v32  ;;  %v3219_v39 = vld [vmem:[%s6912_s1 + $0x2c8] sm:$0xff] }
  0x6a   :  { %3721 = vmatprep.subr.bf16.mxu0 %v6921_v0  ;;  %3769 = vmatprep.subr.bf16.mxu1 %v6921_v0 }
  0x6b   :  { %243 = vmatmul.mubr.f32.gmra.mrb[20].mxu0 %v100_v40  ;;  %573 = vmatmul.mubr.f32.gmra.mrb[20].mxu1 %v3198_v42  ;;  %v120_v40 = vld [vmem:[%s6912_s1 + $0x140] sm:$0xff] }
  0x6c   :  { %247 = vmatprep.mubr.f32.mxu0 %v103_v43  ;;  %577 = vmatprep.mubr.f32.mxu1 %v3201_v45  ;;  %v3218_v42 = vld [vmem:[%s6912_s1 + $0x2c0] sm:$0xff]  ;;  %v123_v43 = vld [vmem:[%s6912_s1 + $0x158] sm:$0xff] }
  0x6d   :  { %3723 = vmatpush1.bf16.msra.mxu0 %v4468_v35  ;;  %3771 = vmatpush1.bf16.msra.mxu1 %v4468_v35  ;;  %v3221_v45 = vld [vmem:[%s6912_s1 + $0x2d8] sm:$0xff] }
  0x6e   :  { %3724 = vmatprep.subr.bf16.mxu0 %v6921_v0  ;;  %3772 = vmatprep.subr.bf16.mxu1 %v6921_v0 }
  0x6f   :  { %248 = vmatmul.mubr.f32.gmra.mrb[22].mxu0 %v102_v46  ;;  %578 = vmatmul.mubr.f32.gmra.mrb[22].mxu1 %v3200_v48  ;;  %v122_v46 = vld [vmem:[%s6912_s1 + $0x150] sm:$0xff] }
  0x70   :  { %252 = vmatprep.mubr.f32.mxu0 %v105_v49  ;;  %582 = vmatprep.mubr.f32.mxu1 %v3203_v51  ;;  %v3220_v48 = vld [vmem:[%s6912_s1 + $0x2d0] sm:$0xff]  ;;  %v125_v49 = vld [vmem:[%s6912_s1 + $0x168] sm:$0xff] }
  0x71   :  { %3726 = vmatpush1.bf16.msra.mxu0 %v4480_v38  ;;  %3774 = vmatpush1.bf16.msra.mxu1 %v4480_v38  ;;  %v3223_v51 = vld [vmem:[%s6912_s1 + $0x2e8] sm:$0xff] }
  0x72   :  { %3727 = vmatprep.subr.bf16.mxu0 %v6921_v0  ;;  %3775 = vmatprep.subr.bf16.mxu1 %v6921_v0 }
  0x73   :  { %253 = vmatmul.mubr.f32.gmra.mrb[24].mxu0 %v104_v52  ;;  %583 = vmatmul.mubr.f32.gmra.mrb[24].mxu1 %v3202_v53  ;;  %v124_v52 = vld [vmem:[%s6912_s1 + $0x160] sm:$0xff] }
  0x74   :  { %257 = vmatprep.mubr.f32.mxu0 %v107_v54  ;;  %587 = vmatprep.mubr.f32.mxu1 %v3205_v55  ;;  %v3222_v53 = vld [vmem:[%s6912_s1 + $0x2e0] sm:$0xff]  ;;  %v127_v54 = vld [vmem:[%s6912_s1 + $0x178] sm:$0xff] }
  0x75   :  { %3729 = vmatpush1.bf16.msra.mxu0 %v4492_v41  ;;  %3777 = vmatpush1.bf16.msra.mxu1 %v4492_v41  ;;  %v3225_v55 = vld [vmem:[%s6912_s1 + $0x2f8] sm:$0xff] }
  0x76   :  { %3730 = vmatprep.subr.bf16.mxu0 %v6921_v0  ;;  %3778 = vmatprep.subr.bf16.mxu1 %v6921_v0 }
  0x77   :  { %258 = vmatmul.mubr.f32.gmra.mrb[26].mxu0 %v106_v56  ;;  %588 = vmatmul.mubr.f32.gmra.mrb[26].mxu1 %v3204_v57  ;;  %v126_v56 = vld [vmem:[%s6912_s1 + $0x170] sm:$0xff] }
  0x78   :  { %262 = vmatprep.mubr.f32.mxu0 %v109_v58  ;;  %592 = vmatprep.mubr.f32.mxu1 %v3207_v59  ;;  %v3224_v57 = vld [vmem:[%s6912_s1 + $0x2f0] sm:$0xff]  ;;  %v3233_v58 = vld [vmem:[%s6912_s1 + $0x308] sm:$0xff] }
  0x79   :  { %3732 = vmatpush1.bf16.msra.mxu0 %v4504_v44  ;;  %3780 = vmatpush1.bf16.msra.mxu1 %v4504_v44  ;;  %v3287_v59 = vld [vmem:[%s6912_s1 + $0x488] sm:$0xff] }
  0x7a   :  { %3733 = vmatprep.subr.bf16.mxu0 %v6921_v0  ;;  %3781 = vmatprep.subr.bf16.mxu1 %v6921_v0 }
  0x7b   :  { %263 = vmatmul.mubr.f32.gmra.mrb[28].mxu0 %v108_v60  ;;  %593 = vmatmul.mubr.f32.gmra.mrb[28].mxu1 %v3206_v61  ;;  %v3232_v60 = vld [vmem:[%s6912_s1 + $0x300] sm:$0xff] }
  0x7c   :  { %267 = vmatprep.mubr.f32.mxu0 %v111_v62  ;;  %597 = vmatprep.mubr.f32.mxu1 %v3209_v63  ;;  %v3286_v61 = vld [vmem:[%s6912_s1 + $0x480] sm:$0xff]  ;;  %v3235_v62 = vld [vmem:[%s6912_s1 + $0x318] sm:$0xff] }
  0x7d   :  { %3735 = vmatpush1.bf16.msra.mxu0 %v4516_v47  ;;  %3783 = vmatpush1.bf16.msra.mxu1 %v4516_v47  ;;  %v3289_v63 = vld [vmem:[%s6912_s1 + $0x498] sm:$0xff] }
  0x7e   :  { %3736 = vmatprep.subr.bf16.mxu0 %v6921_v0  ;;  %3784 = vmatprep.subr.bf16.mxu1 %v6921_v0 }
  0x7f   :  { %268 = vmatmul.mubr.f32.gmra.mrb[30].mxu0 %v110_v1  ;;  %598 = vmatmul.mubr.f32.gmra.mrb[30].mxu1 %v3208_v2  ;;  %v3234_v1 = vld [vmem:[%s6912_s1 + $0x310] sm:$0xff] }
  0x80   :  { %272 = vmatprep.mubr.f32.mxu0 %v113_v3  ;;  %602 = vmatprep.mubr.f32.mxu1 %v3211_v5  ;;  %v3288_v2 = vld [vmem:[%s6912_s1 + $0x490] sm:$0xff]  ;;  %v3237_v3 = vld [vmem:[%s6912_s1 + $0x328] sm:$0xff] }
  0x81   :  { %3738 = vmatpush1.bf16.msra.mxu0 %v4528_v50  ;;  %3786 = vmatpush1.bf16.msra.mxu1 %v4528_v50  ;;  %v3291_v5 = vld [vmem:[%s6912_s1 + $0x4a8] sm:$0xff] }
  0x82   :  { %3787 = vmatprep.subr.bf16.mxu0 %v6921_v0  ;;  %3835 = vmatprep.subr.bf16.mxu1 %v6921_v0 }
  0x83   :  { %273 = vmatmul.mubr.f32.gmra.mrb[32].mxu0 %v112_v7  ;;  %603 = vmatmul.mubr.f32.gmra.mrb[32].mxu1 %v3210_v8  ;;  %v3236_v7 = vld [vmem:[%s6912_s1 + $0x320] sm:$0xff] }
  0x84   :  { %277 = vmatprep.mubr.f32.mxu0 %v115_v10  ;;  %607 = vmatprep.mubr.f32.mxu1 %v3213_v11  ;;  %v3290_v8 = vld [vmem:[%s6912_s1 + $0x4a0] sm:$0xff]  ;;  %v3239_v10 = vld [vmem:[%s6912_s1 + $0x338] sm:$0xff] }
  0x85   :  { %4165 = vset.pattern.permute.xlu0 %v4283_v21  ;;  %4166 = vset.pattern.permute.xlu1 %v4283_v21  ;;  %v3293_v11 = vld [vmem:[%s6912_s1 + $0x4b8] sm:$0xff] }
  0x86   :  { %333 = vperm.xlu0 %4165, %v64_v12   ;;  %343 = vperm.xlu1 %4166, %v66_v14   ;;  %v3238_v12 = vld [vmem:[%s6912_s1 + $0x330] sm:$0xff]  ;;  %v3243_v21 = vld [vmem:[%s6912_s1 + $0x358] sm:$0xff] }
  0x87   :  { %278 = vmatmul.mubr.f32.gmra.mrb[34].mxu0 %v114_v15  ;;  %608 = vmatmul.mubr.f32.gmra.mrb[34].mxu1 %v3212_v16  ;;  %v3292_v14 = vld [vmem:[%s6912_s1 + $0x4b0] sm:$0xff]  ;;  %v3241_v15 = vld [vmem:[%s6912_s1 + $0x348] sm:$0xff] }
  0x88   :  { %282 = vmatprep.mubr.f32.mxu0 %v117_v18  ;;  %612 = vmatprep.mubr.f32.mxu1 %v3215_v19  ;;  %v3295_v16 = vld [vmem:[%s6912_s1 + $0x4c8] sm:$0xff]  ;;  %v3240_v18 = vld [vmem:[%s6912_s1 + $0x340] sm:$0xff] }
  0x89   :  { %v3294_v19 = vld [vmem:[%s6912_s1 + $0x4c0] sm:$0xff] }
  0x8a   :  { %338 = vperm.xlu0 %4165, %v65_v22   ;;  %348 = vperm.xlu1 %4166, %v67_v24   ;;  %v3297_v22 = vld [vmem:[%s6912_s1 + $0x4d8] sm:$0xff]  ;;  %v3242_v24 = vld [vmem:[%s6912_s1 + $0x350] sm:$0xff] }
  0x8b   :  { %283 = vmatmul.mubr.f32.gmra.mrb[36].mxu0 %v116_v25  ;;  %613 = vmatmul.mubr.f32.gmra.mrb[36].mxu1 %v3214_v27  ;;  %v3296_v25 = vld [vmem:[%s6912_s1 + $0x4d0] sm:$0xff]  ;;  %v3245_v27 = vld [vmem:[%s6912_s1 + $0x368] sm:$0xff] }
  0x8c   :  { %287 = vmatprep.mubr.f32.mxu0 %v119_v28  ;;  %617 = vmatprep.mubr.f32.mxu1 %v3217_v30  ;;  %v3299_v28 = vld [vmem:[%s6912_s1 + $0x4e8] sm:$0xff]  ;;  %v3244_v30 = vld [vmem:[%s6912_s1 + $0x360] sm:$0xff] }
  0x8e   :  { %353 = vperm.xlu0 %4165, %v68_v31   ;;  %358 = vperm.xlu1 %4166, %v69_v33   ;;  %v3298_v31 = vld [vmem:[%s6912_s1 + $0x4e0] sm:$0xff]  ;;  %v3247_v33 = vld [vmem:[%s6912_s1 + $0x378] sm:$0xff] }
  0x8f   :  { %288 = vmatmul.mubr.f32.gmra.mrb[38].mxu0 %v118_v34  ;;  %618 = vmatmul.mubr.f32.gmra.mrb[38].mxu1 %v3216_v36  ;;  %v3301_v34 = vld [vmem:[%s6912_s1 + $0x4f8] sm:$0xff]  ;;  %v3246_v36 = vld [vmem:[%s6912_s1 + $0x370] sm:$0xff] }
  0x90   :  { %292 = vmatprep.mubr.f32.mxu0 %v121_v37  ;;  %622 = vmatprep.mubr.f32.mxu1 %v3219_v39  ;;  %v3300_v37 = vld [vmem:[%s6912_s1 + $0x4f0] sm:$0xff]  ;;  %v3249_v39 = vld [vmem:[%s6912_s1 + $0x388] sm:$0xff] }
  0x93   :  { %293 = vmatmul.mubr.f32.gmra.mrb[40].mxu0 %v120_v40  ;;  %623 = vmatmul.mubr.f32.gmra.mrb[40].mxu1 %v3218_v42  ;;  %v3303_v40 = vld [vmem:[%s6912_s1 + $0x508] sm:$0xff]  ;;  %v3248_v42 = vld [vmem:[%s6912_s1 + $0x380] sm:$0xff] }
  0x94   :  { %297 = vmatprep.mubr.f32.mxu0 %v123_v43  ;;  %627 = vmatprep.mubr.f32.mxu1 %v3221_v45  ;;  %v3302_v43 = vld [vmem:[%s6912_s1 + $0x500] sm:$0xff]  ;;  %v3251_v45 = vld [vmem:[%s6912_s1 + $0x398] sm:$0xff] }
  0x97   :  { %298 = vmatmul.mubr.f32.gmra.mrb[42].mxu0 %v122_v46  ;;  %628 = vmatmul.mubr.f32.gmra.mrb[42].mxu1 %v3220_v48  ;;  %v3305_v46 = vld [vmem:[%s6912_s1 + $0x518] sm:$0xff]  ;;  %v3250_v48 = vld [vmem:[%s6912_s1 + $0x390] sm:$0xff] }
  0x98   :  { %302 = vmatprep.mubr.f32.mxu0 %v125_v49  ;;  %632 = vmatprep.mubr.f32.mxu1 %v3223_v51  ;;  %v3304_v49 = vld [vmem:[%s6912_s1 + $0x510] sm:$0xff]  ;;  %v3253_v51 = vld [vmem:[%s6912_s1 + $0x3a8] sm:$0xff] }
  0x9b   :  { %303 = vmatmul.mubr.f32.gmra.mrb[44].mxu0 %v124_v52  ;;  %633 = vmatmul.mubr.f32.gmra.mrb[44].mxu1 %v3222_v53  ;;  %v3307_v52 = vld [vmem:[%s6912_s1 + $0x528] sm:$0xff]  ;;  %v3252_v53 = vld [vmem:[%s6912_s1 + $0x3a0] sm:$0xff] }
  0x9c   :  { %307 = vmatprep.mubr.f32.mxu0 %v127_v54  ;;  %637 = vmatprep.mubr.f32.mxu1 %v3225_v55  ;;  %v3306_v54 = vld [vmem:[%s6912_s1 + $0x520] sm:$0xff]  ;;  %v3255_v55 = vld [vmem:[%s6912_s1 + $0x3b8] sm:$0xff] }
  0x9f   :  { %308 = vmatmul.mubr.f32.gmra.mrb[46].mxu0 %v126_v56  ;;  %638 = vmatmul.mubr.f32.gmra.mrb[46].mxu1 %v3224_v57  ;;  %v3309_v56 = vld [vmem:[%s6912_s1 + $0x538] sm:$0xff]  ;;  %v3254_v57 = vld [vmem:[%s6912_s1 + $0x3b0] sm:$0xff] }
  0xa0   :  { %822 = vmatprep.mubr.f32.mxu0 %v3233_v58  ;;  %1122 = vmatprep.mubr.f32.mxu1 %v3287_v59  ;;  %v3308_v58 = vld [vmem:[%s6912_s1 + $0x530] sm:$0xff]  ;;  %v3257_v59 = vld [vmem:[%s6912_s1 + $0x3c8] sm:$0xff] }
  0xa3   :  { %823 = vmatmul.mubr.f32.vlgmr.msra.gmra.mrb[48].mxu0 %v3232_v60  ;;  %1123 = vmatmul.mubr.f32.vlgmr.msra.gmra.mrb[48].mxu1 %v3286_v61  ;;  %v3311_v60 = vld [vmem:[%s6912_s1 + $0x548] sm:$0xff]  ;;  %v3256_v61 = vld [vmem:[%s6912_s1 + $0x3c0] sm:$0xff] }
  0xa4   :  { %827 = vmatprep.mubr.f32.mxu0 %v3235_v62  ;;  %1127 = vmatprep.mubr.f32.mxu1 %v3289_v63  ;;  %v3310_v62 = vld [vmem:[%s6912_s1 + $0x540] sm:$0xff]  ;;  %v3259_v63 = vld [vmem:[%s6912_s1 + $0x3d8] sm:$0xff] }
  0xa5   :  { %3789 = vmatpush1.bf16.msra.mxu0 %v4347_v4  ;;  %3837 = vmatpush1.bf16.msra.mxu1 %v4347_v4 }
  0xa6   :  { %3790 = vmatprep.subr.bf16.mxu0 %v6921_v0  ;;  %3838 = vmatprep.subr.bf16.mxu1 %v6921_v0 }
  0xa7   :  { %828 = vmatmul.mubr.f32.gmra.mrb[50].mxu0 %v3234_v1  ;;  %1128 = vmatmul.mubr.f32.gmra.mrb[50].mxu1 %v3288_v2  ;;  %v3313_v1 = vld [vmem:[%s6912_s1 + $0x558] sm:$0xff]  ;;  %v3258_v2 = vld [vmem:[%s6912_s1 + $0x3d0] sm:$0xff] }
  0xa8   :  { %832 = vmatprep.mubr.f32.mxu0 %v3237_v3  ;;  %1132 = vmatprep.mubr.f32.mxu1 %v3291_v5  ;;  %v3312_v3 = vld [vmem:[%s6912_s1 + $0x550] sm:$0xff]  ;;  %v3261_v5 = vld [vmem:[%s6912_s1 + $0x3e8] sm:$0xff] }
  0xa9   :  { %3792 = vmatpush1.bf16.msra.mxu0 %v4354_v6  ;;  %3840 = vmatpush1.bf16.msra.mxu1 %v4354_v6 }
  0xaa   :  { %3793 = vmatprep.subr.bf16.mxu0 %v6921_v0  ;;  %3841 = vmatprep.subr.bf16.mxu1 %v6921_v0 }
  0xab   :  { %833 = vmatmul.mubr.f32.gmra.mrb[52].mxu0 %v3236_v7  ;;  %1133 = vmatmul.mubr.f32.gmra.mrb[52].mxu1 %v3290_v8  ;;  %v3315_v7 = vld [vmem:[%s6912_s1 + $0x568] sm:$0xff]  ;;  %v3260_v8 = vld [vmem:[%s6912_s1 + $0x3e0] sm:$0xff] }
  0xac   :  { %837 = vmatprep.mubr.f32.mxu0 %v3239_v10  ;;  %1137 = vmatprep.mubr.f32.mxu1 %v3293_v11  ;;  %v3314_v10 = vld [vmem:[%s6912_s1 + $0x560] sm:$0xff]  ;;  %v3263_v11 = vld [vmem:[%s6912_s1 + $0x3f8] sm:$0xff] }
  0xad   :  { %3795 = vmatpush1.bf16.msra.mxu0 %v4366_v9  ;;  %3843 = vmatpush1.bf16.msra.mxu1 %v4366_v9 }
  0xae   :  { %3796 = vmatprep.subr.bf16.mxu0 %v6921_v0  ;;  %3844 = vmatprep.subr.bf16.mxu1 %v6921_v0 }
  0xaf   :  { %838 = vmatmul.mubr.f32.gmra.mrb[54].mxu0 %v3238_v12  ;;  %1138 = vmatmul.mubr.f32.gmra.mrb[54].mxu1 %v3292_v14  ;;  %v3317_v12 = vld [vmem:[%s6912_s1 + $0x578] sm:$0xff]  ;;  %v3262_v14 = vld [vmem:[%s6912_s1 + $0x3f0] sm:$0xff] }
  0xb0   :  { %842 = vmatprep.mubr.f32.mxu0 %v3241_v15  ;;  %1142 = vmatprep.mubr.f32.mxu1 %v3295_v16  ;;  %v3316_v15 = vld [vmem:[%s6912_s1 + $0x570] sm:$0xff]  ;;  %v3265_v16 = vld [vmem:[%s6912_s1 + $0x408] sm:$0xff] }
  0xb1   :  { %3798 = vmatpush1.bf16.msra.mxu0 %v4381_v13  ;;  %3846 = vmatpush1.bf16.msra.mxu1 %v4381_v13 }
  0xb2   :  { %3799 = vmatprep.subr.bf16.mxu0 %v6921_v0  ;;  %3847 = vmatprep.subr.bf16.mxu1 %v6921_v0 }
  0xb3   :  { %843 = vmatmul.mubr.f32.gmra.mrb[56].mxu0 %v3240_v18  ;;  %1143 = vmatmul.mubr.f32.gmra.mrb[56].mxu1 %v3294_v19  ;;  %v3319_v18 = vld [vmem:[%s6912_s1 + $0x588] sm:$0xff]  ;;  %v70_v19 = vld [vmem:[%s6914_s4] sm:$0xff] }
  0xb4   :  { %847 = vmatprep.mubr.f32.mxu0 %v3243_v21  ;;  %1147 = vmatprep.mubr.f32.mxu1 %v3297_v22  ;;  %v3264_v21 = vld [vmem:[%s6912_s1 + $0x400] sm:$0xff] }
  0xb5   :  { %3801 = vmatpush1.bf16.msra.mxu0 %v4396_v17  ;;  %3849 = vmatpush1.bf16.msra.mxu1 %v4396_v17  ;;  %v3318_v22 = vld [vmem:[%s6912_s1 + $0x580] sm:$0xff] }
  0xb6   :  { %3802 = vmatprep.subr.bf16.mxu0 %v6921_v0  ;;  %3850 = vmatprep.subr.bf16.mxu1 %v6921_v0 }
  0xb7   :  { %848 = vmatmul.mubr.f32.gmra.mrb[58].mxu0 %v3242_v24  ;;  %1148 = vmatmul.mubr.f32.gmra.mrb[58].mxu1 %v3296_v25  ;;  %v3267_v24 = vld [vmem:[%s6912_s1 + $0x418] sm:$0xff] }
  0xb8   :  { %852 = vmatprep.mubr.f32.mxu0 %v3245_v27  ;;  %1152 = vmatprep.mubr.f32.mxu1 %v3299_v28  ;;  %v3321_v25 = vld [vmem:[%s6912_s1 + $0x598] sm:$0xff]  ;;  %v71_v27 = vld [vmem:[%s6914_s4 + $0x8] sm:$0xff]  ;;  %v72_v28 = vld [vmem:[%s6914_s4 + $0x10] sm:$0xff] }
  0xb9   :  { %3804 = vmatpush1.bf16.msra.mxu0 %v4408_v20  ;;  %3852 = vmatpush1.bf16.msra.mxu1 %v4408_v20 }
  0xba   :  { %3805 = vmatprep.subr.bf16.mxu0 %v6921_v0  ;;  %3853 = vmatprep.subr.bf16.mxu1 %v6921_v0 }
  0xbb   :  { %853 = vmatmul.mubr.f32.gmra.mrb[60].mxu0 %v3244_v30  ;;  %1153 = vmatmul.mubr.f32.gmra.mrb[60].mxu1 %v3298_v31  ;;  %v3266_v30 = vld [vmem:[%s6912_s1 + $0x410] sm:$0xff] }
  0xbc   :  { %857 = vmatprep.mubr.f32.mxu0 %v3247_v33  ;;  %1157 = vmatprep.mubr.f32.mxu1 %v3301_v34  ;;  %v3320_v31 = vld [vmem:[%s6912_s1 + $0x590] sm:$0xff]  ;;  %v3269_v33 = vld [vmem:[%s6912_s1 + $0x428] sm:$0xff] }
  0xbd   :  { %3807 = vmatpush1.bf16.msra.mxu0 %v4420_v23  ;;  %3855 = vmatpush1.bf16.msra.mxu1 %v4420_v23  ;;  %v3323_v34 = vld [vmem:[%s6912_s1 + $0x5a8] sm:$0xff] }
  0xbe   :  { %3808 = vmatprep.subr.bf16.mxu0 %v6921_v0  ;;  %3856 = vmatprep.subr.bf16.mxu1 %v6921_v0 }
  0xbf   :  { %858 = vmatmul.mubr.f32.gmra.mrb[62].mxu0 %v3246_v36  ;;  %1158 = vmatmul.mubr.f32.gmra.mrb[62].mxu1 %v3300_v37  ;;  %v73_v36 = vld [vmem:[%s6914_s4 + $0x18] sm:$0xff]  ;;  %v2209_v37 = vld [vmem:[%s6915_s6] sm:$0xff] }
  0xc0   :  { %862 = vmatprep.mubr.f32.mxu0 %v3249_v39  ;;  %1162 = vmatprep.mubr.f32.mxu1 %v3303_v40  ;;  %v3268_v39 = vld [vmem:[%s6912_s1 + $0x420] sm:$0xff] }
  0xc1   :  { %3810 = vmatpush1.bf16.msra.mxu0 %v4432_v26  ;;  %3858 = vmatpush1.bf16.msra.mxu1 %v4432_v26  ;;  %v3322_v40 = vld [vmem:[%s6912_s1 + $0x5a0] sm:$0xff] }
  0xc2   :  { %3811 = vmatprep.subr.bf16.mxu0 %v6921_v0  ;;  %3859 = vmatprep.subr.bf16.mxu1 %v6921_v0 }
  0xc3   :  { %863 = vmatmul.mubr.f32.gmra.mrb[64].mxu0 %v3248_v42  ;;  %1163 = vmatmul.mubr.f32.gmra.mrb[64].mxu1 %v3302_v43  ;;  %v3271_v42 = vld [vmem:[%s6912_s1 + $0x438] sm:$0xff] }
  0xc4   :  { %867 = vmatprep.mubr.f32.mxu0 %v3251_v45  ;;  %1167 = vmatprep.mubr.f32.mxu1 %v3305_v46  ;;  %v3325_v43 = vld [vmem:[%s6912_s1 + $0x5b8] sm:$0xff]  ;;  %v2210_v45 = vld [vmem:[%s6915_s6 + $0x8] sm:$0xff]  ;;  %v3087_v46 = vld [vmem:[%s6916_s8] sm:$0x3] }
  0xc5   :  { %3813 = vmatpush1.bf16.msra.mxu0 %v4444_v29  ;;  %3861 = vmatpush1.bf16.msra.mxu1 %v4444_v29 }
  0xc6   :  { %3814 = vmatprep.subr.bf16.mxu0 %v6921_v0  ;;  %3862 = vmatprep.subr.bf16.mxu1 %v6921_v0 }
  0xc7   :  { %868 = vmatmul.mubr.f32.gmra.mrb[66].mxu0 %v3250_v48  ;;  %1168 = vmatmul.mubr.f32.gmra.mrb[66].mxu1 %v3304_v49  ;;  %v3270_v48 = vld [vmem:[%s6912_s1 + $0x430] sm:$0xff] }
  0xc8   :  { %872 = vmatprep.mubr.f32.mxu0 %v3253_v51  ;;  %1172 = vmatprep.mubr.f32.mxu1 %v3307_v52  ;;  %v3324_v49 = vld [vmem:[%s6912_s1 + $0x5b0] sm:$0xff]  ;;  %v3273_v51 = vld [vmem:[%s6912_s1 + $0x448] sm:$0xff] }
  0xc9   :  { %3816 = vmatpush1.bf16.msra.mxu0 %v4456_v32  ;;  %3864 = vmatpush1.bf16.msra.mxu1 %v4456_v32  ;;  %v3327_v52 = vld [vmem:[%s6912_s1 + $0x5c8] sm:$0xff] }
  0xca   :  { %3817 = vmatprep.subr.bf16.mxu0 %v6921_v0  ;;  %3865 = vmatprep.subr.bf16.mxu1 %v6921_v0 }
  0xcb   :  { %873 = vmatmul.mubr.f32.gmra.mrb[68].mxu0 %v3252_v53  ;;  %1173 = vmatmul.mubr.f32.gmra.mrb[68].mxu1 %v3306_v54  ;;  %v3272_v53 = vld [vmem:[%s6912_s1 + $0x440] sm:$0xff] }
  0xcc   :  { %877 = vmatprep.mubr.f32.mxu0 %v3255_v55  ;;  %1177 = vmatprep.mubr.f32.mxu1 %v3309_v56  ;;  %v3326_v54 = vld [vmem:[%s6912_s1 + $0x5c0] sm:$0xff]  ;;  %v3275_v55 = vld [vmem:[%s6912_s1 + $0x458] sm:$0xff] }
  0xcd   :  { %3819 = vmatpush1.bf16.msra.mxu0 %v4468_v35  ;;  %3867 = vmatpush1.bf16.msra.mxu1 %v4468_v35  ;;  %v3329_v56 = vld [vmem:[%s6912_s1 + $0x5d8] sm:$0xff] }
  0xce   :  { %3820 = vmatprep.subr.bf16.mxu0 %v6921_v0  ;;  %3868 = vmatprep.subr.bf16.mxu1 %v6921_v0 }
  0xcf   :  { %878 = vmatmul.mubr.f32.gmra.mrb[70].mxu0 %v3254_v57  ;;  %1178 = vmatmul.mubr.f32.gmra.mrb[70].mxu1 %v3308_v58  ;;  %v3274_v57 = vld [vmem:[%s6912_s1 + $0x450] sm:$0xff] }
  0xd0   :  { %882 = vmatprep.mubr.f32.mxu0 %v3257_v59  ;;  %1182 = vmatprep.mubr.f32.mxu1 %v3311_v60  ;;  %v3328_v58 = vld [vmem:[%s6912_s1 + $0x5d0] sm:$0xff]  ;;  %v3277_v59 = vld [vmem:[%s6912_s1 + $0x468] sm:$0xff] }
  0xd1   :  { %3822 = vmatpush1.bf16.msra.mxu0 %v4480_v38  ;;  %3870 = vmatpush1.bf16.msra.mxu1 %v4480_v38  ;;  %v3331_v60 = vld [vmem:[%s6912_s1 + $0x5e8] sm:$0xff] }
  0xd2   :  { %3823 = vmatprep.subr.bf16.mxu0 %v6921_v0  ;;  %3871 = vmatprep.subr.bf16.mxu1 %v6921_v0 }
  0xd3   :  { %883 = vmatmul.mubr.f32.gmra.mrb[72].mxu0 %v3256_v61  ;;  %1183 = vmatmul.mubr.f32.gmra.mrb[72].mxu1 %v3310_v62  ;;  %v3276_v61 = vld [vmem:[%s6912_s1 + $0x460] sm:$0xff] }
  0xd4   :  { %887 = vmatprep.mubr.f32.mxu0 %v3259_v63  ;;  %1187 = vmatprep.mubr.f32.mxu1 %v3313_v1  ;;  %v3330_v62 = vld [vmem:[%s6912_s1 + $0x5e0] sm:$0xff]  ;;  %v3279_v63 = vld [vmem:[%s6912_s1 + $0x478] sm:$0xff] }
  0xd5   :  { %3825 = vmatpush1.bf16.msra.mxu0 %v4492_v41  ;;  %3873 = vmatpush1.bf16.msra.mxu1 %v4492_v41  ;;  %v3333_v1 = vld [vmem:[%s6912_s1 + $0x5f8] sm:$0xff] }
  0xd6   :  { %3826 = vmatprep.subr.bf16.mxu0 %v6921_v0  ;;  %3874 = vmatprep.subr.bf16.mxu1 %v6921_v0 }
  0xd7   :  { %888 = vmatmul.mubr.f32.gmra.mrb[74].mxu0 %v3258_v2  ;;  %1188 = vmatmul.mubr.f32.gmra.mrb[74].mxu1 %v3312_v3  ;;  %v3278_v2 = vld [vmem:[%s6912_s1 + $0x470] sm:$0xff] }
  0xd8   :  { %892 = vmatprep.mubr.f32.mxu0 %v3261_v5  ;;  %1192 = vmatprep.mubr.f32.mxu1 %v3315_v7  ;;  %v3332_v3 = vld [vmem:[%s6912_s1 + $0x5f0] sm:$0xff]  ;;  %v3341_v5 = vld [vmem:[%s6912_s1 + $0x608] sm:$0xff] }
  0xd9   :  { %3828 = vmatpush1.bf16.msra.mxu0 %v4504_v44  ;;  %3876 = vmatpush1.bf16.msra.mxu1 %v4504_v44  ;;  %v3395_v7 = vld [vmem:[%s6912_s1 + $0x788] sm:$0xff] }
  0xda   :  { %3829 = vmatprep.subr.bf16.mxu0 %v6921_v0  ;;  %3877 = vmatprep.subr.bf16.mxu1 %v6921_v0 }
  0xdb   :  { %893 = vmatmul.mubr.f32.gmra.mrb[76].mxu0 %v3260_v8  ;;  %1193 = vmatmul.mubr.f32.gmra.mrb[76].mxu1 %v3314_v10  ;;  %v3340_v8 = vld [vmem:[%s6912_s1 + $0x600] sm:$0xff] }
  0xdc   :  { %897 = vmatprep.mubr.f32.mxu0 %v3263_v11  ;;  %1197 = vmatprep.mubr.f32.mxu1 %v3317_v12  ;;  %v3394_v10 = vld [vmem:[%s6912_s1 + $0x780] sm:$0xff]  ;;  %v3343_v11 = vld [vmem:[%s6912_s1 + $0x618] sm:$0xff] }
  0xdd   :  { %3831 = vmatpush1.bf16.msra.mxu0 %v4516_v47  ;;  %3879 = vmatpush1.bf16.msra.mxu1 %v4516_v47  ;;  %v3397_v12 = vld [vmem:[%s6912_s1 + $0x798] sm:$0xff] }
  0xde   :  { %3832 = vmatprep.subr.bf16.mxu0 %v6921_v0  ;;  %3880 = vmatprep.subr.bf16.mxu1 %v6921_v0 }
  0xdf   :  { %898 = vmatmul.mubr.f32.gmra.mrb[78].mxu0 %v3262_v14  ;;  %1198 = vmatmul.mubr.f32.gmra.mrb[78].mxu1 %v3316_v15  ;;  %v3342_v14 = vld [vmem:[%s6912_s1 + $0x610] sm:$0xff] }
  0xe0   :  { %902 = vmatprep.mubr.f32.mxu0 %v3265_v16  ;;  %1202 = vmatprep.mubr.f32.mxu1 %v3319_v18  ;;  %v3396_v15 = vld [vmem:[%s6912_s1 + $0x790] sm:$0xff]  ;;  %v3345_v16 = vld [vmem:[%s6912_s1 + $0x628] sm:$0xff] }
  0xe1   :  { %3834 = vmatpush1.bf16.msra.mxu0 %v4528_v50  ;;  %3882 = vmatpush1.bf16.msra.mxu1 %v4528_v50  ;;  %v3399_v18 = vld [vmem:[%s6912_s1 + $0x7a8] sm:$0xff] }
  0xe2   :  { %3883 = vmatprep.subr.bf16.mxu0 %v6921_v0  ;;  %2536 = vperm.xlu0 %4165, %v70_v19   ;;  %v3344_v19 = vld [vmem:[%s6912_s1 + $0x620] sm:$0xff] }
  0xe3   :  { %903 = vmatmul.mubr.f32.gmra.mrb[80].mxu0 %v3264_v21  ;;  %1203 = vmatmul.mubr.f32.gmra.mrb[80].mxu1 %v3318_v22  ;;  %v3398_v21 = vld [vmem:[%s6912_s1 + $0x7a0] sm:$0xff]  ;;  %v3401_v22 = vld [vmem:[%s6912_s1 + $0x7b8] sm:$0xff] }
  0xe4   :  { %907 = vmatprep.mubr.f32.mxu0 %v3267_v24  ;;  %1207 = vmatprep.mubr.f32.mxu1 %v3321_v25  ;;  %v3346_v24 = vld [vmem:[%s6912_s1 + $0x630] sm:$0xff] }
  0xe5   :  { %2541 = vperm.xlu1 %4166, %v71_v27   ;;  %3931 = vmatprep.subr.bf16.mxu1 %v6921_v0  ;;  %v3400_v25 = vld [vmem:[%s6912_s1 + $0x7b0] sm:$0xff]  ;;  %v3403_v27 = vld [vmem:[%s6912_s1 + $0x7c8] sm:$0xff] }
  0xe6   :  { %2546 = vperm.xlu0 %4165, %v72_v28   ;;  %v3348_v28 = vld [vmem:[%s6912_s1 + $0x640] sm:$0xff] }
  0xe7   :  { %908 = vmatmul.mubr.f32.gmra.mrb[82].mxu0 %v3266_v30  ;;  %1208 = vmatmul.mubr.f32.gmra.mrb[82].mxu1 %v3320_v31  ;;  %v3402_v30 = vld [vmem:[%s6912_s1 + $0x7c0] sm:$0xff]  ;;  %v3405_v31 = vld [vmem:[%s6912_s1 + $0x7d8] sm:$0xff] }
  0xe8   :  { %912 = vmatprep.mubr.f32.mxu0 %v3269_v33  ;;  %1212 = vmatprep.mubr.f32.mxu1 %v3323_v34  ;;  %v3350_v33 = vld [vmem:[%s6912_s1 + $0x650] sm:$0xff] }
  0xe9   :  { %2551 = vperm.xlu1 %4166, %v73_v36   ;;  %v3404_v34 = vld [vmem:[%s6912_s1 + $0x7d0] sm:$0xff]  ;;  %v3353_v36 = vld [vmem:[%s6912_s1 + $0x668] sm:$0xff] }
  0xea   :  { %2668 = vperm.xlu0 %4165, %v2209_v37  }
  0xeb   :  { %913 = vmatmul.mubr.f32.gmra.mrb[84].mxu0 %v3268_v39  ;;  %1213 = vmatmul.mubr.f32.gmra.mrb[84].mxu1 %v3322_v40 }
  0xec   :  { %917 = vmatprep.mubr.f32.mxu0 %v3271_v42  ;;  %1217 = vmatprep.mubr.f32.mxu1 %v3325_v43  ;;  %v3352_v43 = vld [vmem:[%s6912_s1 + $0x660] sm:$0xff] }
  0xed   :  { %2673 = vperm.xlu1 %4166, %v2210_v45   ;;  %v3355_v45 = vld [vmem:[%s6912_s1 + $0x678] sm:$0xff] }
  0xee   :  { %3090 = vperm.xlu0 %4165, %v3087_v46   ;;  %v3409_v46 = vld [vmem:[%s6912_s1 + $0x7f8] sm:$0xff] }
  0xef   :  { %918 = vmatmul.mubr.f32.gmra.mrb[86].mxu0 %v3270_v48  ;;  %1218 = vmatmul.mubr.f32.gmra.mrb[86].mxu1 %v3324_v49 }
  0xf0   :  { %922 = vmatprep.mubr.f32.mxu0 %v3273_v51  ;;  %1222 = vmatprep.mubr.f32.mxu1 %v3327_v52 }
  0xf3   :  { %923 = vmatmul.mubr.f32.gmra.mrb[88].mxu0 %v3272_v53  ;;  %1223 = vmatmul.mubr.f32.gmra.mrb[88].mxu1 %v3326_v54  ;;  %v3354_v53 = vld [vmem:[%s6912_s1 + $0x670] sm:$0xff]  ;;  %v3357_v54 = vld [vmem:[%s6912_s1 + $0x688] sm:$0xff] }
  0xf4   :  { %927 = vmatprep.mubr.f32.mxu0 %v3275_v55  ;;  %1227 = vmatprep.mubr.f32.mxu1 %v3329_v56  ;;  %v3411_v55 = vld [vmem:[%s6912_s1 + $0x808] sm:$0xff] }
  0xf7   :  { %928 = vmatmul.mubr.f32.gmra.mrb[90].mxu0 %v3274_v57  ;;  %1228 = vmatmul.mubr.f32.gmra.mrb[90].mxu1 %v3328_v58 }
  0xf8   :  { %932 = vmatprep.mubr.f32.mxu0 %v3277_v59  ;;  %1232 = vmatprep.mubr.f32.mxu1 %v3331_v60  ;;  %v3356_v60 = vld [vmem:[%s6912_s1 + $0x680] sm:$0xff] }
  0xfb   :  { %933 = vmatmul.mubr.f32.gmra.mrb[92].mxu0 %v3276_v61  ;;  %1233 = vmatmul.mubr.f32.gmra.mrb[92].mxu1 %v3330_v62  ;;  %v3359_v61 = vld [vmem:[%s6912_s1 + $0x698] sm:$0xff] }
  0xfc   :  { %937 = vmatprep.mubr.f32.mxu0 %v3279_v63  ;;  %1237 = vmatprep.mubr.f32.mxu1 %v3333_v1  ;;  %v3413_v62 = vld [vmem:[%s6912_s1 + $0x818] sm:$0xff] }
  0xff   :  { %938 = vmatmul.mubr.f32.gmra.mrb[94].mxu0 %v3278_v2  ;;  %1238 = vmatmul.mubr.f32.gmra.mrb[94].mxu1 %v3332_v3 }
 0x100   :  { %1422 = vmatprep.mubr.f32.mxu0 %v3341_v5  ;;  %1722 = vmatprep.mubr.f32.mxu1 %v3395_v7  ;;  %v3358_v5 = vld [vmem:[%s6912_s1 + $0x690] sm:$0xff]  ;;  %v3361_v7 = vld [vmem:[%s6912_s1 + $0x6a8] sm:$0xff] }
 0x103   :  { %1423 = vmatmul.mubr.f32.vlgmr.msra.gmra.mrb[96].mxu0 %v3340_v8  ;;  %1723 = vmatmul.mubr.f32.vlgmr.msra.gmra.mrb[96].mxu1 %v3394_v10  ;;  %v3415_v8 = vld [vmem:[%s6912_s1 + $0x828] sm:$0xff] }
 0x104   :  { %1427 = vmatprep.mubr.f32.mxu0 %v3343_v11  ;;  %1727 = vmatprep.mubr.f32.mxu1 %v3397_v12 }
 0x105   :  { %3885 = vmatpush1.bf16.msra.mxu0 %v4347_v4  ;;  %3932 = vmatpush1.bf16.msra.mxu1 %v6921_v0  ;;  %v3347_v4 = vld [vmem:[%s6912_s1 + $0x638] sm:$0xff] }
 0x106   :  { %3886 = vmatprep.subr.bf16.mxu0 %v6921_v0  ;;  %3933 = vmatprep.subr.bf16.mxu1 %v6921_v0 }
 0x107   :  { %1428 = vmatmul.mubr.f32.gmra.mrb[98].mxu0 %v3342_v14  ;;  %1728 = vmatmul.mubr.f32.gmra.mrb[98].mxu1 %v3396_v15  ;;  %v3360_v15 = vld [vmem:[%s6912_s1 + $0x6a0] sm:$0xff] }
 0x108   :  { %1432 = vmatprep.mubr.f32.mxu0 %v3345_v16  ;;  %1732 = vmatprep.mubr.f32.mxu1 %v3399_v18  ;;  %v3363_v16 = vld [vmem:[%s6912_s1 + $0x6b8] sm:$0xff] }
 0x109   :  { %3888 = vmatpush1.bf16.msra.mxu0 %v4354_v6  ;;  %3934 = vmatpush1.bf16.msra.mxu1 %v6921_v0  ;;  %v3349_v6 = vld [vmem:[%s6912_s1 + $0x648] sm:$0xff]  ;;  %v3417_v18 = vld [vmem:[%s6912_s1 + $0x838] sm:$0xff] }
 0x10a   :  { %3889 = vmatprep.subr.bf16.mxu0 %v6921_v0  ;;  %3935 = vmatprep.subr.bf16.mxu1 %v6921_v0 }
 0x10b   :  { %1433 = vmatmul.mubr.f32.gmra.mrb[100].mxu0 %v3344_v19  ;;  %1733 = vmatmul.mubr.f32.gmra.mrb[100].mxu1 %v3398_v21 }
 0x10c   :  { %1437 = vmatprep.mubr.f32.mxu0 %v3347_v4  ;;  %1737 = vmatprep.mubr.f32.mxu1 %v3401_v22 }
 0x10d   :  { %3891 = vmatpush1.bf16.msra.mxu0 %v4366_v9  ;;  %3936 = vmatpush1.bf16.msra.mxu1 %v6921_v0  ;;  %v3351_v9 = vld [vmem:[%s6912_s1 + $0x658] sm:$0xff] }
 0x10e   :  { %3892 = vmatprep.subr.bf16.mxu0 %v6921_v0  ;;  %3937 = vmatprep.subr.bf16.mxu1 %v6921_v0 }
 0x10f   :  { %1438 = vmatmul.mubr.f32.gmra.mrb[102].mxu0 %v3346_v24  ;;  %1738 = vmatmul.mubr.f32.gmra.mrb[102].mxu1 %v3400_v25  ;;  %v3362_v24 = vld [vmem:[%s6912_s1 + $0x6b0] sm:$0xff]  ;;  %v3365_v25 = vld [vmem:[%s6912_s1 + $0x6c8] sm:$0xff] }
 0x110   :  { %1442 = vmatprep.mubr.f32.mxu0 %v3349_v6  ;;  %1742 = vmatprep.mubr.f32.mxu1 %v3403_v27  ;;  %v3419_v6 = vld [vmem:[%s6912_s1 + $0x848] sm:$0xff] }
 0x111   :  { %3894 = vmatpush1.bf16.msra.mxu0 %v4381_v13  ;;  %v3407_v13 = vld [vmem:[%s6912_s1 + $0x7e8] sm:$0xff] }
 0x112   :  { %3895 = vmatprep.subr.bf16.mxu0 %v6921_v0 }
 0x113   :  { %1443 = vmatmul.mubr.f32.gmra.mrb[104].mxu0 %v3348_v28  ;;  %1743 = vmatmul.mubr.f32.gmra.mrb[104].mxu1 %v3402_v30 }
 0x114   :  { %1447 = vmatprep.mubr.f32.mxu0 %v3351_v9  ;;  %1747 = vmatprep.mubr.f32.mxu1 %v3405_v31 }
 0x115   :  { %3897 = vmatpush1.bf16.msra.mxu0 %v4396_v17  ;;  %v3406_v17 = vld [vmem:[%s6912_s1 + $0x7e0] sm:$0xff] }
 0x116   :  { %v5366_v37 = vpop.f32.mrb[0].mxu0  ;;  %v5368_v39 = vpop.f32.mrb[0].mxu1  ;;  %3898 = vmatprep.subr.bf16.mxu0 %v6921_v0 }
 0x117   :  { %v196_v40 = vpop.f32.mrb[1].mxu0  ;;  %1448 = vmatmul.mubr.f32.gmra.mrb[106].mxu0 %v3350_v33  ;;  %1748 = vmatmul.mubr.f32.gmra.mrb[106].mxu1 %v3404_v34  ;;  %v526_v42 = vpop.f32.mrb[1].mxu1  ;;  %v3418_v34 = vld [vmem:[%s6912_s1 + $0x840] sm:$0xff] }
 0x118   :  { %1452 = vmatprep.mubr.f32.mxu0 %v3353_v36  ;;  %1752 = vmatprep.mubr.f32.mxu1 %v3407_v13  ;;  %v3367_v36 = vld [vmem:[%s6912_s1 + $0x6d8] sm:$0xff] }
 0x119   :  { %3900 = vmatpush1.bf16.msra.mxu0 %v4408_v20  ;;  %v3408_v20 = vld [vmem:[%s6912_s1 + $0x7f0] sm:$0xff]  ;;  %v3421_v13 = vld [vmem:[%s6912_s1 + $0x858] sm:$0xff] }
 0x11a   :  { %v5384_v48 = vpop.f32.mrb[2].mxu0  ;;  %v5386_v49 = vpop.f32.mrb[2].mxu1  ;;  %3901 = vmatprep.subr.bf16.mxu0 %v6921_v0 }
 0x11b   :  { %v201_v51 = vpop.f32.mrb[3].mxu0  ;;  %1453 = vmatmul.mubr.f32.gmra.mrb[108].mxu0 %v3352_v43  ;;  %1753 = vmatmul.mubr.f32.gmra.mrb[108].mxu1 %v3406_v17  ;;  %v531_v52 = vpop.f32.mrb[3].mxu1 }
 0x11c   :  { %1457 = vmatprep.mubr.f32.mxu0 %v3355_v45  ;;  %1757 = vmatprep.mubr.f32.mxu1 %v3409_v46  ;;  %v3420_v51 = vld [vmem:[%s6912_s1 + $0x850] sm:$0xff]  ;;  %v3369_v52 = vld [vmem:[%s6912_s1 + $0x6e8] sm:$0xff] }
 0x11d   :  { %3903 = vmatpush1.bf16.msra.mxu0 %v4420_v23  ;;  %v3410_v23 = vld [vmem:[%s6912_s1 + $0x800] sm:$0xff] }
 0x11e   :  { %v5402_v56 = vpop.f32.mrb[4].mxu0  ;;  %v5404_v57 = vpop.f32.mrb[4].mxu1  ;;  %3904 = vmatprep.subr.bf16.mxu0 %v6921_v0 }
 0x11f   :  { %v206_v58 = vpop.f32.mrb[5].mxu0  ;;  %1458 = vmatmul.mubr.f32.gmra.mrb[110].mxu0 %v3354_v53  ;;  %1758 = vmatmul.mubr.f32.gmra.mrb[110].mxu1 %v3408_v20  ;;  %v536_v59 = vpop.f32.mrb[5].mxu1  ;;  %v3423_v53 = vld [vmem:[%s6912_s1 + $0x868] sm:$0xff] }
 0x120   :  { %1462 = vmatprep.mubr.f32.mxu0 %v3357_v54  ;;  %1762 = vmatprep.mubr.f32.mxu1 %v3411_v55 }
 0x121   :  { %3906 = vmatpush1.bf16.msra.mxu0 %v4432_v26  ;;  %v3412_v26 = vld [vmem:[%s6912_s1 + $0x810] sm:$0xff] }
 0x122   :  { %v5420_v63 = vpop.f32.mrb[6].mxu0  ;;  %v5422_v1 = vpop.f32.mrb[6].mxu1  ;;  %3907 = vmatprep.subr.bf16.mxu0 %v6921_v0 }
 0x123   :  { %v211_v2 = vpop.f32.mrb[7].mxu0  ;;  %1463 = vmatmul.mubr.f32.gmra.mrb[112].mxu0 %v3356_v60  ;;  %1763 = vmatmul.mubr.f32.gmra.mrb[112].mxu1 %v3410_v23  ;;  %v541_v3 = vpop.f32.mrb[7].mxu1  ;;  %v3422_v23 = vld [vmem:[%s6912_s1 + $0x860] sm:$0xff] }
 0x124   :  { %1467 = vmatprep.mubr.f32.mxu0 %v3359_v61  ;;  %1767 = vmatprep.mubr.f32.mxu1 %v3413_v62  ;;  %v3371_v61 = vld [vmem:[%s6912_s1 + $0x6f8] sm:$0xff] }
 0x125   :  { %3909 = vmatpush1.bf16.msra.mxu0 %v4444_v29  ;;  %v3414_v29 = vld [vmem:[%s6912_s1 + $0x820] sm:$0xff]  ;;  %v3425_v62 = vld [vmem:[%s6912_s1 + $0x878] sm:$0xff] }
 0x126   :  { %v5438_v10 = vpop.f32.mrb[8].mxu0  ;;  %v5440_v11 = vpop.f32.mrb[8].mxu1  ;;  %3910 = vmatprep.subr.bf16.mxu0 %v6921_v0 }
 0x127   :  { %v216_v12 = vpop.f32.mrb[9].mxu0  ;;  %1468 = vmatmul.mubr.f32.gmra.mrb[114].mxu0 %v3358_v5  ;;  %1768 = vmatmul.mubr.f32.gmra.mrb[114].mxu1 %v3412_v26  ;;  %v546_v14 = vpop.f32.mrb[9].mxu1 }
 0x128   :  { %1472 = vmatprep.mubr.f32.mxu0 %v3361_v7  ;;  %1772 = vmatprep.mubr.f32.mxu1 %v3415_v8  ;;  %v3424_v12 = vld [vmem:[%s6912_s1 + $0x870] sm:$0xff]  ;;  %v3373_v14 = vld [vmem:[%s6912_s1 + $0x708] sm:$0xff] }
 0x129   :  { %3912 = vmatpush1.bf16.msra.mxu0 %v4456_v32  ;;  %v3416_v32 = vld [vmem:[%s6912_s1 + $0x830] sm:$0xff] }
 0x12a   :  { %v5456_v19 = vpop.f32.mrb[10].mxu0  ;;  %v5458_v21 = vpop.f32.mrb[10].mxu1  ;;  %3913 = vmatprep.subr.bf16.mxu0 %v6921_v0 }
 0x12b   :  { %v221_v4 = vpop.f32.mrb[11].mxu0  ;;  %1473 = vmatmul.mubr.f32.gmra.mrb[116].mxu0 %v3360_v15  ;;  %1773 = vmatmul.mubr.f32.gmra.mrb[116].mxu1 %v3414_v29  ;;  %v551_v22 = vpop.f32.mrb[11].mxu1  ;;  %v3427_v15 = vld [vmem:[%s6912_s1 + $0x888] sm:$0xff] }
 0x12c   :  { %1477 = vmatprep.mubr.f32.mxu0 %v3363_v16  ;;  %1777 = vmatprep.mubr.f32.mxu1 %v3417_v18 }
 0x12d   :  { %3915 = vmatpush1.bf16.msra.mxu0 %v4468_v35  ;;  %v3364_v35 = vld [vmem:[%s6912_s1 + $0x6c0] sm:$0xff] }
 0x12e   :  { %v5474_v27 = vpop.f32.mrb[12].mxu0  ;;  %v5476_v28 = vpop.f32.mrb[12].mxu1  ;;  %3916 = vmatprep.subr.bf16.mxu0 %v6921_v0 }
 0x12f   :  { %v313_v30 = vmax.f32 %v5366_v37, %v5474_v27  ;;  %v226_v9 = vpop.f32.mrb[13].mxu0  ;;  %1478 = vmatmul.mubr.f32.gmra.mrb[118].mxu0 %v3362_v24  ;;  %1778 = vmatmul.mubr.f32.gmra.mrb[118].mxu1 %v3416_v32  ;;  %v643_v31 = vmax.f32 %v5368_v39, %v5476_v28  ;;  %v556_v33 = vpop.f32.mrb[13].mxu1  ;;  %v3426_v32 = vld [vmem:[%s6912_s1 + $0x880] sm:$0xff]  ;;  %v3450_v28 = vld [vmem:[%s6912_s1 + $0x910] sm:$0xff] }
 0x130   :  { %1482 = vmatprep.mubr.f32.mxu0 %v3365_v25  ;;  %1782 = vmatprep.mubr.f32.mxu1 %v3419_v6  ;;  %v3375_v25 = vld [vmem:[%s6912_s1 + $0x718] sm:$0xff] }
 0x131   :  { %3918 = vmatpush1.bf16.msra.mxu0 %v4480_v38  ;;  %v3366_v38 = vld [vmem:[%s6912_s1 + $0x6d0] sm:$0xff]  ;;  %v3429_v6 = vld [vmem:[%s6912_s1 + $0x898] sm:$0xff] }
 0x132   :  { %v5496_v40 = vpop.f32.mrb[14].mxu0  ;;  %v5498_v42 = vpop.f32.mrb[14].mxu1  ;;  %3919 = vmatprep.subr.bf16.mxu0 %v6921_v0 }
 0x133   :  { %v314_v43 = vmax.f32 %v5384_v48, %v5496_v40  ;;  %v231_v17 = vpop.f32.mrb[15].mxu0  ;;  %1483 = vmatmul.mubr.f32.gmra.mrb[120].mxu0 %v3364_v35  ;;  %1783 = vmatmul.mubr.f32.gmra.mrb[120].mxu1 %v3418_v34  ;;  %v644_v45 = vmax.f32 %v5386_v49, %v5498_v42  ;;  %v561_v46 = vpop.f32.mrb[15].mxu1 }
 0x134   :  { %1487 = vmatprep.mubr.f32.mxu0 %v3367_v36  ;;  %1787 = vmatprep.mubr.f32.mxu1 %v3421_v13  ;;  %v3428_v17 = vld [vmem:[%s6912_s1 + $0x890] sm:$0xff]  ;;  %v3377_v46 = vld [vmem:[%s6912_s1 + $0x728] sm:$0xff] }
 0x135   :  { %3921 = vmatpush1.bf16.msra.mxu0 %v4492_v41  ;;  %v3368_v41 = vld [vmem:[%s6912_s1 + $0x6e0] sm:$0xff] }
 0x136   :  { %v5518_v20 = vpop.f32.mrb[16].mxu0  ;;  %v5520_v54 = vpop.f32.mrb[16].mxu1  ;;  %3922 = vmatprep.subr.bf16.mxu0 %v6921_v0 }
 0x137   :  { %v315_v55 = vmax.f32 %v5402_v56, %v5518_v20  ;;  %v236_v58 = vpop.f32.mrb[17].mxu0  ;;  %1488 = vmatmul.mubr.f32.gmra.mrb[122].mxu0 %v3366_v38  ;;  %1788 = vmatmul.mubr.f32.gmra.mrb[122].mxu1 %v3420_v51  ;;  %v645_v59 = vmax.f32 %v5404_v57, %v5520_v54  ;;  %v566_v60 = vpop.f32.mrb[17].mxu1  ;;  %v3431_v38 = vld [vmem:[%s6912_s1 + $0x8a8] sm:$0xff] }
 0x138   :  { %1492 = vmatprep.mubr.f32.mxu0 %v3369_v52  ;;  %1792 = vmatprep.mubr.f32.mxu1 %v3423_v53  ;;  %v3376_v60 = vld [vmem:[%s6912_s1 + $0x720] sm:$0xff] }
 0x139   :  { %3924 = vmatpush1.bf16.msra.mxu0 %v4504_v44  ;;  %v3370_v44 = vld [vmem:[%s6912_s1 + $0x6f0] sm:$0xff] }
 0x13a   :  { %v5540_v2 = vpop.f32.mrb[18].mxu0  ;;  %v5542_v3 = vpop.f32.mrb[18].mxu1  ;;  %3925 = vmatprep.subr.bf16.mxu0 %v6921_v0 }
 0x13b   :  { %v316_v5 = vmax.f32 %v5420_v63, %v5540_v2  ;;  %v241_v26 = vpop.f32.mrb[19].mxu0  ;;  %1493 = vmatmul.mubr.f32.gmra.mrb[124].mxu0 %v3368_v41  ;;  %1793 = vmatmul.mubr.f32.gmra.mrb[124].mxu1 %v3422_v23  ;;  %v646_v7 = vmax.f32 %v5422_v1, %v5542_v3  ;;  %v571_v8 = vpop.f32.mrb[19].mxu1  ;;  %v3430_v41 = vld [vmem:[%s6912_s1 + $0x8a0] sm:$0xff]  ;;  %v3379_v23 = vld [vmem:[%s6912_s1 + $0x738] sm:$0xff] }
 0x13c   :  { %1497 = vmatprep.mubr.f32.mxu0 %v3371_v61  ;;  %1797 = vmatprep.mubr.f32.mxu1 %v3425_v62  ;;  %v3433_v61 = vld [vmem:[%s6912_s1 + $0x8b8] sm:$0xff] }
 0x13d   :  { %3927 = vmatpush1.bf16.msra.mxu0 %v4516_v47  ;;  %v3372_v47 = vld [vmem:[%s6912_s1 + $0x700] sm:$0xff] }
 0x13e   :  { %v5562_v29 = vpop.f32.mrb[20].mxu0  ;;  %v5564_v16 = vpop.f32.mrb[20].mxu1  ;;  %3928 = vmatprep.subr.bf16.mxu0 %v6921_v0 }
 0x13f   :  { %v317_v18 = vmax.f32 %v5438_v10, %v5562_v29  ;;  %v246_v4 = vpop.f32.mrb[21].mxu0  ;;  %1498 = vmatmul.mubr.f32.gmra.mrb[126].mxu0 %v3370_v44  ;;  %1798 = vmatmul.mubr.f32.gmra.mrb[126].mxu1 %v3424_v12  ;;  %v647_v22 = vmax.f32 %v5440_v11, %v5564_v16  ;;  %v576_v24 = vpop.f32.mrb[21].mxu1  ;;  %v3378_v12 = vld [vmem:[%s6912_s1 + $0x730] sm:$0xff] }
 0x140   :  { %1502 = vmatprep.mubr.f32.mxu0 %v3373_v14  ;;  %1802 = vmatprep.mubr.f32.mxu1 %v3427_v15  ;;  %v3432_v14 = vld [vmem:[%s6912_s1 + $0x8b0] sm:$0xff]  ;;  %v3381_v15 = vld [vmem:[%s6912_s1 + $0x748] sm:$0xff] }
 0x141   :  { %3930 = vmatpush1.bf16.msra.mxu0 %v4528_v50  ;;  %v3374_v50 = vld [vmem:[%s6912_s1 + $0x710] sm:$0xff]  ;;  %v3435_v4 = vld [vmem:[%s6912_s1 + $0x8c8] sm:$0xff] }
 0x142   :  { %v5584_v9 = vpop.f32.mrb[22].mxu0  ;;  %v5586_v33 = vpop.f32.mrb[22].mxu1  ;;  %4026 = vmatprep.subr.bf16.mxu0 %v6921_v0 }
 0x143   :  { %v318_v35 = vmax.f32 %v5456_v19, %v5584_v9  ;;  %v251_v34 = vpop.f32.mrb[23].mxu0  ;;  %1503 = vmatmul.mubr.f32.gmra.mrb[128].mxu0 %v3372_v47  ;;  %1803 = vmatmul.mubr.f32.gmra.mrb[128].mxu1 %v3426_v32  ;;  %v648_v36 = vmax.f32 %v5458_v21, %v5586_v33  ;;  %v581_v13 = vpop.f32.mrb[23].mxu1 }
 0x144   :  { %1507 = vmatprep.mubr.f32.mxu0 %v3375_v25  ;;  %1807 = vmatprep.mubr.f32.mxu1 %v3429_v6  ;;  %v3380_v6 = vld [vmem:[%s6912_s1 + $0x740] sm:$0xff]  ;;  %v3383_v13 = vld [vmem:[%s6912_s1 + $0x758] sm:$0xff] }
 0x145   :  { %v3434_v34 = vld [vmem:[%s6912_s1 + $0x8c0] sm:$0xff] }
 0x146   :  { %v5605_v51 = vpop.f32.mrb[24].mxu0  ;;  %v5607_v52 = vpop.f32.mrb[24].mxu1 }
 0x147   :  { %v256_v53 = vpop.f32.mrb[25].mxu0  ;;  %1508 = vmatmul.mubr.f32.gmra.mrb[130].mxu0 %v3374_v50  ;;  %1808 = vmatmul.mubr.f32.gmra.mrb[130].mxu1 %v3428_v17  ;;  %v586_v58 = vpop.f32.mrb[25].mxu1  ;;  %v3437_v50 = vld [vmem:[%s6912_s1 + $0x8d8] sm:$0xff] }
 0x148   :  { %1512 = vmatprep.mubr.f32.mxu0 %v3377_v46  ;;  %1812 = vmatprep.mubr.f32.mxu1 %v3431_v38  ;;  %v3382_v58 = vld [vmem:[%s6912_s1 + $0x750] sm:$0xff] }
 0x14a   :  { %v5621_v62 = vpop.f32.mrb[26].mxu0  ;;  %v5623_v26 = vpop.f32.mrb[26].mxu1 }
 0x14b   :  { %v261_v8 = vpop.f32.mrb[27].mxu0  ;;  %1513 = vmatmul.mubr.f32.gmra.mrb[132].mxu0 %v3376_v60  ;;  %1813 = vmatmul.mubr.f32.gmra.mrb[132].mxu1 %v3430_v41  ;;  %v591_v44 = vpop.f32.mrb[27].mxu1  ;;  %v3436_v60 = vld [vmem:[%s6912_s1 + $0x8d0] sm:$0xff]  ;;  %v3385_v41 = vld [vmem:[%s6912_s1 + $0x768] sm:$0xff] }
 0x14c   :  { %1517 = vmatprep.mubr.f32.mxu0 %v3379_v23  ;;  %1817 = vmatprep.mubr.f32.mxu1 %v3433_v61  ;;  %v3439_v23 = vld [vmem:[%s6912_s1 + $0x8e8] sm:$0xff] }
 0x14e   :  { %v5637_v24 = vpop.f32.mrb[28].mxu0  ;;  %v5639_v47 = vpop.f32.mrb[28].mxu1 }
 0x14f   :  { %v266_v32 = vpop.f32.mrb[29].mxu0  ;;  %1518 = vmatmul.mubr.f32.gmra.mrb[134].mxu0 %v3378_v12  ;;  %1818 = vmatmul.mubr.f32.gmra.mrb[134].mxu1 %v3432_v14  ;;  %v596_v25 = vpop.f32.mrb[29].mxu1  ;;  %v3384_v14 = vld [vmem:[%s6912_s1 + $0x760] sm:$0xff] }
 0x150   :  { %1522 = vmatprep.mubr.f32.mxu0 %v3381_v15  ;;  %1822 = vmatprep.mubr.f32.mxu1 %v3435_v4  ;;  %v3438_v15 = vld [vmem:[%s6912_s1 + $0x8e0] sm:$0xff]  ;;  %v3387_v4 = vld [vmem:[%s6912_s1 + $0x778] sm:$0xff] }
 0x151   :  { %v3441_v32 = vld [vmem:[%s6912_s1 + $0x8f8] sm:$0xff] }
 0x152   :  { %v5653_v17 = vpop.f32.mrb[30].mxu0  ;;  %v5655_v46 = vpop.f32.mrb[30].mxu1 }
 0x153   :  { %v271_v38 = vpop.f32.mrb[31].mxu0  ;;  %1523 = vmatmul.mubr.f32.gmra.mrb[136].mxu0 %v3380_v6  ;;  %1823 = vmatmul.mubr.f32.gmra.mrb[136].mxu1 %v3434_v34  ;;  %v601_v53 = vpop.f32.mrb[31].mxu1 }
 0x154   :  { %1527 = vmatprep.mubr.f32.mxu0 %v3383_v13  ;;  %1827 = vmatprep.mubr.f32.mxu1 %v3437_v50  ;;  %v3386_v50 = vld [vmem:[%s6912_s1 + $0x770] sm:$0xff]  ;;  %v5695_v53 = vpop.permute.xlu0 %333 }
 0x155   :  { %v3440_v38 = vld [vmem:[%s6912_s1 + $0x8f0] sm:$0xff] }
 0x156   :  { %v5669_v61 = vpop.f32.mrb[32].mxu0  ;;  %v5671_v8 = vpop.f32.mrb[32].mxu1 }
 0x157   :  { %v276_v44 = vpop.f32.mrb[33].mxu0  ;;  %1528 = vmatmul.mubr.f32.gmra.mrb[138].mxu0 %v3382_v58  ;;  %1828 = vmatmul.mubr.f32.gmra.mrb[138].mxu1 %v3436_v60  ;;  %v606_v12 = vpop.f32.mrb[33].mxu1  ;;  %v3449_v58 = vld [vmem:[%s6912_s1 + $0x908] sm:$0xff] }
 0x158   :  { %1532 = vmatprep.mubr.f32.mxu0 %v3385_v41  ;;  %1832 = vmatprep.mubr.f32.mxu1 %v3439_v23  ;;  %v5722_v39 = vpop.permute.xlu0 %338 }
 0x15a   :  { %v5685_v25 = vpop.f32.mrb[34].mxu0  ;;  %v5687_v6 = vpop.f32.mrb[34].mxu1 }
 0x15b   :  { %v281_v34 = vpop.f32.mrb[35].mxu0  ;;  %1533 = vmatmul.mubr.f32.gmra.mrb[140].mxu0 %v3384_v14  ;;  %1833 = vmatmul.mubr.f32.gmra.mrb[140].mxu1 %v3438_v15  ;;  %v611_v13 = vpop.f32.mrb[35].mxu1  ;;  %v3448_v15 = vld [vmem:[%s6912_s1 + $0x900] sm:$0xff] }
 0x15c   :  { %1537 = vmatprep.mubr.f32.mxu0 %v3387_v4  ;;  %1837 = vmatprep.mubr.f32.mxu1 %v3441_v32 }
 0x15e   :  { %v284_v60 = vpop.f32.mrb[36].mxu0  ;;  %v614_v41 = vpop.f32.mrb[36].mxu1 }
 0x15f   :  { %v319_v23 = vmax.f32 %v5605_v51, %v284_v60  ;;  %v649_v44 = vmax.f32 %v5607_v52, %v614_v41  ;;  %v286_v12 = vpop.f32.mrb[37].mxu0  ;;  %1538 = vmatmul.mubr.f32.gmra.mrb[142].mxu0 %v3386_v50  ;;  %1838 = vmatmul.mubr.f32.gmra.mrb[142].mxu1 %v3440_v38  ;;  %v616_v14 = vpop.f32.mrb[37].mxu1  ;;  %v3451_v51 = vld [vmem:[%s6912_s1 + $0x918] sm:$0xff] }
 0x160   :  { %2022 = vmatprep.mubr.f32.mxu0 %v3449_v58 }
 0x161   :  { %v325_v4 = vmax.f32 %v313_v30, %v319_v23  ;;  %v655_v32 = vmax.f32 %v643_v31, %v649_v44 }
 0x162   :  { %v289_v52 = vpop.f32.mrb[38].mxu0  ;;  %v619_v34 = vpop.f32.mrb[38].mxu1 }
 0x163   :  { %v320_v13 = vmax.f32 %v5621_v62, %v289_v52  ;;  %v650_v50 = vmax.f32 %v5623_v26, %v619_v34  ;;  %v291_v38 = vpop.f32.mrb[39].mxu0  ;;  %2023 = vmatmul.mubr.f32.vlgmr.msra.gmra.mrb[144].mxu0 %v3448_v15  ;;  %v621_v58 = vpop.f32.mrb[39].mxu1  ;;  %v5717_v37 = vadd.f32 %v5695_v53, %v325_v4  ;;  %v5720_v27 = vadd.f32 %v655_v32, %v5695_v53  ;;  %v3453_v26 = vld [vmem:[%s6912_s1 + $0x928] sm:$0xff]  ;;  %v3455_v4 = vld [vmem:[%s6912_s1 + $0x938] sm:$0xff] }
 0x164   :  { %2027 = vmatprep.mubr.f32.mxu0 %v3451_v51  ;;  %v5733_v62 = vpop.permute.xlu1 %343 }
 0x165   :  { %v326_v30 = vmax.f32 %v314_v43, %v320_v13  ;;  %v656_v31 = vmax.f32 %v644_v45, %v650_v50  ;;  %v373_v60 = vmin.f32 %v5717_v37, 0.0  ;;  %v673_v44 = vmin.f32 %v5720_v27, 0.0  ;;  %v3452_v45 = vld [vmem:[%s6912_s1 + $0x920] sm:$0xff] }
 0x166   :  { %v294_v41 = vpop.f32.mrb[40].mxu0  ;;  %v624_v23 = vpop.f32.mrb[40].mxu1  ;;  %vm367_vm0 = vcmp.gt.f32.partialorder %v5717_v37, 0.0  ;;  %vm667_vm2 = vcmp.gt.f32.partialorder %v5720_v27, 0.0 }
 0x167   :  { %v321_v12 = vmax.f32 %v5637_v24, %v294_v41  ;;  %v651_v48 = vmax.f32 %v5639_v47, %v624_v23  ;;  %v296_v40 = vpop.f32.mrb[41].mxu0  ;;  %2028 = vmatmul.mubr.f32.gmra.mrb[146].mxu0 %v3450_v28  ;;  %v626_v49 = vpop.f32.mrb[41].mxu1  ;;  %v5743_v42 = vadd.f32 %v5722_v39, %v326_v30  ;;  %v379_v43 = vmul.f32 1.442695, %v373_v60  ;;  %v3457_v28 = vld [vmem:[%s6912_s1 + $0x948] sm:$0xff] }
 0x168   :  { %2032 = vmatprep.mubr.f32.mxu0 %v3453_v26  ;;  %v5749_v14 = vadd.f32 %v656_v31, %v5722_v39  ;;  %v679_v15 = vmul.f32 1.442695, %v673_v44  ;;  %v5764_v54 = vpop.permute.xlu1 %348 }
 0x169   :  { %v327_v24 = vmax.f32 %v315_v55, %v321_v12  ;;  %v657_v47 = vmax.f32 %v645_v59, %v651_v48  ;;  %v374_v32 = vmin.f32 %v5743_v42, 0.0  ;;  %4167 = vpow2.f32 %v379_v43  ;;  %v3454_v59 = vld [vmem:[%s6912_s1 + $0x930] sm:$0xff]  ;;  %v3459_v12 = vld [vmem:[%s6912_s1 + $0x958] sm:$0xff] }
 0x16a   :  { %v299_v51 = vpop.f32.mrb[42].mxu0  ;;  %v629_v52 = vpop.f32.mrb[42].mxu1  ;;  %v674_v34 = vmin.f32 %v5749_v14, 0.0  ;;  %4169 = vpow2.f32 %v679_v15  ;;  %vm368_vm1 = vcmp.gt.f32.partialorder %v5743_v42, 0.0  ;;  %vm668_vm3 = vcmp.gt.f32.partialorder %v5749_v14, 0.0 }
 0x16b   :  { %v322_v13 = vmax.f32 %v5653_v17, %v299_v51  ;;  %v652_v56 = vmax.f32 %v5655_v46, %v629_v52  ;;  %v301_v20 = vpop.f32.mrb[43].mxu0  ;;  %2033 = vmatmul.mubr.f32.gmra.mrb[148].mxu0 %v3452_v45  ;;  %v631_v55 = vpop.f32.mrb[43].mxu1  ;;  %v381_v57 = vmul.f32 1.442695, %v374_v32  ;;  %v5770_v38 = vadd.f32 %v5733_v62, %v327_v24  ;;  %v3461_v52 = vld [vmem:[%s6912_s1 + $0x968] sm:$0xff] }
 0x16c   :  { %2037 = vmatprep.mubr.f32.mxu0 %v3455_v4  ;;  %v681_v50 = vmul.f32 1.442695, %v674_v34  ;;  %v5773_v17 = vadd.f32 %v657_v47, %v5733_v62  ;;  %v5815_v24 = vpop.permute.xlu1 %358  ;;  %v3458_v47 = vld [vmem:[%s6912_s1 + $0x950] sm:$0xff] }
 0x16d   :  { %v328_v46 = vmax.f32 %v316_v5, %v322_v13  ;;  %v658_v58 = vmax.f32 %v646_v7, %v652_v56  ;;  %4171 = vpow2.f32 %v381_v57  ;;  %v375_v26 = vmin.f32 %v5770_v38, 0.0  ;;  %v5793_v5 = vpop.permute.xlu0 %353  ;;  %v3456_v7 = vld [vmem:[%s6912_s1 + $0x940] sm:$0xff] }
 0x16e   :  { %v304_v30 = vpop.f32.mrb[44].mxu0  ;;  %v634_v31 = vpop.f32.mrb[44].mxu1  ;;  %4173 = vpow2.f32 %v681_v50  ;;  %v3460_v57 = vld [vmem:[%s6912_s1 + $0x960] sm:$0xff]  ;;  %vm369_vm5 = vcmp.gt.f32.partialorder %v5770_v38, 0.0  ;;  %vm669_vm7 = vcmp.gt.f32.partialorder %v5773_v17, 0.0 }
 0x16f   :  { %v323_v60 = vmax.f32 %v5669_v61, %v304_v30  ;;  %v653_v41 = vmax.f32 %v5671_v8, %v634_v31  ;;  %v306_v63 = vpop.f32.mrb[45].mxu0  ;;  %2038 = vmatmul.mubr.f32.gmra.mrb[150].mxu0 %v3454_v59  ;;  %v636_v2 = vpop.f32.mrb[45].mxu1  ;;  %v5788_v1 = vadd.f32 %v5764_v54, %v328_v46  ;;  %v5791_v3 = vadd.f32 %v658_v58, %v5764_v54  ;;  %v3463_v31 = vld [vmem:[%s6912_s1 + $0x978] sm:$0xff] }
 0x170   :  { %2042 = vmatprep.mubr.f32.mxu0 %v3457_v28  ;;  %v383_v23 = vmul.f32 1.442695, %v375_v26  ;;  %v675_v61 = vmin.f32 %v5773_v17, 0.0 }
 0x171   :  { %v329_v8 = vmax.f32 %v317_v18, %v323_v60  ;;  %v659_v44 = vmax.f32 %v647_v22, %v653_v41  ;;  %v376_v48 = vmin.f32 %v5788_v1, 0.0  ;;  %v676_v43 = vmin.f32 %v5791_v3, 0.0 }
 0x172   :  { %v309_v40 = vpop.f32.mrb[46].mxu0  ;;  %v639_v49 = vpop.f32.mrb[46].mxu1  ;;  %4175 = vpow2.f32 %v383_v23  ;;  %v683_v45 = vmul.f32 1.442695, %v675_v61  ;;  %vm370_vm6 = vcmp.gt.f32.partialorder %v5788_v1, 0.0  ;;  %vm670_vm8 = vcmp.gt.f32.partialorder %v5791_v3, 0.0 }
 0x173   :  { %v324_v15 = vmax.f32 %v5685_v25, %v309_v40  ;;  %v654_v10 = vmax.f32 %v5687_v6, %v639_v49  ;;  %v311_v29 = vpop.f32.mrb[47].mxu0  ;;  %2043 = vmatmul.mubr.f32.gmra.mrb[152].mxu0 %v3456_v7  ;;  %v385_v11 = vmul.f32 1.442695, %v376_v48  ;;  %v641_v16 = vpop.f32.mrb[47].mxu1  ;;  %v5813_v18 = vadd.f32 %v5793_v5, %v329_v8  ;;  %v5880_v40 = vld [vmem:[%s6917_s3 + $0x8] sm:$0xff] }
 0x174   :  { %v4168_v22 = vpop.eup %4167  ;;  %2047 = vmatprep.mubr.f32.mxu0 %v3459_v12  ;;  %4177 = vpow2.f32 %v683_v45  ;;  %v685_v4 = vmul.f32 1.442695, %v676_v43  ;;  %v5821_v25 = vadd.f32 %v659_v44, %v5793_v5  ;;  %3502 = vmatprep.mubr.msk.f32.mxu1 %vm2257_vm4, %v5880_v40 }
 0x175   :  { %v4170_v6 = vpop.eup %4169  ;;  %v330_v32 = vmax.f32 %v318_v35, %v324_v15  ;;  %v660_v51 = vmax.f32 %v648_v36, %v654_v10  ;;  %v3172_v34 = vadd.f32 -1.0, %v4168_v22  ;;  %4179 = vpow2.f32 %v385_v11 }
 0x176   :  { %v5832_v13 = vpop.f32.mrb[48].mxu0  ;;  %v3226_v56 = vadd.f32 -1.0, %v4170_v6  ;;  %4181 = vpow2.f32 %v685_v4  ;;  %v377_v20 = vmin.f32 %v5813_v18, 0.0  ;;  %v5836_v19 = vpop.f32.mrb[48].mxu1  ;;  %v677_v46 = vmin.f32 %v5821_v25, 0.0 }
 0x177   :  { %v4172_v9 = vpop.eup %4171  ;;  %v826_v35 = vpop.f32.mrb[49].mxu0  ;;  %2048 = vmatmul.mubr.f32.gmra.mrb[154].mxu0 %v3458_v47  ;;  %v5841_v21 = vadd.f32 %v5815_v24, %v330_v32  ;;  %v5844_v33 = vadd.f32 %v660_v51, %v5815_v24  ;;  %v397_v58 = vsel %vm367_vm0, %v5717_v37, %v3172_v34  ;;  %v3464_v47 = vld [vmem:[%s6912_s1 + $0x980] sm:$0xff]  ;;  %v3467_v32 = vld [vmem:[%s6912_s1 + $0x998] sm:$0xff]  ;;  %vm371_vm9 = vcmp.gt.f32.partialorder %v5813_v18, 0.0 }
 0x178   :  { %v1126_v36 = vpop.f32.mrb[49].mxu1  ;;  %v4174_v55 = vpop.eup %4173  ;;  %2052 = vmatprep.mubr.f32.mxu0 %v3461_v52  ;;  %v3173_v59 = vadd.f32 -1.0, %v4172_v9  ;;  %v387_v50 = vmul.f32 1.442695, %v377_v20  ;;  %v697_v30 = vsel %vm667_vm2, %v5720_v27, %v3226_v56  ;;  %v687_v2 = vmul.f32 1.442695, %v677_v46 }
 0x179   :  { %v3227_v28 = vadd.f32 -1.0, %v4174_v55  ;;  %v378_v26 = vmin.f32 %v5841_v21, 0.0  ;;  %v678_v63 = vmin.f32 %v5844_v33, 0.0  ;;  %vm372_vm10 = vcmp.gt.f32.partialorder %v5841_v21, 0.0 }
 0x17a   :  { %v5859_v60 = vpop.f32.mrb[50].mxu0  ;;  %v398_v41 = vsel %vm368_vm1, %v5743_v42, %v3173_v59  ;;  %4183 = vpow2.f32 %v387_v50  ;;  %v5865_v37 = vpop.f32.mrb[50].mxu1  ;;  %v3462_v42 = vld [vmem:[%s6912_s1 + $0x970] sm:$0xff]  ;;  %vm671_vm11 = vcmp.gt.f32.partialorder %v5821_v25, 0.0  ;;  %vm672_vm12 = vcmp.gt.f32.partialorder %v5844_v33, 0.0 }
 0x17b   :  { %v831_v7 = vpop.f32.mrb[51].mxu0  ;;  %2053 = vmatmul.mubr.f32.gmra.mrb[156].mxu0 %v3460_v57  ;;  %v5867_v27 = vpack.c.bf16 %v398_v41, %v397_v58  ;;  %v698_v23 = vsel %vm668_vm3, %v5749_v14, %v3227_v28  ;;  %v389_v61 = vmul.f32 1.442695, %v378_v26  ;;  %v1131_v8 = vpop.f32.mrb[51].mxu1  ;;  %4185 = vpow2.f32 %v687_v2  ;;  %v3465_v14 = vld [vmem:[%s6912_s1 + $0x988] sm:$0xff]  ;;  %v3468_v41 = vld [vmem:[%s6912_s1 + $0x9a0] sm:$0xff] }
 0x17c   :  { %v4176_v44 = vpop.eup %4175  ;;  %v5872_v12 = vpack.c.bf16 %v698_v23, %v697_v30  ;;  %2057 = vmatprep.mubr.f32.mxu0 %v3463_v31  ;;  %v689_v48 = vmul.f32 1.442695, %v678_v63  ;;  %v3471_v7 = vld [vmem:[%s6912_s1 + $0x9b8] sm:$0xff] }
 0x17d   :  { %3939 = vmatpush1.bf16.msra.mxu1 %v5867_v27  ;;  %4187 = vpow2.f32 %v389_v61  ;;  %v3174_v45 = vadd.f32 -1.0, %v4176_v44 }
 0x17e   :  { %v4178_v49 = vpop.eup %4177  ;;  %4028 = vmatpush1.bf16.msra.mxu0 %v5872_v12  ;;  %v5889_v43 = vpop.f32.mrb[52].mxu0  ;;  %3940 = vmatprep.subr.bf16.mxu1 %v6921_v0  ;;  %4189 = vpow2.f32 %v689_v48 }
 0x17f   :  { %v5892_v15 = vpop.f32.mrb[52].mxu1  ;;  %v4180_v10 = vpop.eup %4179  ;;  %2058 = vmatmul.mubr.f32.gmra.mrb[158].mxu0 %v3462_v42  ;;  %4029 = vmatprep.subr.bf16.mxu0 %v6921_v0  ;;  %v3228_v11 = vadd.f32 -1.0, %v4178_v49  ;;  %v399_v52 = vsel %vm369_vm5, %v5770_v38, %v3174_v45  ;;  %v3466_v38 = vld [vmem:[%s6912_s1 + $0x990] sm:$0xff] }
 0x180   :  { %v836_v29 = vpop.f32.mrb[53].mxu0  ;;  %v1136_v16 = vpop.f32.mrb[53].mxu1  ;;  %2062 = vmatprep.mubr.f32.mxu0 %v3465_v14  ;;  %v3175_v4 = vadd.f32 -1.0, %v4180_v10 }
 0x181   :  { %v4182_v22 = vpop.eup %4181  ;;  %v699_v35 = vsel %vm669_vm7, %v5773_v17, %v3228_v11 }
 0x182   :  { %v3229_v6 = vadd.f32 -1.0, %v4182_v22  ;;  %v5903_v51 = vpop.f32.mrb[54].mxu0  ;;  %v400_v34 = vsel %vm370_vm6, %v5788_v1, %v3175_v4  ;;  %v5909_v56 = vpop.f32.mrb[54].mxu1  ;;  %v3469_v1 = vld [vmem:[%s6912_s1 + $0x9a8] sm:$0xff]  ;;  %v3475_v4 = vld [vmem:[%s6912_s1 + $0x9d8] sm:$0xff] }
 0x183   :  { %v841_v20 = vpop.f32.mrb[55].mxu0  ;;  %2063 = vmatmul.mubr.f32.gmra.mrb[160].mxu0 %v3464_v47  ;;  %v5911_v9 = vpack.c.bf16 %v400_v34, %v399_v52  ;;  %v1141_v55 = vpop.f32.mrb[55].mxu1  ;;  %v3472_v47 = vld [vmem:[%s6912_s1 + $0x9c0] sm:$0xff] }
 0x184   :  { %v700_v36 = vsel %vm670_vm8, %v5791_v3, %v3229_v6  ;;  %v4184_v57 = vpop.eup %4183  ;;  %2067 = vmatprep.mubr.f32.mxu0 %v3467_v32  ;;  %v3477_v55 = vld [vmem:[%s6912_s1 + $0x9e8] sm:$0xff] }
 0x185   :  { %v5915_v59 = vpack.c.bf16 %v700_v36, %v699_v35  ;;  %3942 = vmatpush1.bf16.msra.mxu1 %v5911_v9  ;;  %v4186_v50 = vpop.eup %4185  ;;  %v3176_v3 = vadd.f32 -1.0, %v4184_v57  ;;  %v3474_v36 = vld [vmem:[%s6912_s1 + $0x9d0] sm:$0xff] }
 0x186   :  { %v5925_v17 = vpop.f32.mrb[56].mxu0  ;;  %3943 = vmatprep.subr.bf16.mxu1 %v6921_v0  ;;  %v5928_v46 = vpop.f32.mrb[56].mxu1  ;;  %v3230_v30 = vadd.f32 -1.0, %v4186_v50 }
 0x187   :  { %4031 = vmatpush1.bf16.msra.mxu0 %v5915_v59  ;;  %v4188_v58 = vpop.eup %4187  ;;  %v846_v28 = vpop.f32.mrb[57].mxu0  ;;  %v401_v61 = vsel %vm371_vm9, %v5813_v18, %v3176_v3  ;;  %v3470_v18 = vld [vmem:[%s6912_s1 + $0x9b0] sm:$0xff] }
 0x188   :  { %2068 = vmatmul.mubr.f32.gmra.mrb[162].mxu0 %v3466_v38  ;;  %4032 = vmatprep.subr.bf16.mxu0 %v6921_v0  ;;  %v1146_v31 = vpop.f32.mrb[57].mxu1  ;;  %v4190_v26 = vpop.eup %4189  ;;  %v3177_v63 = vadd.f32 -1.0, %v4188_v58  ;;  %v701_v14 = vsel %vm671_vm11, %v5821_v25, %v3230_v30  ;;  %v3476_v28 = vld [vmem:[%s6912_s1 + $0x9e0] sm:$0xff]  ;;  %v3479_v30 = vld [vmem:[%s6912_s1 + $0x9f8] sm:$0xff] }
 0x189   :  { %2072 = vmatprep.mubr.f32.mxu0 %v3469_v1  ;;  %v3231_v2 = vadd.f32 -1.0, %v4190_v26 }
 0x18a   :  { %v5939_v23 = vpop.f32.mrb[58].mxu0  ;;  %v402_v8 = vsel %vm372_vm10, %v5841_v21, %v3177_v63  ;;  %v5945_v44 = vpop.f32.mrb[58].mxu1  ;;  %v3473_v21 = vld [vmem:[%s6912_s1 + $0x9c8] sm:$0xff] }
 0x18b   :  { %v851_v42 = vpop.f32.mrb[59].mxu0  ;;  %v5947_v48 = vpack.c.bf16 %v402_v8, %v401_v61  ;;  %v702_v49 = vsel %vm672_vm12, %v5844_v33, %v3231_v2  ;;  %v1151_v45 = vpop.f32.mrb[59].mxu1  ;;  %v3478_v61 = vld [vmem:[%s6912_s1 + $0x9f0] sm:$0xff]  ;;  %v3481_v8 = vld [vmem:[%s6912_s1 + $0xa08] sm:$0xff] }
 0x18c   :  { %2073 = vmatmul.mubr.f32.gmra.mrb[164].mxu0 %v3468_v41  ;;  %v5951_v10 = vpack.c.bf16 %v702_v49, %v701_v14 }
 0x18d   :  { %2077 = vmatprep.mubr.f32.mxu0 %v3471_v7  ;;  %3945 = vmatpush1.bf16.msra.mxu1 %v5947_v48 }
 0x18e   :  { %4034 = vmatpush1.bf16.msra.mxu0 %v5951_v10  ;;  %v5961_v29 = vpop.f32.mrb[60].mxu0  ;;  %3946 = vmatprep.subr.bf16.mxu1 %v6921_v0  ;;  %v5964_v25 = vpop.f32.mrb[60].mxu1 }
 0x18f   :  { %v943_v33 = vmax.f32 %v5832_v13, %v5961_v29  ;;  %v856_v11 = vpop.f32.mrb[61].mxu0  ;;  %v1243_v16 = vmax.f32 %v5836_v19, %v5964_v25  ;;  %v1156_v22 = vpop.f32.mrb[61].mxu1  ;;  %4035 = vmatprep.subr.bf16.mxu0 %v6921_v0 }
 0x190   :  { %2078 = vmatmul.mubr.f32.gmra.mrb[166].mxu0 %v3470_v18  ;;  %v3480_v11 = vld [vmem:[%s6912_s1 + $0xa00] sm:$0xff]  ;;  %v3483_v22 = vld [vmem:[%s6912_s1 + $0xa18] sm:$0xff] }
 0x191   :  { %2082 = vmatprep.mubr.f32.mxu0 %v3473_v21  ;;  %3948 = vmatpush1.bf16.msra.mxu1 %v5872_v12 }
 0x192   :  { %v5978_v6 = vpop.f32.mrb[62].mxu0  ;;  %3949 = vmatprep.subr.bf16.mxu1 %v6921_v0  ;;  %v5981_v32 = vpop.f32.mrb[62].mxu1 }
 0x193   :  { %v944_v52 = vmax.f32 %v5859_v60, %v5978_v6  ;;  %v861_v34 = vpop.f32.mrb[63].mxu0  ;;  %v1161_v35 = vpop.f32.mrb[63].mxu1  ;;  %v6949_v29 = vmax.f32 %v5865_v37, %v5981_v32 }
 0x194   :  { %2083 = vmatmul.mubr.f32.gmra.mrb[168].mxu0 %v3472_v47 }
 0x195   :  { %2087 = vmatprep.mubr.f32.mxu0 %v3475_v4  ;;  %3951 = vmatpush1.bf16.msra.mxu1 %v5915_v59 }
 0x196   :  { %v5994_v57 = vpop.f32.mrb[64].mxu0  ;;  %3952 = vmatprep.subr.bf16.mxu1 %v6921_v0  ;;  %v5997_v38 = vpop.f32.mrb[64].mxu1 }
 0x197   :  { %v866_v50 = vpop.f32.mrb[65].mxu0  ;;  %v1166_v58 = vpop.f32.mrb[65].mxu1  ;;  %v6950_v37 = vmax.f32 %v5889_v43, %v5994_v57  ;;  %v6951_v32 = vmax.f32 %v5892_v15, %v5997_v38 }
 0x198   :  { %2088 = vmatmul.mubr.f32.gmra.mrb[170].mxu0 %v3474_v36  ;;  %v3482_v50 = vld [vmem:[%s6912_s1 + $0xa10] sm:$0xff]  ;;  %v3485_v58 = vld [vmem:[%s6912_s1 + $0xa28] sm:$0xff] }
 0x199   :  { %2092 = vmatprep.mubr.f32.mxu0 %v3477_v55  ;;  %3954 = vmatpush1.bf16.msra.mxu1 %v5951_v10 }
 0x19a   :  { %v6010_v31 = vpop.f32.mrb[66].mxu0  ;;  %v6012_v26 = vpop.f32.mrb[66].mxu1  ;;  %3955 = vmatprep.subr.bf16.mxu1 %v6921_v0 }
 0x19b   :  { %v871_v63 = vpop.f32.mrb[67].mxu0  ;;  %v1171_v7 = vpop.f32.mrb[67].mxu1 }
 0x19c   :  { %2093 = vmatmul.mubr.f32.gmra.mrb[172].mxu0 %v3476_v28 }
 0x19d   :  { %2097 = vmatprep.mubr.f32.mxu0 %v3479_v30 }
 0x19e   :  { %v6025_v42 = vpop.f32.mrb[68].mxu0  ;;  %v6027_v14 = vpop.f32.mrb[68].mxu1 }
 0x19f   :  { %v876_v45 = vpop.f32.mrb[69].mxu0  ;;  %v1176_v21 = vpop.f32.mrb[69].mxu1 }
 0x1a0   :  { %2098 = vmatmul.mubr.f32.gmra.mrb[174].mxu0 %v3478_v61  ;;  %v3484_v61 = vld [vmem:[%s6912_s1 + $0xa20] sm:$0xff] }
 0x1a1   :  { %2102 = vmatprep.mubr.f32.mxu0 %v3481_v8  ;;  %v3487_v8 = vld [vmem:[%s6912_s1 + $0xa38] sm:$0xff] }
 0x1a2   :  { %v6039_v47 = vpop.f32.mrb[70].mxu0  ;;  %v6041_v4 = vpop.f32.mrb[70].mxu1 }
 0x1a3   :  { %v881_v35 = vpop.f32.mrb[71].mxu0  ;;  %v1181_v55 = vpop.f32.mrb[71].mxu1 }
 0x1a4   :  { %2103 = vmatmul.mubr.f32.gmra.mrb[176].mxu0 %v3480_v11  ;;  %v3486_v35 = vld [vmem:[%s6912_s1 + $0xa30] sm:$0xff]  ;;  %v3489_v55 = vld [vmem:[%s6912_s1 + $0xa48] sm:$0xff] }
 0x1a5   :  { %2107 = vmatprep.mubr.f32.mxu0 %v3483_v22 }
 0x1a6   :  { %v884_v28 = vpop.f32.mrb[72].mxu0  ;;  %v1184_v30 = vpop.f32.mrb[72].mxu1 }
 0x1a7   :  { %v886_v63 = vpop.f32.mrb[73].mxu0  ;;  %v1186_v7 = vpop.f32.mrb[73].mxu1 }
 0x1a8   :  { %2108 = vmatmul.mubr.f32.gmra.mrb[178].mxu0 %v3482_v50 }
 0x1a9   :  { %2112 = vmatprep.mubr.f32.mxu0 %v3485_v58 }
 0x1aa   :  { %v889_v45 = vpop.f32.mrb[74].mxu0  ;;  %v1189_v21 = vpop.f32.mrb[74].mxu1 }
 0x1ab   :  { %v891_v11 = vpop.f32.mrb[75].mxu0  ;;  %v1191_v22 = vpop.f32.mrb[75].mxu1 }
 0x1ac   :  { %2113 = vmatmul.mubr.f32.gmra.mrb[180].mxu0 %v3484_v61  ;;  %v3488_v61 = vld [vmem:[%s6912_s1 + $0xa40] sm:$0xff] }
 0x1ad   :  { %2117 = vmatprep.mubr.f32.mxu0 %v3487_v8  ;;  %v3491_v8 = vld [vmem:[%s6912_s1 + $0xa58] sm:$0xff] }
 0x1ae   :  { %v6065_v50 = vpop.f32.mrb[76].mxu0  ;;  %v6067_v58 = vpop.f32.mrb[76].mxu1 }
 0x1af   :  { %v896_v63 = vpop.f32.mrb[77].mxu0  ;;  %v1196_v7 = vpop.f32.mrb[77].mxu1 }
 0x1b0   :  { %2118 = vmatmul.mubr.f32.gmra.mrb[182].mxu0 %v3486_v35  ;;  %v3490_v35 = vld [vmem:[%s6912_s1 + $0xa50] sm:$0xff] }
 0x1b1   :  { %2122 = vmatprep.mubr.f32.mxu0 %v3489_v55  ;;  %v3493_v55 = vld [vmem:[%s6912_s1 + $0xa68] sm:$0xff] }
 0x1b2   :  { %v6075_v11 = vpop.f32.mrb[78].mxu0  ;;  %v6077_v22 = vpop.f32.mrb[78].mxu1 }
 0x1b3   :  { %v901_v0 = vpop.f32.mrb[79].mxu0  ;;  %v1201_v36 = vpop.f32.mrb[79].mxu1 }
 0x1b4   :  { %2123 = vmatmul.mubr.f32.gmra.mrb[184].mxu0 %v3488_v61  ;;  %v3492_v0 = vld [vmem:[%s6912_s1 + $0xa60] sm:$0xff]  ;;  %v3495_v36 = vld [vmem:[%s6912_s1 + $0xa78] sm:$0xff] }
 0x1b5   :  { %2127 = vmatprep.mubr.f32.mxu0 %v3491_v8 }
 0x1b6   :  { %v6085_v63 = vpop.f32.mrb[80].mxu0  ;;  %v6087_v7 = vpop.f32.mrb[80].mxu1 }
 0x1b7   :  { %v906_v34 = vpop.f32.mrb[81].mxu0  ;;  %v1206_v18 = vpop.f32.mrb[81].mxu1 }
 0x1b8   :  { %2128 = vmatmul.mubr.f32.gmra.mrb[186].mxu0 %v3490_v35  ;;  %v3494_v18 = vld [vmem:[%s6912_s1 + $0xa70] sm:$0xff] }
 0x1b9   :  { %2132 = vmatprep.mubr.f32.mxu0 %v3493_v55 }
 0x1ba   :  { %v6095_v61 = vpop.f32.mrb[82].mxu0  ;;  %v6097_v8 = vpop.f32.mrb[82].mxu1 }
 0x1bb   :  { %v911_v49 = vpop.f32.mrb[83].mxu0  ;;  %v1211_v2 = vpop.f32.mrb[83].mxu1 }
 0x1bc   :  { %2133 = vmatmul.mubr.f32.gmra.mrb[188].mxu0 %v3492_v0 }
 0x1bd   :  { %2137 = vmatprep.mubr.f32.mxu0 %v3495_v36 }
 0x1be   :  { %v914_v34 = vpop.f32.mrb[84].mxu0  ;;  %v1214_v35 = vpop.f32.mrb[84].mxu1 }
 0x1bf   :  { %v949_v55 = vmax.f32 %v884_v28, %v914_v34  ;;  %v1249_v41 = vmax.f32 %v1184_v30, %v1214_v35  ;;  %v916_v3 = vpop.f32.mrb[85].mxu0  ;;  %v1216_v1 = vpop.f32.mrb[85].mxu1 }
 0x1c0   :  { %2138 = vmatmul.mubr.f32.gmra.mrb[190].mxu0 %v3494_v18 }
 0x1c1   :  { %3524 = vmatprep.mubr.msk.f32.mxu0 %vm2257_vm4, %v5880_v40  ;;  %v955_v49 = vmax.f32 %v943_v33, %v949_v55  ;;  %v1255_v2 = vmax.f32 %v1243_v16, %v1249_v41 }
 0x1c2   :  { %v919_v0 = vpop.f32.mrb[86].mxu0  ;;  %v1219_v36 = vpop.f32.mrb[86].mxu1 }
 0x1c3   :  { %v6111_v20 = vadd.f32 %v955_v49, %v5695_v53  ;;  %v6114_v3 = vadd.f32 %v1255_v2, %v5695_v53  ;;  %v950_v1 = vmax.f32 %v889_v45, %v919_v0  ;;  %v1250_v28 = vmax.f32 %v1189_v21, %v1219_v36  ;;  %v921_v30 = vpop.f32.mrb[87].mxu0  ;;  %v1221_v18 = vpop.f32.mrb[87].mxu1 }
 0x1c5   :  { %v973_v34 = vmin.f32 %v6111_v20, 0.0  ;;  %v1273_v13 = vmin.f32 %v6114_v3, 0.0  ;;  %v956_v19 = vmax.f32 %v944_v52, %v950_v1  ;;  %v1256_v25 = vmax.f32 %v6949_v29, %v1250_v28 }
 0x1c6   :  { %v924_v33 = vpop.f32.mrb[88].mxu0  ;;  %v1224_v16 = vpop.f32.mrb[88].mxu1  ;;  %vm967_vm13 = vcmp.gt.f32.partialorder %v6111_v20, 0.0  ;;  %vm1267_vm14 = vcmp.gt.f32.partialorder %v6114_v3, 0.0 }
 0x1c7   :  { %v979_v41 = vmul.f32 1.442695, %v973_v34  ;;  %v1279_v35 = vmul.f32 1.442695, %v1273_v13  ;;  %v951_v45 = vmax.f32 %v6065_v50, %v924_v33  ;;  %v1251_v21 = vmax.f32 %v6067_v58, %v1224_v16  ;;  %v926_v55 = vpop.f32.mrb[89].mxu0  ;;  %v1226_v49 = vpop.f32.mrb[89].mxu1 }
 0x1c8   :  { %v6127_v2 = vadd.f32 %v956_v19, %v5722_v39  ;;  %v6130_v60 = vadd.f32 %v1256_v25, %v5722_v39  ;;  %v6952_v19 = vmax.f32 %v5903_v51, %v6010_v31  ;;  %v6953_v25 = vmax.f32 %v5909_v56, %v6012_v26 }
 0x1c9   :  { %4191 = vpow2.f32 %v979_v41  ;;  %v957_v6 = vmax.f32 %v6950_v37, %v951_v45  ;;  %v1257_v52 = vmax.f32 %v6951_v32, %v1251_v21  ;;  %v6954_v56 = vmax.f32 %v5925_v17, %v6025_v42 }
 0x1ca   :  { %4193 = vpow2.f32 %v1279_v35  ;;  %v974_v50 = vmin.f32 %v6127_v2, 0.0  ;;  %v929_v58 = vpop.f32.mrb[90].mxu0  ;;  %v1229_v0 = vpop.f32.mrb[90].mxu1  ;;  %v1274_v36 = vmin.f32 %v6130_v60, 0.0  ;;  %v6955_v26 = vmax.f32 %v5928_v46, %v6027_v14 }
 0x1cb   :  { %v6141_v1 = vadd.f32 %v957_v6, %v5733_v62  ;;  %v6144_v28 = vadd.f32 %v1257_v52, %v5733_v62  ;;  %v952_v43 = vmax.f32 %v6075_v11, %v929_v58  ;;  %v931_v57 = vpop.f32.mrb[91].mxu0  ;;  %v1231_v30 = vpop.f32.mrb[91].mxu1  ;;  %v1252_v15 = vmax.f32 %v6077_v22, %v1229_v0 }
 0x1cc   :  { %v981_v18 = vmul.f32 1.442695, %v974_v50  ;;  %v1281_v38 = vmul.f32 1.442695, %v1274_v36  ;;  %vm968_vm15 = vcmp.gt.f32.partialorder %v6127_v2, 0.0  ;;  %vm1268_vm0 = vcmp.gt.f32.partialorder %v6130_v60, 0.0 }
 0x1cd   :  { %v975_v34 = vmin.f32 %v6141_v1, 0.0  ;;  %v1275_v13 = vmin.f32 %v6144_v28, 0.0  ;;  %v958_v29 = vmax.f32 %v6952_v19, %v952_v43  ;;  %v1258_v33 = vmax.f32 %v6953_v25, %v1252_v15 }
 0x1ce   :  { %4195 = vpow2.f32 %v981_v18  ;;  %v934_v11 = vpop.f32.mrb[92].mxu0  ;;  %v1234_v16 = vpop.f32.mrb[92].mxu1  ;;  %vm969_vm1 = vcmp.gt.f32.partialorder %v6141_v1, 0.0  ;;  %vm1269_vm3 = vcmp.gt.f32.partialorder %v6144_v28, 0.0 }
 0x1cf   :  { %4197 = vpow2.f32 %v1281_v38  ;;  %v983_v41 = vmul.f32 1.442695, %v975_v34  ;;  %v953_v22 = vmax.f32 %v6085_v63, %v934_v11  ;;  %v1253_v35 = vmax.f32 %v6087_v7, %v1234_v16  ;;  %v936_v45 = vpop.f32.mrb[93].mxu0  ;;  %v1236_v21 = vpop.f32.mrb[93].mxu1 }
 0x1d0   :  { %v1283_v55 = vmul.f32 1.442695, %v1275_v13  ;;  %v6159_v49 = vadd.f32 %v958_v29, %v5764_v54  ;;  %v6162_v51 = vadd.f32 %v1258_v33, %v5764_v54  ;;  %v6957_v33 = vmax.f32 %v5945_v44, %v6041_v4 }
 0x1d1   :  { %4199 = vpow2.f32 %v983_v41  ;;  %v959_v31 = vmax.f32 %v6954_v56, %v953_v22  ;;  %v1259_v63 = vmax.f32 %v6955_v26, %v1253_v35 }
 0x1d2   :  { %4201 = vpow2.f32 %v1283_v55  ;;  %v976_v7 = vmin.f32 %v6159_v49, 0.0  ;;  %v939_v37 = vpop.f32.mrb[94].mxu0  ;;  %v1239_v6 = vpop.f32.mrb[94].mxu1  ;;  %v1276_v52 = vmin.f32 %v6162_v51, 0.0  ;;  %vm970_vm2 = vcmp.gt.f32.partialorder %v6159_v49, 0.0 }
 0x1d3   :  { %v4192_v32 = vpop.eup %4191  ;;  %v6173_v50 = vadd.f32 %v959_v31, %v5793_v5  ;;  %v6176_v58 = vadd.f32 %v1259_v63, %v5793_v5  ;;  %v954_v17 = vmax.f32 %v6095_v61, %v939_v37  ;;  %v941_v42 = vpop.f32.mrb[95].mxu0  ;;  %v1254_v36 = vmax.f32 %v6097_v8, %v1239_v6 }
 0x1d4   :  { %v1241_v0 = vpop.f32.mrb[95].mxu1  ;;  %v4194_v46 = vpop.eup %4193  ;;  %v985_v14 = vmul.f32 1.442695, %v976_v7  ;;  %v1285_v43 = vmul.f32 1.442695, %v1276_v52  ;;  %v3280_v38 = vadd.f32 -1.0, %v4192_v32  ;;  %v6956_v61 = vmax.f32 %v5939_v23, %v6039_v47 }
 0x1d5   :  { %v977_v57 = vmin.f32 %v6173_v50, 0.0  ;;  %v1277_v30 = vmin.f32 %v6176_v58, 0.0  ;;  %v3334_v25 = vadd.f32 -1.0, %v4194_v46  ;;  %v1260_v11 = vmax.f32 %v6957_v33, %v1254_v36 }
 0x1d6   :  { %4203 = vpow2.f32 %v985_v14  ;;  %v6182_v18 = vpop.f32.mrb[96].mxu0  ;;  %v6184_v15 = vpop.f32.mrb[96].mxu1  ;;  %v960_v13 = vmax.f32 %v6956_v61, %v954_v17  ;;  %v997_v21 = vsel %vm967_vm13, %v6111_v20, %v3280_v38  ;;  %v6959_v46 = vmov 0.0|0.0  }
 0x1d7   :  { %4205 = vpow2.f32 %v1285_v43  ;;  %v987_v34 = vmul.f32 1.442695, %v977_v57  ;;  %v1426_v19 = vpop.f32.mrb[97].mxu0  ;;  %v1726_v29 = vpop.f32.mrb[97].mxu1  ;;  %v1287_v22 = vmul.f32 1.442695, %v1277_v30  ;;  %v6200_v47 = vadd.f32 %v1260_v11, %v5815_v24 }
 0x1d8   :  { %v4196_v8 = vpop.eup %4195  ;;  %v6195_v35 = vadd.f32 %v960_v13, %v5815_v24  ;;  %v1297_v7 = vsel %vm1267_vm14, %v6114_v3, %v3334_v25  ;;  %vm1270_vm5 = vcmp.gt.f32.partialorder %v6162_v51, 0.0  ;;  %vm971_vm6 = vcmp.gt.f32.partialorder %v6173_v50, 0.0 }
 0x1d9   :  { %v4198_v16 = vpop.eup %4197  ;;  %v3281_v41 = vadd.f32 -1.0, %v4196_v8  ;;  %4207 = vpow2.f32 %v987_v34  ;;  %vm1271_vm8 = vcmp.gt.f32.partialorder %v6176_v58, 0.0  ;;  %vm1272_vm9 = vcmp.gt.f32.partialorder %v6200_v47, 0.0 }
 0x1da   :  { %v3335_v23 = vadd.f32 -1.0, %v4198_v16  ;;  %v6202_v45 = vpop.f32.mrb[98].mxu0  ;;  %v6204_v44 = vpop.f32.mrb[98].mxu1  ;;  %v978_v56 = vmin.f32 %v6195_v35, 0.0  ;;  %4209 = vpow2.f32 %v1287_v22  ;;  %vm972_vm7 = vcmp.gt.f32.partialorder %v6195_v35, 0.0 }
 0x1db   :  { %v4200_v4 = vpop.eup %4199  ;;  %v998_v55 = vsel %vm968_vm15, %v6127_v2, %v3281_v41  ;;  %v1431_v31 = vpop.f32.mrb[99].mxu0  ;;  %v1278_v2 = vmin.f32 %v6200_v47, 0.0 }
 0x1dc   :  { %v1731_v26 = vpop.f32.mrb[99].mxu1  ;;  %v4202_v63 = vpop.eup %4201  ;;  %v6212_v37 = vpack.c.bf16 %v998_v55, %v997_v21  ;;  %v1298_v6 = vsel %vm1268_vm0, %v6130_v60, %v3335_v23  ;;  %v989_v20 = vmul.f32 1.442695, %v978_v56  ;;  %v3282_v42 = vadd.f32 -1.0, %v4200_v4 }
 0x1dd   :  { %v6215_v32 = vpack.c.bf16 %v1298_v6, %v1297_v7  ;;  %v1289_v3 = vmul.f32 1.442695, %v1278_v2  ;;  %v3336_v36 = vadd.f32 -1.0, %v4202_v63 }
 0x1de   :  { %6958 = vst [vmem:[#allocation3_spill] sm:$0xff] %v6212_v37  ;;  %3957 = vmatpush1.bf16.msra.mxu1 %v6212_v37  ;;  %4037 = vmatpush1.bf16.msra.mxu0 %v6212_v37  ;;  %v6220_v52 = vpop.f32.mrb[100].mxu0  ;;  %v6222_v17 = vpop.f32.mrb[100].mxu1  ;;  %4211 = vpow2.f32 %v989_v20  ;;  %v999_v61 = vsel %vm969_vm1, %v6141_v1, %v3282_v42 }
 0x1df   :  { %v1436_v0 = vpop.f32.mrb[101].mxu0  ;;  %3958 = vmatprep.subr.bf16.mxu1 %v6959_v46  ;;  %4038 = vmatprep.subr.bf16.mxu0 %v6959_v46  ;;  %v1736_v60 = vpop.f32.mrb[101].mxu1  ;;  %4213 = vpow2.f32 %v1289_v3  ;;  %v1299_v8 = vsel %vm1269_vm3, %v6144_v28, %v3336_v36  ;;  %v6444_v36 = vld [vmem:[%s6917_s3 + $0x78] sm:$0xff] }
 0x1e0   :  { %v4204_v14 = vpop.eup %4203  ;;  %6970 = vst [vmem:[#allocation14_spill] sm:$0xff] %v6444_v36 }
 0x1e1   :  { %v4206_v43 = vpop.eup %4205  ;;  %v3283_v57 = vadd.f32 -1.0, %v4204_v14 }
 0x1e2   :  { %v3337_v30 = vadd.f32 -1.0, %v4206_v43  ;;  %v6228_v38 = vpop.f32.mrb[102].mxu0  ;;  %v6230_v34 = vpop.f32.mrb[102].mxu1 }
 0x1e3   :  { %v1000_v13 = vsel %vm970_vm2, %v6159_v49, %v3283_v57  ;;  %v1441_v19 = vpop.f32.mrb[103].mxu0  ;;  %v1741_v29 = vpop.f32.mrb[103].mxu1  ;;  %v6438_v57 = vld [vmem:[%s6917_s3 + $0x60] sm:$0xff] }
 0x1e4   :  { %v6237_v25 = vpack.c.bf16 %v1000_v13, %v999_v61  ;;  %v1300_v33 = vsel %vm1270_vm5, %v6162_v51, %v3337_v30  ;;  %v4208_v11 = vpop.eup %4207  ;;  %6969 = vst [vmem:[#allocation13_spill] sm:$0xff] %v6438_v57 }
 0x1e5   :  { %v6240_v16 = vpack.c.bf16 %v1300_v33, %v1299_v8  ;;  %v4210_v41 = vpop.eup %4209  ;;  %v3284_v23 = vadd.f32 -1.0, %v4208_v11  ;;  %v6419_v11 = vld [vmem:[%s6917_s3 + $0x50] sm:$0xff]  ;;  %v6425_v8 = vld [vmem:[%s6917_s3 + $0x68] sm:$0xff] }
 0x1e6   :  { %6960 = vst [vmem:[#allocation4_spill] sm:$0xff] %v6237_v25  ;;  %3960 = vmatpush1.bf16.msra.mxu1 %v6237_v25  ;;  %4040 = vmatpush1.bf16.msra.mxu0 %v6237_v25  ;;  %v6244_v1 = vpop.f32.mrb[104].mxu0  ;;  %v6246_v49 = vpop.f32.mrb[104].mxu1  ;;  %v3338_v4 = vadd.f32 -1.0, %v4210_v41  ;;  %6967 = vst [vmem:[#allocation11_spill] sm:$0xff] %v6419_v11 }
 0x1e7   :  { %v1446_v22 = vpop.f32.mrb[105].mxu0  ;;  %3961 = vmatprep.subr.bf16.mxu1 %v6959_v46  ;;  %4041 = vmatprep.subr.bf16.mxu0 %v6959_v46  ;;  %v1746_v28 = vpop.f32.mrb[105].mxu1  ;;  %v1001_v7 = vsel %vm971_vm6, %v6173_v50, %v3284_v23  ;;  %6968 = vst [vmem:[#allocation12_spill] sm:$0xff] %v6425_v8 }
 0x1e8   :  { %v4212_v51 = vpop.eup %4211  ;;  %v1301_v42 = vsel %vm1271_vm8, %v6176_v58, %v3338_v4  ;;  %v6313_v4 = vld [vmem:[%s6917_s3] sm:$0xff] }
 0x1e9   :  { %v3285_v21 = vadd.f32 -1.0, %v4212_v51  ;;  %v4214_v31 = vpop.eup %4213 }
 0x1ea   :  { %v6250_v55 = vpop.f32.mrb[106].mxu0  ;;  %v6252_v56 = vpop.f32.mrb[106].mxu1  ;;  %v3339_v20 = vadd.f32 -1.0, %v4214_v31 }
 0x1eb   :  { %v1451_v26 = vpop.f32.mrb[107].mxu0  ;;  %v1751_v63 = vpop.f32.mrb[107].mxu1  ;;  %v1002_v6 = vsel %vm972_vm7, %v6195_v35, %v3285_v21  ;;  %v6406_v21 = vld [vmem:[%s6917_s3 + $0x58] sm:$0xff] }
 0x1ec   :  { %v6259_v2 = vpack.c.bf16 %v1002_v6, %v1001_v7  ;;  %v1302_v3 = vsel %vm1272_vm9, %v6200_v47, %v3339_v20  ;;  %v6321_v26 = vld [vmem:[%s6917_s3 + $0x18] sm:$0xff]  ;;  %v6400_v6 = vld [vmem:[%s6917_s3 + $0x40] sm:$0xff]  ;;  %6966 = vst [vmem:[#allocation10_spill] sm:$0xff] %v6406_v21 }
 0x1ed   :  { %v6268_v14 = vpack.c.bf16 %v1302_v3, %v1301_v42  ;;  %6965 = vst [vmem:[#allocation9_spill] sm:$0xff] %v6400_v6 }
 0x1ee   :  { %6961 = vst [vmem:[#allocation5_spill] sm:$0xff] %v6259_v2  ;;  %v6264_v0 = vpop.f32.mrb[108].mxu0  ;;  %v6266_v60 = vpop.f32.mrb[108].mxu1  ;;  %3963 = vmatpush1.bf16.msra.mxu1 %v6259_v2  ;;  %4043 = vmatpush1.bf16.msra.mxu0 %v6259_v2 }
 0x1ef   :  { %v1456_v35 = vpop.f32.mrb[109].mxu0  ;;  %v1756_v58 = vpop.f32.mrb[109].mxu1  ;;  %3964 = vmatprep.subr.bf16.mxu1 %v6959_v46  ;;  %4044 = vmatprep.subr.bf16.mxu0 %v6959_v46 }
 0x1f0   :  { %v6339_v35 = vld [vmem:[%s6917_s3 + $0x10] sm:$0xff] }
 0x1f2   :  { %v6278_v47 = vpop.f32.mrb[110].mxu0  ;;  %v6280_v43 = vpop.f32.mrb[110].mxu1  ;;  %3966 = vmatpush1.bf16.msra.mxu1 %v6215_v32  ;;  %4046 = vmatpush1.bf16.msra.mxu0 %v6215_v32 }
 0x1f3   :  { %v1461_v30 = vpop.f32.mrb[111].mxu0  ;;  %v1761_v13 = vpop.f32.mrb[111].mxu1  ;;  %3967 = vmatprep.subr.bf16.mxu1 %v6959_v46  ;;  %4047 = vmatprep.subr.bf16.mxu0 %v6959_v46 }
 0x1f4   :  { %v6387_v13 = vld [vmem:[%s6917_s3 + $0x48] sm:$0xff] }
 0x1f5   :  { %6964 = vst [vmem:[#allocation8_spill] sm:$0xff] %v6387_v13 }
 0x1f6   :  { %v6290_v19 = vpop.f32.mrb[112].mxu0  ;;  %v6292_v29 = vpop.f32.mrb[112].mxu1  ;;  %3969 = vmatpush1.bf16.msra.mxu1 %v6240_v16  ;;  %4049 = vmatpush1.bf16.msra.mxu0 %v6240_v16 }
 0x1f7   :  { %v1466_v33 = vpop.f32.mrb[113].mxu0  ;;  %v1766_v41 = vpop.f32.mrb[113].mxu1  ;;  %3970 = vmatprep.subr.bf16.mxu1 %v6959_v46  ;;  %4050 = vmatprep.subr.bf16.mxu0 %v6959_v46 }
 0x1f8   :  { %v6381_v41 = vld [vmem:[%s6917_s3 + $0x30] sm:$0xff] }
 0x1f9   :  { %6963 = vst [vmem:[#allocation7_spill] sm:$0xff] %v6381_v41 }
 0x1fa   :  { %v6302_v22 = vpop.f32.mrb[114].mxu0  ;;  %v6304_v28 = vpop.f32.mrb[114].mxu1  ;;  %3972 = vmatpush1.bf16.msra.mxu1 %v6268_v14  ;;  %4052 = vmatpush1.bf16.msra.mxu0 %v6268_v14 }
 0x1fb   :  { %v1471_v51 = vpop.f32.mrb[115].mxu0  ;;  %v1771_v31 = vpop.f32.mrb[115].mxu1  ;;  %3973 = vmatprep.subr.bf16.mxu1 %v6959_v46  ;;  %4053 = vmatprep.subr.bf16.mxu0 %v6959_v46 }
 0x1fc   :  { %v6362_v31 = vld [vmem:[%s6917_s3 + $0x20] sm:$0xff] }
 0x1fd   :  { %2347 = vmatmul.mubr.f32.vlgmr.msra.gmra.mrb[144].mxu1 %v6313_v4 }
 0x1fe   :  { %v6325_v63 = vpop.f32.mrb[116].mxu0  ;;  %v6327_v7 = vpop.f32.mrb[116].mxu1  ;;  %3975 = vmatpush1.bf16.msra.mxu1 %v5867_v27  ;;  %3503 = vmatprep.mubr.msk.f32.mxu1 %vm2257_vm4, %v6321_v26  ;;  %v6345_v27 = vld [vmem:[%s6917_s3 + $0x28] sm:$0xff] }
 0x1ff   :  { %v1476_v20 = vpop.f32.mrb[117].mxu0  ;;  %v1776_v3 = vpop.f32.mrb[117].mxu1  ;;  %3976 = vmatprep.subr.bf16.mxu1 %v6959_v46 }
 0x201   :  { %2352 = vmatmul.mubr.f32.gmra.mrb[146].mxu1 %v6339_v35 }
 0x202   :  { %v6347_v58 = vpop.f32.mrb[118].mxu0  ;;  %v6349_v30 = vpop.f32.mrb[118].mxu1  ;;  %3978 = vmatpush1.bf16.msra.mxu1 %v5911_v9  ;;  %3504 = vmatprep.mubr.msk.f32.mxu1 %vm2257_vm4, %v6345_v27  ;;  %v6368_v9 = vld [vmem:[%s6917_s3 + $0x38] sm:$0xff] }
 0x203   :  { %v1481_v33 = vpop.f32.mrb[119].mxu0  ;;  %v1781_v51 = vpop.f32.mrb[119].mxu1  ;;  %3979 = vmatprep.subr.bf16.mxu1 %v6959_v46  ;;  %6962 = vst [vmem:[#allocation6_spill] sm:$0xff] %v6368_v9 }
 0x205   :  { %2357 = vmatmul.mubr.f32.gmra.mrb[148].mxu1 %v6362_v31 }
 0x206   :  { %v6370_v20 = vpop.f32.mrb[120].mxu0  ;;  %v6372_v3 = vpop.f32.mrb[120].mxu1  ;;  %3981 = vmatpush1.bf16.msra.mxu1 %v5947_v48  ;;  %3505 = vmatprep.mubr.msk.f32.mxu1 %vm2257_vm4, %v6368_v9 }
 0x207   :  { %v1486_v33 = vpop.f32.mrb[121].mxu0  ;;  %v1786_v51 = vpop.f32.mrb[121].mxu1  ;;  %3982 = vmatprep.subr.bf16.mxu1 %v6959_v46 }
 0x209   :  { %2362 = vmatmul.mubr.f32.gmra.mrb[150].mxu1 %v6381_v41 }
 0x20a   :  { %v6389_v42 = vpop.f32.mrb[122].mxu0  ;;  %v6391_v48 = vpop.f32.mrb[122].mxu1  ;;  %3984 = vmatpush1.bf16.msra.mxu1 %v5872_v12  ;;  %3506 = vmatprep.mubr.msk.f32.mxu1 %vm2257_vm4, %v6387_v13 }
 0x20b   :  { %v1491_v33 = vpop.f32.mrb[123].mxu0  ;;  %v1791_v51 = vpop.f32.mrb[123].mxu1  ;;  %3985 = vmatprep.subr.bf16.mxu1 %v6959_v46 }
 0x20d   :  { %2367 = vmatmul.mubr.f32.gmra.mrb[152].mxu1 %v6400_v6 }
 0x20e   :  { %v6408_v23 = vpop.f32.mrb[124].mxu0  ;;  %v6410_v12 = vpop.f32.mrb[124].mxu1  ;;  %3987 = vmatpush1.bf16.msra.mxu1 %v5915_v59  ;;  %3507 = vmatprep.mubr.msk.f32.mxu1 %vm2257_vm4, %v6406_v21 }
 0x20f   :  { %v1496_v33 = vpop.f32.mrb[125].mxu0  ;;  %v1796_v51 = vpop.f32.mrb[125].mxu1  ;;  %3988 = vmatprep.subr.bf16.mxu1 %v6959_v46 }
 0x211   :  { %2372 = vmatmul.mubr.f32.gmra.mrb[154].mxu1 %v6419_v11 }
 0x212   :  { %v6427_v61 = vpop.f32.mrb[126].mxu0  ;;  %v6429_v59 = vpop.f32.mrb[126].mxu1  ;;  %3990 = vmatpush1.bf16.msra.mxu1 %v5951_v10  ;;  %3508 = vmatprep.mubr.msk.f32.mxu1 %vm2257_vm4, %v6425_v8  ;;  %v6457_v8 = vld [vmem:[%s6917_s3 + $0x70] sm:$0xff] }
 0x213   :  { %v1501_v33 = vpop.f32.mrb[127].mxu0  ;;  %v1801_v51 = vpop.f32.mrb[127].mxu1  ;;  %3991 = vmatprep.subr.bf16.mxu1 %v6959_v46  ;;  %6971 = vst [vmem:[#allocation15_spill] sm:$0xff] %v6457_v8 }
 0x215   :  { %2377 = vmatmul.mubr.f32.gmra.mrb[156].mxu1 %v6438_v57 }
 0x216   :  { %v6446_v50 = vpop.f32.mrb[128].mxu0  ;;  %v6448_v10 = vpop.f32.mrb[128].mxu1  ;;  %3993 = vmatpush1.bf16.msra.mxu1 %v6212_v37  ;;  %3509 = vmatprep.mubr.msk.f32.mxu1 %vm2257_vm4, %v6444_v36 }
 0x217   :  { %v1506_v33 = vpop.f32.mrb[129].mxu0  ;;  %v1806_v51 = vpop.f32.mrb[129].mxu1  ;;  %3994 = vmatprep.subr.bf16.mxu1 %v6959_v46 }
 0x219   :  { %2382 = vmatmul.mubr.f32.gmra.mrb[158].mxu1 %v6457_v8 }
 0x21a   :  { %v6460_v11 = vpop.f32.mrb[130].mxu0  ;;  %v6462_v21 = vpop.f32.mrb[130].mxu1  ;;  %3996 = vmatpush1.bf16.msra.mxu1 %v6237_v25  ;;  %3510 = vmatprep.mubr.msk.f32.mxu1 %vm2257_vm4, %v5880_v40  ;;  %v6973_v40 = vmax.f32 %v6184_v15, %v6266_v60 }
 0x21b   :  { %v1511_v33 = vpop.f32.mrb[131].mxu0  ;;  %v1811_v51 = vpop.f32.mrb[131].mxu1  ;;  %3997 = vmatprep.subr.bf16.mxu1 %v6959_v46 }
 0x21c   :  { %v6972_v33 = vmax.f32 %v6182_v18, %v6264_v0 }
 0x21e   :  { %v1514_v36 = vpop.f32.mrb[132].mxu0  ;;  %v1814_v57 = vpop.f32.mrb[132].mxu1  ;;  %3999 = vmatpush1.bf16.msra.mxu1 %v6259_v2 }
 0x21f   :  { %v1549_v6 = vmax.f32 %v6370_v20, %v1514_v36  ;;  %v1849_v13 = vmax.f32 %v6372_v3, %v1814_v57  ;;  %v1516_v37 = vpop.f32.mrb[133].mxu0  ;;  %v1816_v41 = vpop.f32.mrb[133].mxu1  ;;  %4000 = vmatprep.subr.bf16.mxu1 %v6959_v46 }
 0x221   :  { %v1555_v51 = vmax.f32 %v6972_v33, %v1549_v6  ;;  %v1855_v8 = vmax.f32 %v6973_v40, %v1849_v13  ;;  %v6974_v6 = vmax.f32 %v6202_v45, %v6278_v47 }
 0x222   :  { %v1519_v25 = vpop.f32.mrb[134].mxu0  ;;  %v1819_v9 = vpop.f32.mrb[134].mxu1  ;;  %4002 = vmatpush1.bf16.msra.mxu1 %v6215_v32 }
 0x223   :  { %v6480_v2 = vadd.f32 %v1555_v51, %v5695_v53  ;;  %v6483_v36 = vadd.f32 %v1855_v8, %v5695_v53  ;;  %v1550_v37 = vmax.f32 %v6389_v42, %v1519_v25  ;;  %v1850_v57 = vmax.f32 %v6391_v48, %v1819_v9  ;;  %v1521_v18 = vpop.f32.mrb[135].mxu0  ;;  %v1821_v0 = vpop.f32.mrb[135].mxu1  ;;  %4003 = vmatprep.subr.bf16.mxu1 %v6959_v46 }
 0x224   :  { %v6975_v8 = vmax.f32 %v6204_v44, %v6280_v43  ;;  %v6976_v44 = vmax.f32 %v6220_v52, %v6290_v19  ;;  %v6977_v43 = vmax.f32 %v6222_v17, %v6292_v29 }
 0x225   :  { %v1573_v15 = vmin.f32 %v6480_v2, 0.0  ;;  %v1873_v60 = vmin.f32 %v6483_v36, 0.0  ;;  %v1556_v13 = vmax.f32 %v6974_v6, %v1550_v37  ;;  %vm1567_vm10 = vcmp.gt.f32.partialorder %v6480_v2, 0.0 }
 0x226   :  { %v1856_v41 = vmax.f32 %v6975_v8, %v1850_v57  ;;  %v1524_v20 = vpop.f32.mrb[136].mxu0  ;;  %v1824_v25 = vpop.f32.mrb[136].mxu1  ;;  %4005 = vmatpush1.bf16.msra.mxu1 %v6240_v16  ;;  %vm1867_vm11 = vcmp.gt.f32.partialorder %v6483_v36, 0.0 }
 0x227   :  { %v1579_v42 = vmul.f32 1.442695, %v1573_v15  ;;  %v1879_v9 = vmul.f32 1.442695, %v1873_v60  ;;  %v1551_v3 = vmax.f32 %v6408_v23, %v1524_v20  ;;  %v1851_v48 = vmax.f32 %v6410_v12, %v1824_v25  ;;  %v1526_v33 = vpop.f32.mrb[137].mxu0  ;;  %v1826_v51 = vpop.f32.mrb[137].mxu1  ;;  %4006 = vmatprep.subr.bf16.mxu1 %v6959_v46 }
 0x228   :  { %v6501_v40 = vadd.f32 %v1556_v13, %v5722_v39  ;;  %v6504_v45 = vadd.f32 %v1856_v41, %v5722_v39  ;;  %v6978_v41 = vmax.f32 %v6228_v38, %v6302_v22 }
 0x229   :  { %4215 = vpow2.f32 %v1579_v42  ;;  %v1557_v47 = vmax.f32 %v6976_v44, %v1551_v3  ;;  %v1857_v23 = vmax.f32 %v6977_v43, %v1851_v48 }
 0x22a   :  { %4217 = vpow2.f32 %v1879_v9  ;;  %v1574_v12 = vmin.f32 %v6501_v40, 0.0  ;;  %v1529_v37 = vpop.f32.mrb[138].mxu0  ;;  %v1829_v57 = vpop.f32.mrb[138].mxu1  ;;  %v1874_v18 = vmin.f32 %v6504_v45, 0.0  ;;  %4008 = vmatpush1.bf16.msra.mxu1 %v6268_v14  ;;  %vm1568_vm12 = vcmp.gt.f32.partialorder %v6501_v40, 0.0 }
 0x22b   :  { %v6516_v0 = vadd.f32 %v1557_v47, %v5733_v62  ;;  %v6519_v15 = vadd.f32 %v1857_v23, %v5733_v62  ;;  %v1552_v52 = vmax.f32 %v6427_v61, %v1529_v37  ;;  %v1531_v19 = vpop.f32.mrb[139].mxu0  ;;  %v1831_v17 = vpop.f32.mrb[139].mxu1  ;;  %v1852_v60 = vmax.f32 %v6429_v59, %v1829_v57  ;;  %4009 = vmatprep.subr.bf16.mxu1 %v6959_v46 }
 0x22c   :  { %v1581_v29 = vmul.f32 1.442695, %v1574_v12  ;;  %v1881_v6 = vmul.f32 1.442695, %v1874_v18  ;;  %v6979_v61 = vmax.f32 %v6230_v34, %v6304_v28  ;;  %v6980_v34 = vmax.f32 %v6244_v1, %v6325_v63 }
 0x22d   :  { %v1575_v13 = vmin.f32 %v6516_v0, 0.0  ;;  %v1875_v8 = vmin.f32 %v6519_v15, 0.0  ;;  %v1558_v20 = vmax.f32 %v6978_v41, %v1552_v52  ;;  %v6981_v28 = vmax.f32 %v6246_v49, %v6327_v7 }
 0x22e   :  { %4219 = vpow2.f32 %v1581_v29  ;;  %v1858_v25 = vmax.f32 %v6979_v61, %v1852_v60  ;;  %v1534_v42 = vpop.f32.mrb[140].mxu0  ;;  %v1834_v9 = vpop.f32.mrb[140].mxu1  ;;  %vm1868_vm13 = vcmp.gt.f32.partialorder %v6504_v45, 0.0  ;;  %vm1569_vm14 = vcmp.gt.f32.partialorder %v6516_v0, 0.0 }
 0x22f   :  { %4221 = vpow2.f32 %v1881_v6  ;;  %v1583_v59 = vmul.f32 1.442695, %v1575_v13  ;;  %v1553_v3 = vmax.f32 %v6446_v50, %v1534_v42  ;;  %v1853_v48 = vmax.f32 %v6448_v10, %v1834_v9  ;;  %v1536_v33 = vpop.f32.mrb[141].mxu0  ;;  %v1836_v51 = vpop.f32.mrb[141].mxu1 }
 0x230   :  { %v1883_v44 = vmul.f32 1.442695, %v1875_v8  ;;  %v6536_v47 = vadd.f32 %v1558_v20, %v5764_v54  ;;  %v6539_v38 = vadd.f32 %v1858_v25, %v5764_v54  ;;  %v6982_v6 = vmax.f32 %v6250_v55, %v6347_v58 }
 0x231   :  { %4223 = vpow2.f32 %v1583_v59  ;;  %v1559_v22 = vmax.f32 %v6980_v34, %v1553_v3  ;;  %v1859_v50 = vmax.f32 %v6981_v28, %v1853_v48  ;;  %v6983_v20 = vmax.f32 %v6252_v56, %v6349_v30 }
 0x232   :  { %4225 = vpow2.f32 %v1883_v44  ;;  %v1576_v10 = vmin.f32 %v6536_v47, 0.0  ;;  %v1539_v43 = vpop.f32.mrb[142].mxu0  ;;  %v1839_v23 = vpop.f32.mrb[142].mxu1  ;;  %v1876_v37 = vmin.f32 %v6539_v38, 0.0  ;;  %vm1570_vm15 = vcmp.gt.f32.partialorder %v6536_v47, 0.0 }
 0x233   :  { %v4216_v12 = vpop.eup %4215  ;;  %v6550_v57 = vadd.f32 %v1559_v22, %v5793_v5  ;;  %v6553_v18 = vadd.f32 %v1859_v50, %v5793_v5  ;;  %v1554_v1 = vmax.f32 %v6460_v11, %v1539_v43  ;;  %v1541_v63 = vpop.f32.mrb[143].mxu0  ;;  %v1854_v19 = vmax.f32 %v6462_v21, %v1839_v23 }
 0x234   :  { %v1841_v52 = vpop.f32.mrb[143].mxu1  ;;  %v4218_v49 = vpop.eup %4217  ;;  %v1585_v7 = vmul.f32 1.442695, %v1576_v10  ;;  %v1885_v17 = vmul.f32 1.442695, %v1876_v37  ;;  %v3388_v41 = vadd.f32 -1.0, %v4216_v12 }
 0x235   :  { %v1577_v29 = vmin.f32 %v6550_v57, 0.0  ;;  %v1877_v60 = vmin.f32 %v6553_v18, 0.0  ;;  %v1560_v13 = vmax.f32 %v6982_v6, %v1554_v1  ;;  %v1860_v61 = vmax.f32 %v6983_v20, %v1854_v19 }
 0x236   :  { %4227 = vpow2.f32 %v1585_v7  ;;  %v6562_v8 = vpop.f32.mrb[144].mxu0  ;;  %v3442_v42 = vadd.f32 -1.0, %v4218_v49  ;;  %v1597_v44 = vsel %vm1567_vm10, %v6480_v2, %v3388_v41  ;;  %vm1869_vm0 = vcmp.gt.f32.partialorder %v6519_v15, 0.0 }
 0x237   :  { %4229 = vpow2.f32 %v1885_v17  ;;  %v1587_v11 = vmul.f32 1.442695, %v1577_v29  ;;  %v2026_v21 = vpop.f32.mrb[145].mxu0  ;;  %v1887_v9 = vmul.f32 1.442695, %v1877_v60  ;;  %v6569_v59 = vadd.f32 %v1560_v13, %v5815_v24 }
 0x238   :  { %v4220_v25 = vpop.eup %4219  ;;  %v6574_v3 = vadd.f32 %v1860_v61, %v5815_v24  ;;  %v1897_v43 = vsel %vm1867_vm11, %v6483_v36, %v3442_v42  ;;  %vm1870_vm1 = vcmp.gt.f32.partialorder %v6539_v38, 0.0  ;;  %vm1571_vm2 = vcmp.gt.f32.partialorder %v6550_v57, 0.0 }
 0x239   :  { %v4222_v55 = vpop.eup %4221  ;;  %v3389_v58 = vadd.f32 -1.0, %v4220_v25  ;;  %4231 = vpow2.f32 %v1587_v11  ;;  %v1578_v30 = vmin.f32 %v6569_v59, 0.0  ;;  %vm1572_vm3 = vcmp.gt.f32.partialorder %v6569_v59, 0.0 }
 0x23a   :  { %v3443_v56 = vadd.f32 -1.0, %v4222_v55  ;;  %v6578_v48 = vpop.f32.mrb[146].mxu0  ;;  %4233 = vpow2.f32 %v1887_v9  ;;  %v1878_v51 = vmin.f32 %v6574_v3, 0.0  ;;  %vm1871_vm5 = vcmp.gt.f32.partialorder %v6553_v18, 0.0 }
 0x23b   :  { %v4224_v33 = vpop.eup %4223  ;;  %v1598_v34 = vsel %vm1568_vm12, %v6501_v40, %v3389_v58  ;;  %v2031_v22 = vpop.f32.mrb[147].mxu0  ;;  %v1589_v50 = vmul.f32 1.442695, %v1578_v30  ;;  %vm1872_vm6 = vcmp.gt.f32.partialorder %v6574_v3, 0.0 }
 0x23c   :  { %v4226_v28 = vpop.eup %4225  ;;  %v6585_v10 = vpack.c.bf16 %v1598_v34, %v1597_v44  ;;  %v1898_v23 = vsel %vm1868_vm13, %v6504_v45, %v3443_v56  ;;  %v1889_v12 = vmul.f32 1.442695, %v1878_v51  ;;  %v3390_v40 = vadd.f32 -1.0, %v4224_v33 }
 0x23d   :  { %v6591_v37 = vpack.c.bf16 %v1898_v23, %v1897_v43  ;;  %4235 = vpow2.f32 %v1589_v50  ;;  %v3444_v63 = vadd.f32 -1.0, %v4226_v28  ;;  %v6984_v23 = vld [vmem:[#allocation6_spill] sm:$0xff]  ;;  %vm2584_vm13 = vcmask 261120  }
 0x23e   :  { %4011 = vmatpush1.bf16.msra.mxu1 %v6585_v10  ;;  %4055 = vmatpush1.bf16.msra.mxu0 %v6585_v10  ;;  %v6595_v2 = vpop.f32.mrb[148].mxu0  ;;  %4237 = vpow2.f32 %v1889_v12  ;;  %v1599_v19 = vsel %vm1569_vm14, %v6516_v0, %v3390_v40 }
 0x23f   :  { %4012 = vmatprep.subr.bf16.mxu1 %v6959_v46  ;;  %4056 = vmatprep.subr.bf16.mxu0 %v6959_v46  ;;  %v2036_v1 = vpop.f32.mrb[149].mxu0  ;;  %v1899_v13 = vsel %vm1869_vm0, %v6519_v15, %v3444_v63  ;;  %v6986_v63 = vld [vmem:[#allocation3_spill] sm:$0xff] }
 0x240   :  { %v4228_v36 = vpop.eup %4227 }
 0x241   :  { %v4230_v45 = vpop.eup %4229  ;;  %v3391_v52 = vadd.f32 -1.0, %v4228_v36  ;;  %v6985_v36 = vld [vmem:[#allocation7_spill] sm:$0xff] }
 0x242   :  { %v3445_v49 = vadd.f32 -1.0, %v4230_v45  ;;  %v6601_v7 = vpop.f32.mrb[150].mxu0  ;;  %v6987_v45 = vld [vmem:[#allocation8_spill] sm:$0xff] }
 0x243   :  { %v1600_v17 = vsel %vm1570_vm15, %v6536_v47, %v3391_v52  ;;  %v2041_v29 = vpop.f32.mrb[151].mxu0  ;;  %v4232_v60 = vpop.eup %4231 }
 0x244   :  { %v6607_v6 = vpack.c.bf16 %v1600_v17, %v1599_v19  ;;  %v1900_v41 = vsel %vm1870_vm1, %v6539_v38, %v3445_v49  ;;  %v4234_v11 = vpop.eup %4233  ;;  %v3392_v0 = vadd.f32 -1.0, %v4232_v60  ;;  %v6988_v17 = vld [vmem:[#allocation9_spill] sm:$0xff]  ;;  %v6989_v29 = vld [vmem:[#allocation4_spill] sm:$0xff]  ;;  %v6990_v60 = vld [vmem:[#allocation10_spill] sm:$0xff] }
 0x245   :  { %v6611_v20 = vpack.c.bf16 %v1900_v41, %v1899_v13  ;;  %v3446_v25 = vadd.f32 -1.0, %v4234_v11 }
 0x246   :  { %4014 = vmatpush1.bf16.msra.mxu1 %v6607_v6  ;;  %4058 = vmatpush1.bf16.msra.mxu0 %v6607_v6  ;;  %v6615_v61 = vpop.f32.mrb[152].mxu0  ;;  %v1601_v55 = vsel %vm1571_vm2, %v6550_v57, %v3392_v0  ;;  %v6991_v0 = vld [vmem:[#allocation11_spill] sm:$0xff] }
 0x247   :  { %4015 = vmatprep.subr.bf16.mxu1 %v6959_v46  ;;  %4059 = vmatprep.subr.bf16.mxu0 %v6959_v46  ;;  %v2046_v47 = vpop.f32.mrb[153].mxu0  ;;  %v4236_v21 = vpop.eup %4235  ;;  %v1901_v33 = vsel %vm1871_vm5, %v6553_v18, %v3446_v25 }
 0x248   :  { %v4238_v15 = vpop.eup %4237  ;;  %v3393_v42 = vadd.f32 -1.0, %v4236_v21  ;;  %v6992_v47 = vld [vmem:[#allocation5_spill] sm:$0xff]  ;;  %v6993_v21 = vld [vmem:[#allocation12_spill] sm:$0xff] }
 0x249   :  { %v3447_v38 = vadd.f32 -1.0, %v4238_v15 }
 0x24a   :  { %v6621_v9 = vpop.f32.mrb[154].mxu0  ;;  %v1602_v58 = vsel %vm1572_vm3, %v6569_v59, %v3393_v42  ;;  %v6994_v42 = vld [vmem:[#allocation13_spill] sm:$0xff] }
 0x24b   :  { %v2051_v56 = vpop.f32.mrb[155].mxu0  ;;  %v6627_v30 = vpack.c.bf16 %v1602_v58, %v1601_v55  ;;  %v1902_v51 = vsel %vm1872_vm6, %v6574_v3, %v3447_v38  ;;  %v6995_v38 = vld [vmem:[#allocation14_spill] sm:$0xff]  ;;  %vm4284_vm6 = vmmov 0  }
 0x24c   :  { %v6631_v44 = vpack.c.bf16 %v1902_v51, %v1901_v33  ;;  %v6996_v56 = vld [vmem:[#allocation15_spill] sm:$0xff] }
 0x24d   :  { %4017 = vmatpush1.bf16.msra.mxu1 %v6627_v30  ;;  %4061 = vmatpush1.bf16.msra.mxu0 %v6627_v30 }
 0x24e   :  { %v6635_v34 = vpop.f32.mrb[156].mxu0  ;;  %4062 = vmatprep.subr.bf16.mxu0 %v6959_v46 }
 0x24f   :  { %v2143_v57 = vmax.f32 %v6562_v8, %v6635_v34  ;;  %v2056_v59 = vpop.f32.mrb[157].mxu0 }
 0x250   :  { %2482 = vmatmul.mubr.f32.vlgmr.msra.gmra.mrb[160].mxu1 %v6313_v4 }
 0x251   :  { %4064 = vmatpush1.bf16.msra.mxu0 %v6591_v37  ;;  %3511 = vmatprep.mubr.msk.f32.mxu1 %vm2257_vm4, %v6321_v26 }
 0x252   :  { %v6644_v18 = vpop.f32.mrb[158].mxu0  ;;  %4065 = vmatprep.subr.bf16.mxu0 %v6959_v46 }
 0x253   :  { %v2144_v3 = vmax.f32 %v6578_v48, %v6644_v18  ;;  %v2061_v22 = vpop.f32.mrb[159].mxu0 }
 0x254   :  { %2487 = vmatmul.mubr.f32.gmra.mrb[162].mxu1 %v6339_v35 }
 0x255   :  { %4067 = vmatpush1.bf16.msra.mxu0 %v6611_v20  ;;  %3512 = vmatprep.mubr.msk.f32.mxu1 %vm2257_vm4, %v6345_v27 }
 0x256   :  { %v6653_v28 = vpop.f32.mrb[160].mxu0  ;;  %4068 = vmatprep.subr.bf16.mxu0 %v6959_v46 }
 0x257   :  { %v2145_v50 = vmax.f32 %v6595_v2, %v6653_v28  ;;  %v2066_v43 = vpop.f32.mrb[161].mxu0 }
 0x258   :  { %2492 = vmatmul.mubr.f32.gmra.mrb[164].mxu1 %v6362_v31 }
 0x259   :  { %4070 = vmatpush1.bf16.msra.mxu0 %v6631_v44  ;;  %3513 = vmatprep.mubr.msk.f32.mxu1 %vm2257_vm4, %v6984_v23 }
 0x25a   :  { %4071 = vmatprep.subr.bf16.mxu0 %v6959_v46 }
 0x25b   :  { %v6662_v12 = vpop.f32.mrb[162].mxu0 }
 0x25c   :  { %v2146_v40 = vmax.f32 %v6601_v7, %v6662_v12  ;;  %v2071_v1 = vpop.f32.mrb[163].mxu0  ;;  %2497 = vmatmul.mubr.f32.gmra.mrb[166].mxu1 %v6985_v36  ;;  %2773 = vmatmul.mubr.f32.vlgmr.msra.gmra.mrb[192].mxu0 %v6313_v4 }
 0x25d   :  { %4073 = vmatpush1.bf16.msra.mxu0 %v6986_v63  ;;  %3514 = vmatprep.mubr.msk.f32.mxu1 %vm2257_vm4, %v6987_v45 }
 0x25e   :  { %4074 = vmatprep.subr.bf16.mxu0 %v6959_v46  ;;  %3525 = vmatprep.mubr.msk.f32.mxu0 %vm2257_vm4, %v6321_v26 }
 0x25f   :  { %v6672_v52 = vpop.f32.mrb[164].mxu0 }
 0x260   :  { %v2147_v49 = vmax.f32 %v6615_v61, %v6672_v52  ;;  %v2076_v19 = vpop.f32.mrb[165].mxu0  ;;  %2502 = vmatmul.mubr.f32.gmra.mrb[168].mxu1 %v6988_v17  ;;  %2778 = vmatmul.mubr.f32.gmra.mrb[194].mxu0 %v6339_v35 }
 0x261   :  { %4076 = vmatpush1.bf16.msra.mxu0 %v6989_v29  ;;  %3515 = vmatprep.mubr.msk.f32.mxu1 %vm2257_vm4, %v6990_v60 }
 0x262   :  { %4077 = vmatprep.subr.bf16.mxu0 %v6959_v46  ;;  %3526 = vmatprep.mubr.msk.f32.mxu0 %vm2257_vm4, %v6345_v27 }
 0x263   :  { %v6684_v13 = vpop.f32.mrb[166].mxu0 }
 0x264   :  { %v2148_v41 = vmax.f32 %v6621_v9, %v6684_v13  ;;  %v2081_v11 = vpop.f32.mrb[167].mxu0  ;;  %2507 = vmatmul.mubr.f32.gmra.mrb[170].mxu1 %v6991_v0  ;;  %2783 = vmatmul.mubr.f32.gmra.mrb[196].mxu0 %v6362_v31 }
 0x265   :  { %4079 = vmatpush1.bf16.msra.mxu0 %v6992_v47  ;;  %3516 = vmatprep.mubr.msk.f32.mxu1 %vm2257_vm4, %v6993_v21 }
 0x266   :  { %4080 = vmatprep.subr.bf16.mxu0 %v6959_v46  ;;  %3527 = vmatprep.mubr.msk.f32.mxu0 %vm2257_vm4, %v6984_v23 }
 0x267   :  { %v2084_v25 = vpop.f32.mrb[168].mxu0 }
 0x268   :  { %v2086_v15 = vpop.f32.mrb[169].mxu0  ;;  %2512 = vmatmul.mubr.f32.gmra.mrb[172].mxu1 %v6994_v42  ;;  %2788 = vmatmul.mubr.f32.gmra.mrb[198].mxu0 %v6985_v36  ;;  %v4271_v36 = vld [vmem:[%s6917_s3 + $0x8] sm:$0xff] }
 0x269   :  { %4082 = vmatpush1.bf16.msra.mxu0 %v6215_v32  ;;  %3517 = vmatprep.mubr.msk.f32.mxu1 %vm2257_vm4, %v6995_v38 }
 0x26a   :  { %4083 = vmatprep.subr.bf16.mxu0 %v6959_v46  ;;  %3528 = vmatprep.mubr.msk.f32.mxu0 %vm2257_vm4, %v6987_v45 }
 0x26b   :  { %v2089_v55 = vpop.f32.mrb[170].mxu0 }
 0x26c   :  { %v2091_v58 = vpop.f32.mrb[171].mxu0  ;;  %2517 = vmatmul.mubr.f32.gmra.mrb[174].mxu1 %v6996_v56  ;;  %2793 = vmatmul.mubr.f32.gmra.mrb[200].mxu0 %v6988_v17 }
 0x26d   :  { %4085 = vmatpush1.bf16.msra.mxu0 %v6240_v16  ;;  %3529 = vmatprep.mubr.msk.f32.mxu0 %vm2257_vm4, %v6990_v60 }
 0x26e   :  { %4086 = vmatprep.subr.bf16.mxu0 %v6959_v46 }
 0x26f   :  { %v2094_v33 = vpop.f32.mrb[172].mxu0 }
 0x270   :  { %v2096_v51 = vpop.f32.mrb[173].mxu0  ;;  %2798 = vmatmul.mubr.f32.gmra.mrb[202].mxu0 %v6991_v0 }
 0x271   :  { %4088 = vmatpush1.bf16.msra.mxu0 %v6268_v14  ;;  %3530 = vmatprep.mubr.msk.f32.mxu0 %vm2257_vm4, %v6993_v21 }
 0x272   :  { %4089 = vmatprep.subr.bf16.mxu0 %v6959_v46 }
 0x273   :  { %v2099_v59 = vpop.f32.mrb[174].mxu0 }
 0x274   :  { %v2101_v22 = vpop.f32.mrb[175].mxu0  ;;  %2803 = vmatmul.mubr.f32.gmra.mrb[204].mxu0 %v6994_v42 }
 0x275   :  { %4091 = vmatpush1.bf16.msra.mxu0 %v6585_v10  ;;  %3531 = vmatprep.mubr.msk.f32.mxu0 %vm2257_vm4, %v6995_v38 }
 0x276   :  { %4092 = vmatprep.subr.bf16.mxu0 %v6959_v46 }
 0x277   :  { %v2104_v43 = vpop.f32.mrb[176].mxu0 }
 0x278   :  { %v2106_v23 = vpop.f32.mrb[177].mxu0  ;;  %2808 = vmatmul.mubr.f32.gmra.mrb[206].mxu0 %v6996_v56 }
 0x279   :  { %4094 = vmatpush1.bf16.msra.mxu0 %v6607_v6  ;;  %3532 = vmatprep.mubr.msk.f32.mxu0 %vm2257_vm4, %v4271_v36 }
 0x27a   :  { %4095 = vmatprep.subr.bf16.mxu0 %v6959_v46 }
 0x27b   :  { %v2109_v1 = vpop.f32.mrb[178].mxu0 }
 0x27c   :  { %v2111_v45 = vpop.f32.mrb[179].mxu0 }
 0x27d   :  { %4097 = vmatpush1.bf16.msra.mxu0 %v6627_v30 }
 0x27e   :  { %4098 = vmatprep.subr.bf16.mxu0 %v6959_v46 }
 0x27f   :  { %v2114_v19 = vpop.f32.mrb[180].mxu0 }
 0x280   :  { %v2149_v17 = vmax.f32 %v2084_v25, %v2114_v19  ;;  %v2116_v60 = vpop.f32.mrb[181].mxu0 }
 0x281   :  { %4100 = vmatpush1.bf16.msra.mxu0 %v6591_v37 }
 0x282   :  { %v2155_v11 = vmax.f32 %v2143_v57, %v2149_v17  ;;  %4101 = vmatprep.subr.bf16.mxu0 %v6959_v46 }
 0x283   :  { %v2119_v0 = vpop.f32.mrb[182].mxu0 }
 0x284   :  { %v2161_v21 = vadd.f32 %v2155_v11, %v5695_v53  ;;  %v2150_v15 = vmax.f32 %v2089_v55, %v2119_v0  ;;  %v2121_v42 = vpop.f32.mrb[183].mxu0 }
 0x285   :  { %4103 = vmatpush1.bf16.msra.mxu0 %v6611_v20 }
 0x286   :  { %v2173_v38 = vmin.f32 %v2161_v21, 0.0  ;;  %v2156_v25 = vmax.f32 %v2144_v3, %v2150_v15  ;;  %4104 = vmatprep.subr.bf16.mxu0 %v6959_v46  ;;  %vm2167_vm7 = vcmp.gt.f32.partialorder %v2161_v21, 0.0 }
 0x287   :  { %v2124_v58 = vpop.f32.mrb[184].mxu0 }
 0x288   :  { %v2179_v56 = vmul.f32 1.442695, %v2173_v38  ;;  %v2162_v8 = vadd.f32 %v2156_v25, %v5722_v39  ;;  %v2151_v34 = vmax.f32 %v2094_v33, %v2124_v58  ;;  %v2126_v57 = vpop.f32.mrb[185].mxu0 }
 0x289   :  { %4106 = vmatpush1.bf16.msra.mxu0 %v6631_v44 }
 0x28a   :  { %4239 = vpow2.f32 %v2179_v56  ;;  %v2174_v53 = vmin.f32 %v2162_v8, 0.0  ;;  %v2157_v55 = vmax.f32 %v2145_v50, %v2151_v34  ;;  %4107 = vmatprep.subr.bf16.mxu0 %v6959_v46  ;;  %vm2168_vm8 = vcmp.gt.f32.partialorder %v2162_v8, 0.0 }
 0x28b   :  { %v2129_v48 = vpop.f32.mrb[186].mxu0 }
 0x28c   :  { %v2181_v18 = vmul.f32 1.442695, %v2174_v53  ;;  %v2163_v3 = vadd.f32 %v2157_v55, %v5733_v62  ;;  %v2152_v51 = vmax.f32 %v2099_v59, %v2129_v48  ;;  %v2131_v22 = vpop.f32.mrb[187].mxu0 }
 0x28e   :  { %4241 = vpow2.f32 %v2181_v18  ;;  %v2175_v39 = vmin.f32 %v2163_v3, 0.0  ;;  %v2158_v33 = vmax.f32 %v2146_v40, %v2152_v51  ;;  %vm2169_vm9 = vcmp.gt.f32.partialorder %v2163_v3, 0.0 }
 0x28f   :  { %v2134_v23 = vpop.f32.mrb[188].mxu0 }
 0x290   :  { %v2183_v36 = vmul.f32 1.442695, %v2175_v39  ;;  %v2164_v2 = vadd.f32 %v2158_v33, %v5764_v54  ;;  %v2153_v28 = vmax.f32 %v2104_v43, %v2134_v23  ;;  %v2136_v50 = vpop.f32.mrb[189].mxu0 }
 0x292   :  { %4243 = vpow2.f32 %v2183_v36  ;;  %v2176_v45 = vmin.f32 %v2164_v2, 0.0  ;;  %v2159_v62 = vmax.f32 %v2147_v49, %v2153_v28  ;;  %vm2170_vm10 = vcmp.gt.f32.partialorder %v2164_v2, 0.0 }
 0x293   :  { %v2139_v59 = vpop.f32.mrb[190].mxu0 }
 0x294   :  { %v4240_v19 = vpop.eup %4239  ;;  %v2185_v17 = vmul.f32 1.442695, %v2176_v45  ;;  %v2165_v60 = vadd.f32 %v2159_v62, %v5793_v5  ;;  %v2154_v11 = vmax.f32 %v2109_v1, %v2139_v59  ;;  %v2141_v7 = vpop.f32.mrb[191].mxu0 }
 0x295   :  { %v3496_v40 = vadd.f32 -1.0, %v4240_v19 }
 0x296   :  { %4245 = vpow2.f32 %v2185_v17  ;;  %v2177_v12 = vmin.f32 %v2165_v60, 0.0  ;;  %v2160_v54 = vmax.f32 %v2148_v41, %v2154_v11  ;;  %vm2171_vm11 = vcmp.gt.f32.partialorder %v2165_v60, 0.0 }
 0x297   :  { %v2197_v49 = vsel %vm2167_vm7, %v2161_v21, %v3496_v40 }
 0x298   :  { %v4242_v43 = vpop.eup %4241  ;;  %v2187_v0 = vmul.f32 1.442695, %v2177_v12  ;;  %v2166_v15 = vadd.f32 %v2160_v54, %v5815_v24 }
 0x299   :  { %v3497_v61 = vadd.f32 -1.0, %v4242_v43 }
 0x29a   :  { %4247 = vpow2.f32 %v2187_v0  ;;  %v2178_v52 = vmin.f32 %v2166_v15, 0.0  ;;  %vm2172_vm12 = vcmp.gt.f32.partialorder %v2166_v15, 0.0 }
 0x29b   :  { %v2198_v5 = vsel %vm2168_vm8, %v2162_v8, %v3497_v61 }
 0x29c   :  { %v4244_v1 = vpop.eup %4243  ;;  %v2189_v42 = vmul.f32 1.442695, %v2178_v52  ;;  %v6762_v38 = vpack.c.bf16 %v2198_v5, %v2197_v49 }
 0x29d   :  { %v3498_v9 = vadd.f32 -1.0, %v4244_v1 }
 0x29e   :  { %4249 = vpow2.f32 %v2189_v42  ;;  %4109 = vmatpush1.bf16.msra.mxu0 %v6762_v38  ;;  %v6792_v42 = vpop.permute.xlu0 %2536 }
 0x29f   :  { %4110 = vmatprep.subr.bf16.mxu0 %v6959_v46  ;;  %v2199_v24 = vsel %vm2169_vm9, %v2163_v3, %v3498_v9  ;;  %vm3093_vm9 = vcmask 130048  }
 0x2a0   :  { %v4246_v13 = vpop.eup %4245 }
 0x2a1   :  { %v3499_v41 = vadd.f32 -1.0, %v4246_v13 }
 0x2a3   :  { %v2200_v25 = vsel %vm2170_vm10, %v2164_v2, %v3499_v41 }
 0x2a4   :  { %v4248_v58 = vpop.eup %4247  ;;  %v6766_v56 = vpack.c.bf16 %v2200_v25, %v2199_v24 }
 0x2a5   :  { %v3500_v21 = vadd.f32 -1.0, %v4248_v58 }
 0x2a6   :  { %4112 = vmatpush1.bf16.msra.mxu0 %v6766_v56 }
 0x2a7   :  { %4113 = vmatprep.subr.bf16.mxu0 %v6959_v46  ;;  %v2201_v57 = vsel %vm2171_vm11, %v2165_v60, %v3500_v21 }
 0x2a8   :  { %v4250_v8 = vpop.eup %4249 }
 0x2a9   :  { %v3501_v34 = vadd.f32 -1.0, %v4250_v8  ;;  %v6797_v8 = vpop.permute.xlu1 %2541 }
 0x2ab   :  { %v2202_v53 = vsel %vm2172_vm12, %v2166_v15, %v3501_v34 }
 0x2ac   :  { %v6770_v55 = vpack.c.bf16 %v2202_v53, %v2201_v57 }
 0x2ae   :  { %4115 = vmatpush1.bf16.msra.mxu0 %v6770_v55 }
 0x2af   :  { %4124 = vmatprep.subr.bf16.mxu0 %v6959_v46 }
 0x2b1   :  { %2908 = vmatmul.mubr.f32.vlgmr.msra.gmra.mrb[208].mxu0 %v6313_v4  ;;  %v2582_v4 = vld [vmem:[%s6918_s5] sm:$0xff] }
 0x2b2   :  { %3533 = vmatprep.mubr.msk.f32.mxu0 %vm2257_vm4, %v6321_v26  ;;  %3574 = vmatprep.mubr.msk.f32.mxu1 %vm2584_vm13, %v2582_v4 }
 0x2b5   :  { %2913 = vmatmul.mubr.f32.gmra.mrb[210].mxu0 %v6339_v35 }
 0x2b6   :  { %3534 = vmatprep.mubr.msk.f32.mxu0 %vm2257_vm4, %v6345_v27 }
 0x2b9   :  { %2918 = vmatmul.mubr.f32.gmra.mrb[212].mxu0 %v6362_v31 }
 0x2d0   :  { %v2348_v48 = vpop.f32.mrb[144].mxu1 }
 0x2d1   :  { %v2350_v18 = vpop.f32.mrb[145].mxu1 }
 0x2d4   :  { %v2353_v3 = vpop.f32.mrb[146].mxu1 }
 0x2d5   :  { %v2355_v51 = vpop.f32.mrb[147].mxu1 }
 0x2d8   :  { %v2358_v22 = vpop.f32.mrb[148].mxu1 }
 0x2d9   :  { %v2360_v39 = vpop.f32.mrb[149].mxu1 }
 0x2dc   :  { %v6781_v33 = vpop.f32.mrb[150].mxu1 }
 0x2dd   :  { %v2365_v26 = vpop.f32.mrb[151].mxu1 }
 0x2e0   :  { %v2368_v35 = vpop.f32.mrb[152].mxu1 }
 0x2e1   :  { %v2370_v27 = vpop.f32.mrb[153].mxu1 }
 0x2e4   :  { %v2373_v23 = vpop.f32.mrb[154].mxu1 }
 0x2e5   :  { %v2375_v31 = vpop.f32.mrb[155].mxu1 }
 0x2e8   :  { %v2378_v36 = vpop.f32.mrb[156].mxu1 }
 0x2e9   :  { %v2380_v2 = vpop.f32.mrb[157].mxu1 }
 0x2ec   :  { %v2383_v28 = vpop.f32.mrb[158].mxu1 }
 0x2ed   :  { %v2385_v50 = vpop.f32.mrb[159].mxu1 }
 0x323   :  { %v2483_v45 = vpop.f32.mrb[160].mxu1 }
 0x324   :  { %v2522_v62 = vmax.f32 %v2348_v48, %v2483_v45  ;;  %v2485_v59 = vpop.f32.mrb[161].mxu1 }
 0x327   :  { %v2488_v19 = vpop.f32.mrb[162].mxu1 }
 0x328   :  { %v2523_v17 = vmax.f32 %v2353_v3, %v2488_v19  ;;  %v2490_v60 = vpop.f32.mrb[163].mxu1 }
 0x32b   :  { %v2493_v11 = vpop.f32.mrb[164].mxu1 }
 0x32c   :  { %v2524_v7 = vmax.f32 %v2358_v22, %v2493_v11  ;;  %v2495_v12 = vpop.f32.mrb[165].mxu1 }
 0x32f   :  { %v2498_v54 = vpop.f32.mrb[166].mxu1  ;;  %v6787_v40 = vpop.f32.mrb[192].mxu0 }
 0x330   :  { %v2525_v43 = vmax.f32 %v6781_v33, %v2498_v54  ;;  %v2500_v0 = vpop.f32.mrb[167].mxu1  ;;  %v2776_v15 = vpop.f32.mrb[193].mxu0 }
 0x331   :  { %v6802_v33 = vpop.permute.xlu0 %2546 }
 0x333   :  { %v2503_v61 = vpop.f32.mrb[168].mxu1  ;;  %v6790_v52 = vpop.f32.mrb[194].mxu0 }
 0x334   :  { %v2526_v49 = vmax.f32 %v2368_v35, %v2503_v61  ;;  %v2505_v5 = vpop.f32.mrb[169].mxu1  ;;  %v2781_v1 = vpop.f32.mrb[195].mxu0 }
 0x336   :  { %v2530_v9 = vmax.f32 %v2522_v62, %v2526_v49 }
 0x337   :  { %v2508_v13 = vpop.f32.mrb[170].mxu1  ;;  %v6794_v41 = vpop.f32.mrb[196].mxu0 }
 0x338   :  { %v2554_v24 = vadd.f32 %v6792_v42, %v2530_v9  ;;  %v2527_v25 = vmax.f32 %v2373_v23, %v2508_v13  ;;  %v2510_v58 = vpop.f32.mrb[171].mxu1  ;;  %v2786_v21 = vpop.f32.mrb[197].mxu0 }
 0x33a   :  { %v2562_v34 = vmin.f32 %v2554_v24, 0.0  ;;  %v2531_v57 = vmax.f32 %v2523_v17, %v2527_v25  ;;  %vm2558_vm14 = vcmp.gt.f32.partialorder %v2554_v24, 0.0 }
 0x33b   :  { %v2513_v53 = vpop.f32.mrb[172].mxu1  ;;  %v6799_v48 = vpop.f32.mrb[198].mxu0 }
 0x33c   :  { %v2566_v18 = vmul.f32 1.442695, %v2562_v34  ;;  %v2555_v3 = vadd.f32 %v6797_v8, %v2531_v57  ;;  %v2528_v51 = vmax.f32 %v2378_v36, %v2513_v53  ;;  %v2515_v22 = vpop.f32.mrb[173].mxu1  ;;  %v2791_v39 = vpop.f32.mrb[199].mxu0 }
 0x33d   :  { %v6807_v36 = vpop.permute.xlu1 %2551 }
 0x33e   :  { %4251 = vpow2.f32 %v2566_v18  ;;  %v2563_v4 = vmin.f32 %v2555_v3, 0.0  ;;  %v2532_v26 = vmax.f32 %v2524_v7, %v2528_v51  ;;  %vm2559_vm15 = vcmp.gt.f32.partialorder %v2555_v3, 0.0  ;;  %v2583_v51 = vld [vmem:[%s6918_s5 + $0x8] sm:$0xff] }
 0x33f   :  { %v2518_v35 = vpop.f32.mrb[174].mxu1  ;;  %v6804_v27 = vpop.f32.mrb[200].mxu0 }
 0x340   :  { %v2568_v23 = vmul.f32 1.442695, %v2563_v4  ;;  %v2556_v31 = vadd.f32 %v6802_v33, %v2532_v26  ;;  %v2529_v2 = vmax.f32 %v2383_v28, %v2518_v35  ;;  %v2520_v50 = vpop.f32.mrb[175].mxu1  ;;  %v2796_v45 = vpop.f32.mrb[201].mxu0 }
 0x342   :  { %4253 = vpow2.f32 %v2568_v23  ;;  %v2564_v62 = vmin.f32 %v2556_v31, 0.0  ;;  %v2533_v59 = vmax.f32 %v2525_v43, %v2529_v2  ;;  %vm2560_vm0 = vcmp.gt.f32.partialorder %v2556_v31, 0.0 }
 0x343   :  { %v6809_v19 = vpop.f32.mrb[202].mxu0 }
 0x344   :  { %v2570_v17 = vmul.f32 1.442695, %v2564_v62  ;;  %v2557_v60 = vadd.f32 %v6807_v36, %v2533_v59  ;;  %v2801_v11 = vpop.f32.mrb[203].mxu0 }
 0x346   :  { %4255 = vpow2.f32 %v2570_v17  ;;  %v2565_v7 = vmin.f32 %v2557_v60, 0.0  ;;  %vm2561_vm1 = vcmp.gt.f32.partialorder %v2557_v60, 0.0 }
 0x347   :  { %v6812_v12 = vpop.f32.mrb[204].mxu0 }
 0x348   :  { %v4252_v54 = vpop.eup %4251  ;;  %v2572_v0 = vmul.f32 1.442695, %v2565_v7  ;;  %v2806_v28 = vpop.f32.mrb[205].mxu0 }
 0x349   :  { %v3518_v15 = vadd.f32 -1.0, %v4252_v54 }
 0x34a   :  { %4257 = vpow2.f32 %v2572_v0 }
 0x34b   :  { %v6814_v61 = vpop.f32.mrb[206].mxu0  ;;  %v2578_v1 = vsel %vm2558_vm14, %v2554_v24, %v3518_v15  ;;  %v4272_v24 = vld [vmem:[%s6917_s3 + $0x38] sm:$0xff] }
 0x34c   :  { %v4254_v43 = vpop.eup %4253  ;;  %v2811_v49 = vpop.f32.mrb[207].mxu0 }
 0x34d   :  { %v3519_v5 = vadd.f32 -1.0, %v4254_v43 }
 0x34f   :  { %v2579_v9 = vsel %vm2559_vm15, %v2555_v3, %v3519_v5 }
 0x350   :  { %v4256_v13 = vpop.eup %4255  ;;  %v4018_v25 = vpack.c.bf16 %v2579_v9, %v2578_v1 }
 0x351   :  { %v3520_v58 = vadd.f32 -1.0, %v4256_v13 }
 0x352   :  { %4019 = vmatprep.subr.bf16.mxu1 %v4018_v25 }
 0x353   :  { %4021 = vmatpush3.bf16.msra.mxu1 %v4018_v25  ;;  %v2580_v57 = vsel %vm2560_vm0, %v2556_v31, %v3520_v58 }
 0x354   :  { %v4258_v21 = vpop.eup %4257 }
 0x355   :  { %v3521_v34 = vadd.f32 -1.0, %v4258_v21 }
 0x357   :  { %v2581_v53 = vsel %vm2561_vm1, %v2557_v60, %v3521_v34 }
 0x358   :  { %v4022_v18 = vpack.c.bf16 %v2581_v53, %v2580_v57 }
 0x35a   :  { %4023 = vmatprep.subr.bf16.mxu1 %v4022_v18 }
 0x35b   :  { %4025 = vmatpush3.bf16.msra.mxu1 %v4022_v18 }
 0x35c   :  { %4127 = vmatprep.subr.bf16.mxu1 %v6959_v46 }
 0x35e   :  { %3575 = vmatmul.mubr.msk.f32.vlgmr.msra.gmra.mrb[176].mxu1 %vm2584_vm13, %v2583_v51 }
 0x35f   :  { %4142 = vmatpush1.bf16.msra.mxu1 %v6986_v63  ;;  %3535 = vmatprep.mubr.msk.f32.mxu1 %vm2257_vm4, %v4272_v24 }
 0x360   :  { %4128 = vmatprep.subr.bf16.mxu1 %v6959_v46 }
 0x363   :  { %4143 = vmatpush1.bf16.msra.mxu1 %v6989_v29 }
 0x364   :  { %4129 = vmatprep.subr.bf16.mxu1 %v6959_v46 }
 0x367   :  { %4144 = vmatpush1.bf16.msra.mxu1 %v6992_v47 }
 0x368   :  { %4130 = vmatprep.subr.bf16.mxu1 %v6959_v46 }
 0x36b   :  { %4145 = vmatpush1.bf16.msra.mxu1 %v6215_v32 }
 0x36c   :  { %4131 = vmatprep.subr.bf16.mxu1 %v6959_v46 }
 0x36f   :  { %4146 = vmatpush1.bf16.msra.mxu1 %v6240_v16 }
 0x370   :  { %4132 = vmatprep.subr.bf16.mxu1 %v6959_v46 }
 0x373   :  { %4147 = vmatpush1.bf16.msra.mxu1 %v6268_v14 }
 0x374   :  { %4133 = vmatprep.subr.bf16.mxu1 %v6959_v46 }
 0x377   :  { %4148 = vmatpush1.bf16.msra.mxu1 %v6585_v10 }
 0x378   :  { %4134 = vmatprep.subr.bf16.mxu1 %v6959_v46 }
 0x37b   :  { %4149 = vmatpush1.bf16.msra.mxu1 %v6607_v6 }
 0x37c   :  { %4135 = vmatprep.subr.bf16.mxu1 %v6959_v46 }
 0x37f   :  { %4150 = vmatpush1.bf16.msra.mxu1 %v6627_v30 }
 0x380   :  { %4136 = vmatprep.subr.bf16.mxu1 %v6959_v46 }
 0x383   :  { %4151 = vmatpush1.bf16.msra.mxu1 %v6591_v37  ;;  %v4273_v37 = vld [vmem:[%s6917_s3 + $0x30] sm:$0xff] }
 0x384   :  { %v2909_v32 = vpop.f32.mrb[208].mxu0  ;;  %4137 = vmatprep.subr.bf16.mxu1 %v6959_v46 }
 0x385   :  { %v2948_v16 = vmax.f32 %v6787_v40, %v2909_v32  ;;  %v2911_v14 = vpop.f32.mrb[209].mxu0  ;;  %v4280_v40 = vld [vmem:[%s6917_s3 + $0x78] sm:$0xff] }
 0x386   :  { %v3545_v32 = vld [vmem:[%s6918_s5 + $0x18] sm:$0xff]  ;;  %v2674_v14 = vpop.permute.xlu1 %2673 }
 0x387   :  { %4152 = vmatpush1.bf16.msra.mxu1 %v6611_v20  ;;  %v4274_v20 = vld [vmem:[%s6917_s3 + $0x48] sm:$0xff] }
 0x388   :  { %v2914_v63 = vpop.f32.mrb[210].mxu0  ;;  %4138 = vmatprep.subr.bf16.mxu1 %v6959_v46 }
 0x389   :  { %v2949_v10 = vmax.f32 %v6790_v52, %v2914_v63  ;;  %v2916_v6 = vpop.f32.mrb[211].mxu0  ;;  %v4281_v52 = vld [vmem:[%s6917_s3 + $0x70] sm:$0xff] }
 0x38b   :  { %4153 = vmatpush1.bf16.msra.mxu1 %v6631_v44  ;;  %v4275_v44 = vld [vmem:[%s6917_s3 + $0x40] sm:$0xff] }
 0x38c   :  { %v2919_v29 = vpop.f32.mrb[212].mxu0  ;;  %4139 = vmatprep.subr.bf16.mxu1 %v6959_v46 }
 0x38d   :  { %v2950_v30 = vmax.f32 %v6794_v41, %v2919_v29  ;;  %v2921_v47 = vpop.f32.mrb[213].mxu0  ;;  %v3544_v41 = vld [vmem:[%s6918_s5 + $0x10] sm:$0xff] }
 0x38f   :  { %4154 = vmatpush1.bf16.msra.mxu1 %v6762_v38  ;;  %v4277_v38 = vld [vmem:[%s6917_s3 + $0x50] sm:$0xff] }
 0x390   :  { %4140 = vmatprep.subr.bf16.mxu1 %v6959_v46 }
 0x393   :  { %4155 = vmatpush1.bf16.msra.mxu1 %v6766_v56  ;;  %v4278_v56 = vld [vmem:[%s6917_s3 + $0x68] sm:$0xff] }
 0x394   :  { %4141 = vmatprep.subr.bf16.mxu1 %v6959_v46  ;;  %v4276_v46 = vld [vmem:[%s6917_s3 + $0x58] sm:$0xff] }
 0x397   :  { %4156 = vmatpush1.bf16.msra.mxu1 %v6770_v55  ;;  %v4279_v55 = vld [vmem:[%s6917_s3 + $0x60] sm:$0xff] }
 0x39a   :  { %2923 = vmatmul.mubr.f32.vlgmr.msra.gmra.mrb[178].mxu1 %v4273_v37 }
 0x39b   :  { %3536 = vmatprep.mubr.msk.f32.mxu1 %vm2257_vm4, %v4274_v20 }
 0x39e   :  { %2928 = vmatmul.mubr.f32.gmra.mrb[180].mxu1 %v4275_v44 }
 0x39f   :  { %3537 = vmatprep.mubr.msk.f32.mxu1 %vm2257_vm4, %v4276_v46 }
 0x3a2   :  { %2933 = vmatmul.mubr.f32.gmra.mrb[182].mxu1 %v4277_v38 }
 0x3a3   :  { %3538 = vmatprep.mubr.msk.f32.mxu1 %vm2257_vm4, %v4278_v56 }
 0x3a6   :  { %2938 = vmatmul.mubr.f32.gmra.mrb[184].mxu1 %v4279_v55 }
 0x3a7   :  { %3539 = vmatprep.mubr.msk.f32.mxu1 %vm2257_vm4, %v4280_v40 }
 0x3aa   :  { %2943 = vmatmul.mubr.f32.gmra.mrb[186].mxu1 %v4281_v52 }
 0x3ab   :  { %3585 = vmatprep.mubr.msk.f32.mxu1 %vm2584_vm13, %v3544_v41 }
 0x46d   :  { %v2924_v3 = vpop.f32.mrb[178].mxu1 }
 0x46e   :  { %v2951_v22 = vmax.f32 %v6799_v48, %v2924_v3  ;;  %v2926_v39 = vpop.f32.mrb[179].mxu1  ;;  %v3086_v3 = vld [vmem:[%s6919_s7] sm:$0x3] }
 0x471   :  { %v2929_v4 = vpop.f32.mrb[180].mxu1 }
 0x472   :  { %v2952_v26 = vmax.f32 %v6804_v27, %v2929_v4  ;;  %v2931_v35 = vpop.f32.mrb[181].mxu1 }
 0x474   :  { %v2956_v23 = vmax.f32 %v2948_v16, %v2952_v26  ;;  %v4285_v16 = vmov 0.0  }
 0x475   :  { %v2934_v31 = vpop.f32.mrb[182].mxu1  ;;  %3592 = vmatprep.mubr.msk.f32.mxu0 %vm4284_vm6, %v4285_v16 }
 0x476   :  { %v2960_v2 = vadd.f32 %v2956_v23, %v6792_v42  ;;  %v2953_v50 = vmax.f32 %v6809_v19, %v2934_v31  ;;  %v2936_v45 = vpop.f32.mrb[183].mxu1 }
 0x478   :  { %v2968_v62 = vmin.f32 %v2960_v2, 0.0  ;;  %v2957_v59 = vmax.f32 %v2949_v10, %v2953_v50  ;;  %vm2964_vm4 = vcmp.gt.f32.partialorder %v2960_v2, 0.0  ;;  %v2669_v10 = vpop.permute.xlu0 %2668 }
 0x479   :  { %v2939_v17 = vpop.f32.mrb[184].mxu1 }
 0x47a   :  { %v2972_v60 = vmul.f32 1.442695, %v2968_v62  ;;  %v2961_v11 = vadd.f32 %v2957_v59, %v6797_v8  ;;  %v2954_v48 = vmax.f32 %v6812_v12, %v2939_v17  ;;  %v2941_v7 = vpop.f32.mrb[185].mxu1 }
 0x47c   :  { %4259 = vpow2.f32 %v2972_v60  ;;  %v2969_v54 = vmin.f32 %v2961_v11, 0.0  ;;  %v2958_v27 = vmax.f32 %v2950_v30, %v2954_v48  ;;  %vm2965_vm2 = vcmp.gt.f32.partialorder %v2961_v11, 0.0 }
 0x47d   :  { %v2944_v0 = vpop.f32.mrb[186].mxu1 }
 0x47e   :  { %v2974_v28 = vmul.f32 1.442695, %v2969_v54  ;;  %v2962_v15 = vadd.f32 %v2958_v27, %v6802_v33  ;;  %v2955_v42 = vmax.f32 %v6814_v61, %v2944_v0  ;;  %v2946_v19 = vpop.f32.mrb[187].mxu1 }
 0x480   :  { %4261 = vpow2.f32 %v2974_v28  ;;  %v2970_v43 = vmin.f32 %v2962_v15, 0.0  ;;  %v2959_v49 = vmax.f32 %v2951_v22, %v2955_v42  ;;  %vm2966_vm3 = vcmp.gt.f32.partialorder %v2962_v15, 0.0  ;;  %v3091_v22 = vpop.permute.xlu0 %3090 }
 0x482   :  { %v2976_v5 = vmul.f32 1.442695, %v2970_v43  ;;  %v2963_v1 = vadd.f32 %v2959_v49, %v6807_v36 }
 0x484   :  { %4263 = vpow2.f32 %v2976_v5  ;;  %v2971_v8 = vmin.f32 %v2963_v1, 0.0  ;;  %vm2967_vm5 = vcmp.gt.f32.partialorder %v2963_v1, 0.0 }
 0x486   :  { %v4260_v12 = vpop.eup %4259  ;;  %v2978_v9 = vmul.f32 1.442695, %v2971_v8 }
 0x487   :  { %v3540_v13 = vadd.f32 -1.0, %v4260_v12 }
 0x488   :  { %4265 = vpow2.f32 %v2978_v9 }
 0x489   :  { %v2984_v33 = vsel %vm2964_vm4, %v2960_v2, %v3540_v13 }
 0x48a   :  { %v4262_v25 = vpop.eup %4261 }
 0x48b   :  { %v3541_v58 = vadd.f32 -1.0, %v4262_v25 }
 0x48d   :  { %v2985_v21 = vsel %vm2965_vm2, %v2961_v11, %v3541_v58 }
 0x48e   :  { %v4264_v61 = vpop.eup %4263  ;;  %v4116_v34 = vpack.c.bf16 %v2985_v21, %v2984_v33 }
 0x48f   :  { %v3542_v57 = vadd.f32 -1.0, %v4264_v61 }
 0x490   :  { %4117 = vmatprep.subr.bf16.mxu1 %v4116_v34 }
 0x491   :  { %4119 = vmatpush3.bf16.msra.mxu1 %v4116_v34  ;;  %v2986_v36 = vsel %vm2966_vm3, %v2962_v15, %v3542_v57 }
 0x492   :  { %v4266_v53 = vpop.eup %4265 }
 0x493   :  { %v3543_v18 = vadd.f32 -1.0, %v4266_v53 }
 0x495   :  { %v2987_v51 = vsel %vm2967_vm5, %v2963_v1, %v3543_v18 }
 0x496   :  { %v4120_v24 = vpack.c.bf16 %v2987_v51, %v2986_v36 }
 0x498   :  { %4121 = vmatprep.subr.bf16.mxu1 %v4120_v24 }
 0x499   :  { %4123 = vmatpush3.bf16.msra.mxu1 %v4120_v24 }
 0x49c   :  { %3586 = vmatmul.mubr.msk.f32.vlgmr.msra.gmra.mrb[176].mxu1 %vm2584_vm13, %v3545_v32 }
 0x56f   :  { %v3587_v63 = vpop.f32.mrb[176].mxu1 }
 0x570   :  { %v4157_v6 = vadd.f32 %v3587_v63, %v2674_v14  ;;  %v3063_v29 = vpop.f32.mrb[177].mxu1 }
 0x571   :  { %v4158_v30 = vadd.f32 %v3063_v29, %v2669_v10 }
 0x572   :  { %v3077_v47 = vmin.f32 %v4157_v6, 0.0  ;;  %vm3075_vm7 = vcmp.gt.f32.partialorder %v4157_v6, 0.0 }
 0x573   :  { %v3076_v37 = vmin.f32 %v4158_v30, 0.0  ;;  %vm3074_vm8 = vcmp.gt.f32.partialorder %v4158_v30, 0.0 }
 0x574   :  { %v3080_v20 = vmul.f32 1.442695, %v3077_v47 }
 0x575   :  { %v3078_v44 = vmul.f32 1.442695, %v3076_v37 }
 0x576   :  { %4267 = vpow2.f32 %v3080_v20 }
 0x577   :  { %4269 = vpow2.f32 %v3078_v44 }
 0x580   :  { %v4268_v46 = vpop.eup %4267 }
 0x581   :  { %v4270_v38 = vpop.eup %4269  ;;  %v3549_v56 = vadd.f32 -1.0, %v4268_v46 }
 0x582   :  { %v3548_v55 = vadd.f32 -1.0, %v4270_v38 }
 0x583   :  { %v3085_v40 = vsel %vm3075_vm7, %v4157_v6, %v3549_v56 }
 0x584   :  { %v3084_v52 = vsel %vm3074_vm8, %v4158_v30, %v3548_v55 }
 0x585   :  { %v4125_v41 = vpack.c.bf16 %v3085_v40, %v3084_v52 }
 0x587   :  { %4126 = vmatpush3.bf16.msra.mxu0 %v4125_v41 }
 0x58a   :  { %3593 = vmatmul.mubr.msk.f32.vlgmr.msra.gmra.mrb[214].mxu0 %vm3093_vm9, %v3086_v3 }
 0x65d   :  { %v3163_v39 = vpop.f32.mrb[214].mxu0 }
 0x65e   :  { %v3164_v4 = vadd.f32 %v3163_v39, %v3091_v22  ;;  %v3594_v26 = vpop.f32.mrb[215].mxu0 }
 0x660   :  { %3167 = vst [vmem:[%s6920_s9] sm:$0x3] %v3164_v4 }

</bundles_post_ra>
